<compile_context>
chip_gen: v5e
topology: v5e:2x2
jax: 0.10.0
libtpu: 0.0.40
codegen_flags: <defaults>
</compile_context>

<pallas_src>
import jax
import jax.numpy as jnp
from jax import lax
from jax.experimental import pallas as pl
from jax.experimental.pallas import tpu as pltpu


# ------------------------------ fused kernel --------------------------------

def _make_dss_kernel(C_in, out_ch, sr_ch, th, W):
    """Fused 3-head 3x3 conv + bias + channel-softmax epilogue for one row tile."""
    C_total = out_ch + sr_ch + 1
    taps = [(dy, dx) for dy in range(3) for dx in range(3)]
    aligned = (th % 8 == 0)          # row tile is either a multiple of 8 or == H

    def kernel(x_ref, w_ref, b_ref, mask_ref, sr_ref, bd_ref):
        # x_ref   : (1, C_in, H+2, W+2) VMEM  full zero-padded image (resident across t)
        # w_ref   : (C_total, C_in*9)   SMEM  fused 3x3 weights (scalars)
        # b_ref   : (C_total,)          SMEM  fused biases
        # mask_ref: (1, out_ch, th, W) ; sr_ref: (1, sr_ch, th, W) ; bd_ref: (1, 1, th, W)
        t = pl.program_id(1)
        row0 = t * th
        if aligned:
            row0 = pl.multiple_of(row0, 8)      # aligned sublane start for the slab load

        # One dynamic-row-slab load per tile; everything below is static VMEM slicing.
        slab = x_ref[0, :, pl.ds(row0, th + 2), :].astype(jnp.float32)  # (C_in, th+2, W+2)

        # In-kernel "im2col": 9 static shifted windows per input channel (VMEM only),
        # built once and reused by every output channel.
        win = [[slab[c, dy:dy + th, dx:dx + W] for (dy, dx) in taps]
               for c in range(C_in)]                                    # C_in x 9 of (th, W)

        # Fused conv for all heads: unrolled scalar-broadcast FMAs, bias in the init.
        logits = []
        for co in range(C_total):
            acc = jnp.full((th, W), b_ref[co], dtype=jnp.float32)
            for c in range(C_in):
                for k in range(9):
                    acc = acc + w_ref[co, c * 9 + k] * win[c][k]
            logits.append(acc)

        # Numerically stable softmax over the channel axis, fused as the epilogue
        # (exp lands on the EUP slot; exact reciprocal kept so results match XLA).
        def store_softmax(vals, o_ref):
            m = vals[0]
            for v in vals[1:]:
                m = jnp.maximum(m, v)
            es = [jnp.exp(v - m) for v in vals]
            s = es[0]
            for e in es[1:]:
                s = s + e
            inv = 1.0 / s
            for i, e in enumerate(es):
                o_ref[0, i, :, :] = (e * inv).astype(o_ref.dtype)

        store_softmax(logits[:out_ch], mask_ref)                # softmax(mask)
        store_softmax(logits[out_ch:out_ch + sr_ch], sr_ref)    # softmax(img_sr)
        bd_ref[0, 0, :, :] = logits[-1].astype(bd_ref.dtype)    # boundary passthrough

    return kernel


# ------------------------------ wrapper --------------------------------------

def _pick_row_tile(H, W, C_in, C_total, budget_bytes=4 << 20):
    """Largest multiple-of-8 divisor of H whose per-tile VMEM intermediates fit the budget."""
    # 27 shifted windows + C_total accumulators + softmax temps + double-buffered outputs.
    per_row_bytes = 4 * W * (C_in * 9 + 3 * C_total + 4)
    best = None
    for th in range(8, H + 1, 8):
        if H % th == 0 and th * per_row_bytes <= budget_bytes:
            best = th
    return best if best is not None else H


# TODO(synk): the DSS backbone (DSS(opt.inchannel, opt.outchannel)) is not defined in the
# reference source; a minimal deterministic 3-head 3x3-conv stand-in producing
# (mask, img_sr, boundary) with the correct channel counts is used instead.
def dss_trainer_forward(params, x):
    """DSSTrainer.forward: (softmax(mask), softmax(img_sr), boundary), one fused pallas_call."""
    N, C_in, H, W = x.shape
    out_ch = params["mask_w"].shape[0]
    sr_ch = params["sr_w"].shape[0]
    C_total = out_ch + sr_ch + 1
    Wp = W + 2

    th = _pick_row_tile(H, W, C_in, C_total)
    n_t = H // th

    # Only wrapper-side data movement: a single zero-pad of the input.  The padded
    # image is DMA'd into VMEM once per batch element by the auto-pipeline (its block
    # index is constant along the row-tile axis) and sliced in-kernel.
    xp = jnp.pad(x, ((0, 0), (0, 0), (1, 1), (1, 1)))

    # Fuse the three heads into one weight / bias table (SMEM scalars).
    w_all = jnp.concatenate(
        [params["mask_w"], params["sr_w"], params["bd_w"]], axis=0
    ).reshape(C_total, C_in * 9).astype(jnp.float32)
    b_all = jnp.concatenate(
        [params["mask_b"], params["sr_b"], params["bd_b"]], axis=0
    ).astype(jnp.float32)

    kernel = _make_dss_kernel(C_in, out_ch, sr_ch, th, W)

    mask_p, sr_p, boundary = pl.pallas_call(
        kernel,
        out_shape=(
            jax.ShapeDtypeStruct((N, out_ch, H, W), x.dtype),
            jax.ShapeDtypeStruct((N, sr_ch, H, W), x.dtype),
            jax.ShapeDtypeStruct((N, 1, H, W), x.dtype),
        ),
        grid=(N, n_t),
        in_specs=[
            # Full padded image per batch element; index ignores t -> fetched once per n.
            pl.BlockSpec((1, C_in, H + 2, Wp), lambda n, t: (n, 0, 0, 0)),
            pl.BlockSpec(memory_space=pltpu.MemorySpace.SMEM),
            pl.BlockSpec(memory_space=pltpu.MemorySpace.SMEM),
        ],
        out_specs=(
            pl.BlockSpec((1, out_ch, th, W), lambda n, t: (n, 0, t, 0)),
            pl.BlockSpec((1, sr_ch, th, W), lambda n, t: (n, 0, t, 0)),
            pl.BlockSpec((1, 1, th, W), lambda n, t: (n, 0, t, 0)),
        ),
        compiler_params=pltpu.CompilerParams(
            dimension_semantics=("parallel", "parallel"),
        ),
    )(xp, w_all, b_all)

    return mask_p, sr_p, boundary


# ---------------------------------- main --------------------------------------

if __name__ == "__main__":
    key = jax.random.PRNGKey(0)
    kx, k1, k2, k3 = jax.random.split(key, 4)

    N, C_in, C_out, H, W = 2, 3, 2, 16, 16      # opt.inchannel=3, opt.outchannel=2
    x = jax.random.normal(kx, (N, C_in, H, W), dtype=jnp.float32)
    scale = 0.1
    params = {
        "mask_w": scale * jax.random.normal(k1, (C_out, C_in, 3, 3), jnp.float32),
        "mask_b": jnp.zeros((C_out,), jnp.float32),
        "sr_w":   scale * jax.random.normal(k2, (C_in, C_in, 3, 3), jnp.float32),
        "sr_b":   jnp.zeros((C_in,), jnp.float32),
        "bd_w":   scale * jax.random.normal(k3, (1, C_in, 3, 3), jnp.float32),
        "bd_b":   jnp.zeros((1,), jnp.float32),
    }

    mask_p, sr_p, boundary = jax.jit(dss_trainer_forward)(params, x)
    jax.block_until_ready((mask_p, sr_p, boundary))

    # Pure-JAX reference (XLA conv + softmax) for correctness.
    def conv_ref(inp, w, b):
        y = lax.conv_general_dilated(
            inp, w, window_strides=(1, 1), padding=((1, 1), (1, 1)),
            dimension_numbers=("NCHW", "OIHW", "NCHW"))
        return y + b[None, :, None, None]

    mask_want = jax.nn.softmax(conv_ref(x, params["mask_w"], params["mask_b"]), axis=1)
    sr_want = jax.nn.softmax(conv_ref(x, params["sr_w"], params["sr_b"]), axis=1)
    bd_want = conv_ref(x, params["bd_w"], params["bd_b"])

    assert mask_p.shape == (N, C_out, H, W)
    assert sr_p.shape == (N, C_in, H, W)
    assert boundary.shape == (N, 1, H, W)
    assert jnp.allclose(jnp.sum(mask_p, axis=1), 1.0, atol=1e-4)
    assert jnp.allclose(jnp.sum(sr_p, axis=1), 1.0, atol=1e-4)
    assert jnp.allclose(mask_p, mask_want, atol=1e-5, rtol=1e-5)
    assert jnp.allclose(sr_p, sr_want, atol=1e-5, rtol=1e-5)
    assert jnp.allclose(boundary, bd_want, atol=1e-5, rtol=1e-5)

    print("KERNEL_OK")
</pallas_src>

<mosaic_0001>
module attributes {stable_mosaic.version = 11 : i64} {
  func.func @kernel(%arg0: i32, %arg1: i32, %arg2: memref<1x3x18x18xf32, #tpu.memory_space<vmem>>, %arg3: memref<6x27xf32, #tpu.memory_space<smem>>, %arg4: memref<6xf32, #tpu.memory_space<smem>>, %arg5: memref<1x2x16x16xf32, #tpu.memory_space<vmem>>, %arg6: memref<1x3x16x16xf32, #tpu.memory_space<vmem>>, %arg7: memref<1x1x16x16xf32, #tpu.memory_space<vmem>>) attributes {dimension_semantics = [#tpu.dimension_semantics<parallel>, #tpu.dimension_semantics<parallel>], iteration_bounds = array<i64: 2, 1>, scalar_prefetch = 0 : i64, scratch_operands = 0 : i64, tpu.core_type = #tpu.core_type<tc>, window_params = [{transform_indices = @transform_0, window_bounds = array<i64: 1, 3, 18, 18>}, {transform_indices = @transform_1, window_bounds = array<i64: 6, 27>}, {transform_indices = @transform_2, window_bounds = array<i64: 6>}, {transform_indices = @transform_3, window_bounds = array<i64: 1, 2, 16, 16>}, {transform_indices = @transform_4, window_bounds = array<i64: 1, 3, 16, 16>}, {transform_indices = @transform_5, window_bounds = array<i64: 1, 1, 16, 16>}]} {
    %c16_i32 = arith.constant 16 : i32
    %0 = arith.muli %arg1, %c16_i32 : i32
    %1 = tpu.assume_multiple %0, 8 : i32
    %c0 = arith.constant 0 : index
    %c0_0 = arith.constant 0 : index
    %2 = arith.index_cast %1 : i32 to index
    %c0_1 = arith.constant 0 : index
    %3 = vector.load %arg2[%c0, %c0_0, %2, %c0_1] : memref<1x3x18x18xf32, #tpu.memory_space<vmem>>, vector<1x3x18x18xf32>
    %4 = vector.shape_cast %3 : vector<1x3x18x18xf32> to vector<3x18x18xf32>
    %5 = vector.extract_strided_slice %4 {offsets = [0, 0, 0], sizes = [1, 16, 16], strides = [1, 1, 1]} : vector<3x18x18xf32> to vector<1x16x16xf32>
    %6 = vector.shape_cast %5 : vector<1x16x16xf32> to vector<16x16xf32>
    %7 = vector.extract_strided_slice %4 {offsets = [0, 0, 1], sizes = [1, 16, 16], strides = [1, 1, 1]} : vector<3x18x18xf32> to vector<1x16x16xf32>
    %8 = vector.shape_cast %7 : vector<1x16x16xf32> to vector<16x16xf32>
    %9 = vector.extract_strided_slice %4 {offsets = [0, 0, 2], sizes = [1, 16, 16], strides = [1, 1, 1]} : vector<3x18x18xf32> to vector<1x16x16xf32>
    %10 = vector.shape_cast %9 : vector<1x16x16xf32> to vector<16x16xf32>
    %11 = vector.extract_strided_slice %4 {offsets = [0, 1, 0], sizes = [1, 16, 16], strides = [1, 1, 1]} : vector<3x18x18xf32> to vector<1x16x16xf32>
    %12 = vector.shape_cast %11 : vector<1x16x16xf32> to vector<16x16xf32>
    %13 = vector.extract_strided_slice %4 {offsets = [0, 1, 1], sizes = [1, 16, 16], strides = [1, 1, 1]} : vector<3x18x18xf32> to vector<1x16x16xf32>
    %14 = vector.shape_cast %13 : vector<1x16x16xf32> to vector<16x16xf32>
    %15 = vector.extract_strided_slice %4 {offsets = [0, 1, 2], sizes = [1, 16, 16], strides = [1, 1, 1]} : vector<3x18x18xf32> to vector<1x16x16xf32>
    %16 = vector.shape_cast %15 : vector<1x16x16xf32> to vector<16x16xf32>
    %17 = vector.extract_strided_slice %4 {offsets = [0, 2, 0], sizes = [1, 16, 16], strides = [1, 1, 1]} : vector<3x18x18xf32> to vector<1x16x16xf32>
    %18 = vector.shape_cast %17 : vector<1x16x16xf32> to vector<16x16xf32>
    %19 = vector.extract_strided_slice %4 {offsets = [0, 2, 1], sizes = [1, 16, 16], strides = [1, 1, 1]} : vector<3x18x18xf32> to vector<1x16x16xf32>
    %20 = vector.shape_cast %19 : vector<1x16x16xf32> to vector<16x16xf32>
    %21 = vector.extract_strided_slice %4 {offsets = [0, 2, 2], sizes = [1, 16, 16], strides = [1, 1, 1]} : vector<3x18x18xf32> to vector<1x16x16xf32>
    %22 = vector.shape_cast %21 : vector<1x16x16xf32> to vector<16x16xf32>
    %23 = vector.extract_strided_slice %4 {offsets = [1, 0, 0], sizes = [1, 16, 16], strides = [1, 1, 1]} : vector<3x18x18xf32> to vector<1x16x16xf32>
    %24 = vector.shape_cast %23 : vector<1x16x16xf32> to vector<16x16xf32>
    %25 = vector.extract_strided_slice %4 {offsets = [1, 0, 1], sizes = [1, 16, 16], strides = [1, 1, 1]} : vector<3x18x18xf32> to vector<1x16x16xf32>
    %26 = vector.shape_cast %25 : vector<1x16x16xf32> to vector<16x16xf32>
    %27 = vector.extract_strided_slice %4 {offsets = [1, 0, 2], sizes = [1, 16, 16], strides = [1, 1, 1]} : vector<3x18x18xf32> to vector<1x16x16xf32>
    %28 = vector.shape_cast %27 : vector<1x16x16xf32> to vector<16x16xf32>
    %29 = vector.extract_strided_slice %4 {offsets = [1, 1, 0], sizes = [1, 16, 16], strides = [1, 1, 1]} : vector<3x18x18xf32> to vector<1x16x16xf32>
    %30 = vector.shape_cast %29 : vector<1x16x16xf32> to vector<16x16xf32>
    %31 = vector.extract_strided_slice %4 {offsets = [1, 1, 1], sizes = [1, 16, 16], strides = [1, 1, 1]} : vector<3x18x18xf32> to vector<1x16x16xf32>
    %32 = vector.shape_cast %31 : vector<1x16x16xf32> to vector<16x16xf32>
    %33 = vector.extract_strided_slice %4 {offsets = [1, 1, 2], sizes = [1, 16, 16], strides = [1, 1, 1]} : vector<3x18x18xf32> to vector<1x16x16xf32>
    %34 = vector.shape_cast %33 : vector<1x16x16xf32> to vector<16x16xf32>
    %35 = vector.extract_strided_slice %4 {offsets = [1, 2, 0], sizes = [1, 16, 16], strides = [1, 1, 1]} : vector<3x18x18xf32> to vector<1x16x16xf32>
    %36 = vector.shape_cast %35 : vector<1x16x16xf32> to vector<16x16xf32>
    %37 = vector.extract_strided_slice %4 {offsets = [1, 2, 1], sizes = [1, 16, 16], strides = [1, 1, 1]} : vector<3x18x18xf32> to vector<1x16x16xf32>
    %38 = vector.shape_cast %37 : vector<1x16x16xf32> to vector<16x16xf32>
    %39 = vector.extract_strided_slice %4 {offsets = [1, 2, 2], sizes = [1, 16, 16], strides = [1, 1, 1]} : vector<3x18x18xf32> to vector<1x16x16xf32>
    %40 = vector.shape_cast %39 : vector<1x16x16xf32> to vector<16x16xf32>
    %41 = vector.extract_strided_slice %4 {offsets = [2, 0, 0], sizes = [1, 16, 16], strides = [1, 1, 1]} : vector<3x18x18xf32> to vector<1x16x16xf32>
    %42 = vector.shape_cast %41 : vector<1x16x16xf32> to vector<16x16xf32>
    %43 = vector.extract_strided_slice %4 {offsets = [2, 0, 1], sizes = [1, 16, 16], strides = [1, 1, 1]} : vector<3x18x18xf32> to vector<1x16x16xf32>
    %44 = vector.shape_cast %43 : vector<1x16x16xf32> to vector<16x16xf32>
    %45 = vector.extract_strided_slice %4 {offsets = [2, 0, 2], sizes = [1, 16, 16], strides = [1, 1, 1]} : vector<3x18x18xf32> to vector<1x16x16xf32>
    %46 = vector.shape_cast %45 : vector<1x16x16xf32> to vector<16x16xf32>
    %47 = vector.extract_strided_slice %4 {offsets = [2, 1, 0], sizes = [1, 16, 16], strides = [1, 1, 1]} : vector<3x18x18xf32> to vector<1x16x16xf32>
    %48 = vector.shape_cast %47 : vector<1x16x16xf32> to vector<16x16xf32>
    %49 = vector.extract_strided_slice %4 {offsets = [2, 1, 1], sizes = [1, 16, 16], strides = [1, 1, 1]} : vector<3x18x18xf32> to vector<1x16x16xf32>
    %50 = vector.shape_cast %49 : vector<1x16x16xf32> to vector<16x16xf32>
    %51 = vector.extract_strided_slice %4 {offsets = [2, 1, 2], sizes = [1, 16, 16], strides = [1, 1, 1]} : vector<3x18x18xf32> to vector<1x16x16xf32>
    %52 = vector.shape_cast %51 : vector<1x16x16xf32> to vector<16x16xf32>
    %53 = vector.extract_strided_slice %4 {offsets = [2, 2, 0], sizes = [1, 16, 16], strides = [1, 1, 1]} : vector<3x18x18xf32> to vector<1x16x16xf32>
    %54 = vector.shape_cast %53 : vector<1x16x16xf32> to vector<16x16xf32>
    %55 = vector.extract_strided_slice %4 {offsets = [2, 2, 1], sizes = [1, 16, 16], strides = [1, 1, 1]} : vector<3x18x18xf32> to vector<1x16x16xf32>
    %56 = vector.shape_cast %55 : vector<1x16x16xf32> to vector<16x16xf32>
    %57 = vector.extract_strided_slice %4 {offsets = [2, 2, 2], sizes = [1, 16, 16], strides = [1, 1, 1]} : vector<3x18x18xf32> to vector<1x16x16xf32>
    %58 = vector.shape_cast %57 : vector<1x16x16xf32> to vector<16x16xf32>
    %c0_2 = arith.constant 0 : index
    %59 = memref.load %arg4[%c0_2] : memref<6xf32, #tpu.memory_space<smem>>
    %60 = vector.broadcast %59 : f32 to vector<16x16xf32>
    %c0_3 = arith.constant 0 : index
    %c0_4 = arith.constant 0 : index
    %61 = memref.load %arg3[%c0_3, %c0_4] : memref<6x27xf32, #tpu.memory_space<smem>>
    %62 = vector.broadcast %61 : f32 to vector<16x16xf32>
    %63 = arith.mulf %62, %6 : vector<16x16xf32>
    %64 = arith.addf %60, %63 : vector<16x16xf32>
    %c0_5 = arith.constant 0 : index
    %c1 = arith.constant 1 : index
    %65 = memref.load %arg3[%c0_5, %c1] : memref<6x27xf32, #tpu.memory_space<smem>>
    %66 = vector.broadcast %65 : f32 to vector<16x16xf32>
    %67 = arith.mulf %66, %8 : vector<16x16xf32>
    %68 = arith.addf %64, %67 : vector<16x16xf32>
    %c0_6 = arith.constant 0 : index
    %c2 = arith.constant 2 : index
    %69 = memref.load %arg3[%c0_6, %c2] : memref<6x27xf32, #tpu.memory_space<smem>>
    %70 = vector.broadcast %69 : f32 to vector<16x16xf32>
    %71 = arith.mulf %70, %10 : vector<16x16xf32>
    %72 = arith.addf %68, %71 : vector<16x16xf32>
    %c0_7 = arith.constant 0 : index
    %c3 = arith.constant 3 : index
    %73 = memref.load %arg3[%c0_7, %c3] : memref<6x27xf32, #tpu.memory_space<smem>>
    %74 = vector.broadcast %73 : f32 to vector<16x16xf32>
    %75 = arith.mulf %74, %12 : vector<16x16xf32>
    %76 = arith.addf %72, %75 : vector<16x16xf32>
    %c0_8 = arith.constant 0 : index
    %c4 = arith.constant 4 : index
    %77 = memref.load %arg3[%c0_8, %c4] : memref<6x27xf32, #tpu.memory_space<smem>>
    %78 = vector.broadcast %77 : f32 to vector<16x16xf32>
    %79 = arith.mulf %78, %14 : vector<16x16xf32>
    %80 = arith.addf %76, %79 : vector<16x16xf32>
    %c0_9 = arith.constant 0 : index
    %c5 = arith.constant 5 : index
    %81 = memref.load %arg3[%c0_9, %c5] : memref<6x27xf32, #tpu.memory_space<smem>>
    %82 = vector.broadcast %81 : f32 to vector<16x16xf32>
    %83 = arith.mulf %82, %16 : vector<16x16xf32>
    %84 = arith.addf %80, %83 : vector<16x16xf32>
    %c0_10 = arith.constant 0 : index
    %c6 = arith.constant 6 : index
    %85 = memref.load %arg3[%c0_10, %c6] : memref<6x27xf32, #tpu.memory_space<smem>>
    %86 = vector.broadcast %85 : f32 to vector<16x16xf32>
    %87 = arith.mulf %86, %18 : vector<16x16xf32>
    %88 = arith.addf %84, %87 : vector<16x16xf32>
    %c0_11 = arith.constant 0 : index
    %c7 = arith.constant 7 : index
    %89 = memref.load %arg3[%c0_11, %c7] : memref<6x27xf32, #tpu.memory_space<smem>>
    %90 = vector.broadcast %89 : f32 to vector<16x16xf32>
    %91 = arith.mulf %90, %20 : vector<16x16xf32>
    %92 = arith.addf %88, %91 : vector<16x16xf32>
    %c0_12 = arith.constant 0 : index
    %c8 = arith.constant 8 : index
    %93 = memref.load %arg3[%c0_12, %c8] : memref<6x27xf32, #tpu.memory_space<smem>>
    %94 = vector.broadcast %93 : f32 to vector<16x16xf32>
    %95 = arith.mulf %94, %22 : vector<16x16xf32>
    %96 = arith.addf %92, %95 : vector<16x16xf32>
    %c0_13 = arith.constant 0 : index
    %c9 = arith.constant 9 : index
    %97 = memref.load %arg3[%c0_13, %c9] : memref<6x27xf32, #tpu.memory_space<smem>>
    %98 = vector.broadcast %97 : f32 to vector<16x16xf32>
    %99 = arith.mulf %98, %24 : vector<16x16xf32>
    %100 = arith.addf %96, %99 : vector<16x16xf32>
    %c0_14 = arith.constant 0 : index
    %c10 = arith.constant 10 : index
    %101 = memref.load %arg3[%c0_14, %c10] : memref<6x27xf32, #tpu.memory_space<smem>>
    %102 = vector.broadcast %101 : f32 to vector<16x16xf32>
    %103 = arith.mulf %102, %26 : vector<16x16xf32>
    %104 = arith.addf %100, %103 : vector<16x16xf32>
    %c0_15 = arith.constant 0 : index
    %c11 = arith.constant 11 : index
    %105 = memref.load %arg3[%c0_15, %c11] : memref<6x27xf32, #tpu.memory_space<smem>>
    %106 = vector.broadcast %105 : f32 to vector<16x16xf32>
    %107 = arith.mulf %106, %28 : vector<16x16xf32>
    %108 = arith.addf %104, %107 : vector<16x16xf32>
    %c0_16 = arith.constant 0 : index
    %c12 = arith.constant 12 : index
    %109 = memref.load %arg3[%c0_16, %c12] : memref<6x27xf32, #tpu.memory_space<smem>>
    %110 = vector.broadcast %109 : f32 to vector<16x16xf32>
    %111 = arith.mulf %110, %30 : vector<16x16xf32>
    %112 = arith.addf %108, %111 : vector<16x16xf32>
    %c0_17 = arith.constant 0 : index
    %c13 = arith.constant 13 : index
    %113 = memref.load %arg3[%c0_17, %c13] : memref<6x27xf32, #tpu.memory_space<smem>>
    %114 = vector.broadcast %113 : f32 to vector<16x16xf32>
    %115 = arith.mulf %114, %32 : vector<16x16xf32>
    %116 = arith.addf %112, %115 : vector<16x16xf32>
    %c0_18 = arith.constant 0 : index
    %c14 = arith.constant 14 : index
    %117 = memref.load %arg3[%c0_18, %c14] : memref<6x27xf32, #tpu.memory_space<smem>>
    %118 = vector.broadcast %117 : f32 to vector<16x16xf32>
    %119 = arith.mulf %118, %34 : vector<16x16xf32>
    %120 = arith.addf %116, %119 : vector<16x16xf32>
    %c0_19 = arith.constant 0 : index
    %c15 = arith.constant 15 : index
    %121 = memref.load %arg3[%c0_19, %c15] : memref<6x27xf32, #tpu.memory_space<smem>>
    %122 = vector.broadcast %121 : f32 to vector<16x16xf32>
    %123 = arith.mulf %122, %36 : vector<16x16xf32>
    %124 = arith.addf %120, %123 : vector<16x16xf32>
    %c0_20 = arith.constant 0 : index
    %c16 = arith.constant 16 : index
    %125 = memref.load %arg3[%c0_20, %c16] : memref<6x27xf32, #tpu.memory_space<smem>>
    %126 = vector.broadcast %125 : f32 to vector<16x16xf32>
    %127 = arith.mulf %126, %38 : vector<16x16xf32>
    %128 = arith.addf %124, %127 : vector<16x16xf32>
    %c0_21 = arith.constant 0 : index
    %c17 = arith.constant 17 : index
    %129 = memref.load %arg3[%c0_21, %c17] : memref<6x27xf32, #tpu.memory_space<smem>>
    %130 = vector.broadcast %129 : f32 to vector<16x16xf32>
    %131 = arith.mulf %130, %40 : vector<16x16xf32>
    %132 = arith.addf %128, %131 : vector<16x16xf32>
    %c0_22 = arith.constant 0 : index
    %c18 = arith.constant 18 : index
    %133 = memref.load %arg3[%c0_22, %c18] : memref<6x27xf32, #tpu.memory_space<smem>>
    %134 = vector.broadcast %133 : f32 to vector<16x16xf32>
    %135 = arith.mulf %134, %42 : vector<16x16xf32>
    %136 = arith.addf %132, %135 : vector<16x16xf32>
    %c0_23 = arith.constant 0 : index
    %c19 = arith.constant 19 : index
    %137 = memref.load %arg3[%c0_23, %c19] : memref<6x27xf32, #tpu.memory_space<smem>>
    %138 = vector.broadcast %137 : f32 to vector<16x16xf32>
    %139 = arith.mulf %138, %44 : vector<16x16xf32>
    %140 = arith.addf %136, %139 : vector<16x16xf32>
    %c0_24 = arith.constant 0 : index
    %c20 = arith.constant 20 : index
    %141 = memref.load %arg3[%c0_24, %c20] : memref<6x27xf32, #tpu.memory_space<smem>>
    %142 = vector.broadcast %141 : f32 to vector<16x16xf32>
    %143 = arith.mulf %142, %46 : vector<16x16xf32>
    %144 = arith.addf %140, %143 : vector<16x16xf32>
    %c0_25 = arith.constant 0 : index
    %c21 = arith.constant 21 : index
    %145 = memref.load %arg3[%c0_25, %c21] : memref<6x27xf32, #tpu.memory_space<smem>>
    %146 = vector.broadcast %145 : f32 to vector<16x16xf32>
    %147 = arith.mulf %146, %48 : vector<16x16xf32>
    %148 = arith.addf %144, %147 : vector<16x16xf32>
    %c0_26 = arith.constant 0 : index
    %c22 = arith.constant 22 : index
    %149 = memref.load %arg3[%c0_26, %c22] : memref<6x27xf32, #tpu.memory_space<smem>>
    %150 = vector.broadcast %149 : f32 to vector<16x16xf32>
    %151 = arith.mulf %150, %50 : vector<16x16xf32>
    %152 = arith.addf %148, %151 : vector<16x16xf32>
    %c0_27 = arith.constant 0 : index
    %c23 = arith.constant 23 : index
    %153 = memref.load %arg3[%c0_27, %c23] : memref<6x27xf32, #tpu.memory_space<smem>>
    %154 = vector.broadcast %153 : f32 to vector<16x16xf32>
    %155 = arith.mulf %154, %52 : vector<16x16xf32>
    %156 = arith.addf %152, %155 : vector<16x16xf32>
    %c0_28 = arith.constant 0 : index
    %c24 = arith.constant 24 : index
    %157 = memref.load %arg3[%c0_28, %c24] : memref<6x27xf32, #tpu.memory_space<smem>>
    %158 = vector.broadcast %157 : f32 to vector<16x16xf32>
    %159 = arith.mulf %158, %54 : vector<16x16xf32>
    %160 = arith.addf %156, %159 : vector<16x16xf32>
    %c0_29 = arith.constant 0 : index
    %c25 = arith.constant 25 : index
    %161 = memref.load %arg3[%c0_29, %c25] : memref<6x27xf32, #tpu.memory_space<smem>>
    %162 = vector.broadcast %161 : f32 to vector<16x16xf32>
    %163 = arith.mulf %162, %56 : vector<16x16xf32>
    %164 = arith.addf %160, %163 : vector<16x16xf32>
    %c0_30 = arith.constant 0 : index
    %c26 = arith.constant 26 : index
    %165 = memref.load %arg3[%c0_30, %c26] : memref<6x27xf32, #tpu.memory_space<smem>>
    %166 = vector.broadcast %165 : f32 to vector<16x16xf32>
    %167 = arith.mulf %166, %58 : vector<16x16xf32>
    %168 = arith.addf %164, %167 : vector<16x16xf32>
    %c1_31 = arith.constant 1 : index
    %169 = memref.load %arg4[%c1_31] : memref<6xf32, #tpu.memory_space<smem>>
    %170 = vector.broadcast %169 : f32 to vector<16x16xf32>
    %c1_32 = arith.constant 1 : index
    %c0_33 = arith.constant 0 : index
    %171 = memref.load %arg3[%c1_32, %c0_33] : memref<6x27xf32, #tpu.memory_space<smem>>
    %172 = vector.broadcast %171 : f32 to vector<16x16xf32>
    %173 = arith.mulf %172, %6 : vector<16x16xf32>
    %174 = arith.addf %170, %173 : vector<16x16xf32>
    %c1_34 = arith.constant 1 : index
    %c1_35 = arith.constant 1 : index
    %175 = memref.load %arg3[%c1_34, %c1_35] : memref<6x27xf32, #tpu.memory_space<smem>>
    %176 = vector.broadcast %175 : f32 to vector<16x16xf32>
    %177 = arith.mulf %176, %8 : vector<16x16xf32>
    %178 = arith.addf %174, %177 : vector<16x16xf32>
    %c1_36 = arith.constant 1 : index
    %c2_37 = arith.constant 2 : index
    %179 = memref.load %arg3[%c1_36, %c2_37] : memref<6x27xf32, #tpu.memory_space<smem>>
    %180 = vector.broadcast %179 : f32 to vector<16x16xf32>
    %181 = arith.mulf %180, %10 : vector<16x16xf32>
    %182 = arith.addf %178, %181 : vector<16x16xf32>
    %c1_38 = arith.constant 1 : index
    %c3_39 = arith.constant 3 : index
    %183 = memref.load %arg3[%c1_38, %c3_39] : memref<6x27xf32, #tpu.memory_space<smem>>
    %184 = vector.broadcast %183 : f32 to vector<16x16xf32>
    %185 = arith.mulf %184, %12 : vector<16x16xf32>
    %186 = arith.addf %182, %185 : vector<16x16xf32>
    %c1_40 = arith.constant 1 : index
    %c4_41 = arith.constant 4 : index
    %187 = memref.load %arg3[%c1_40, %c4_41] : memref<6x27xf32, #tpu.memory_space<smem>>
    %188 = vector.broadcast %187 : f32 to vector<16x16xf32>
    %189 = arith.mulf %188, %14 : vector<16x16xf32>
    %190 = arith.addf %186, %189 : vector<16x16xf32>
    %c1_42 = arith.constant 1 : index
    %c5_43 = arith.constant 5 : index
    %191 = memref.load %arg3[%c1_42, %c5_43] : memref<6x27xf32, #tpu.memory_space<smem>>
    %192 = vector.broadcast %191 : f32 to vector<16x16xf32>
    %193 = arith.mulf %192, %16 : vector<16x16xf32>
    %194 = arith.addf %190, %193 : vector<16x16xf32>
    %c1_44 = arith.constant 1 : index
    %c6_45 = arith.constant 6 : index
    %195 = memref.load %arg3[%c1_44, %c6_45] : memref<6x27xf32, #tpu.memory_space<smem>>
    %196 = vector.broadcast %195 : f32 to vector<16x16xf32>
    %197 = arith.mulf %196, %18 : vector<16x16xf32>
    %198 = arith.addf %194, %197 : vector<16x16xf32>
    %c1_46 = arith.constant 1 : index
    %c7_47 = arith.constant 7 : index
    %199 = memref.load %arg3[%c1_46, %c7_47] : memref<6x27xf32, #tpu.memory_space<smem>>
    %200 = vector.broadcast %199 : f32 to vector<16x16xf32>
    %201 = arith.mulf %200, %20 : vector<16x16xf32>
    %202 = arith.addf %198, %201 : vector<16x16xf32>
    %c1_48 = arith.constant 1 : index
    %c8_49 = arith.constant 8 : index
    %203 = memref.load %arg3[%c1_48, %c8_49] : memref<6x27xf32, #tpu.memory_space<smem>>
    %204 = vector.broadcast %203 : f32 to vector<16x16xf32>
    %205 = arith.mulf %204, %22 : vector<16x16xf32>
    %206 = arith.addf %202, %205 : vector<16x16xf32>
    %c1_50 = arith.constant 1 : index
    %c9_51 = arith.constant 9 : index
    %207 = memref.load %arg3[%c1_50, %c9_51] : memref<6x27xf32, #tpu.memory_space<smem>>
    %208 = vector.broadcast %207 : f32 to vector<16x16xf32>
    %209 = arith.mulf %208, %24 : vector<16x16xf32>
    %210 = arith.addf %206, %209 : vector<16x16xf32>
    %c1_52 = arith.constant 1 : index
    %c10_53 = arith.constant 10 : index
    %211 = memref.load %arg3[%c1_52, %c10_53] : memref<6x27xf32, #tpu.memory_space<smem>>
    %212 = vector.broadcast %211 : f32 to vector<16x16xf32>
    %213 = arith.mulf %212, %26 : vector<16x16xf32>
    %214 = arith.addf %210, %213 : vector<16x16xf32>
    %c1_54 = arith.constant 1 : index
    %c11_55 = arith.constant 11 : index
    %215 = memref.load %arg3[%c1_54, %c11_55] : memref<6x27xf32, #tpu.memory_space<smem>>
    %216 = vector.broadcast %215 : f32 to vector<16x16xf32>
    %217 = arith.mulf %216, %28 : vector<16x16xf32>
    %218 = arith.addf %214, %217 : vector<16x16xf32>
    %c1_56 = arith.constant 1 : index
    %c12_57 = arith.constant 12 : index
    %219 = memref.load %arg3[%c1_56, %c12_57] : memref<6x27xf32, #tpu.memory_space<smem>>
    %220 = vector.broadcast %219 : f32 to vector<16x16xf32>
    %221 = arith.mulf %220, %30 : vector<16x16xf32>
    %222 = arith.addf %218, %221 : vector<16x16xf32>
    %c1_58 = arith.constant 1 : index
    %c13_59 = arith.constant 13 : index
    %223 = memref.load %arg3[%c1_58, %c13_59] : memref<6x27xf32, #tpu.memory_space<smem>>
    %224 = vector.broadcast %223 : f32 to vector<16x16xf32>
    %225 = arith.mulf %224, %32 : vector<16x16xf32>
    %226 = arith.addf %222, %225 : vector<16x16xf32>
    %c1_60 = arith.constant 1 : index
    %c14_61 = arith.constant 14 : index
    %227 = memref.load %arg3[%c1_60, %c14_61] : memref<6x27xf32, #tpu.memory_space<smem>>
    %228 = vector.broadcast %227 : f32 to vector<16x16xf32>
    %229 = arith.mulf %228, %34 : vector<16x16xf32>
    %230 = arith.addf %226, %229 : vector<16x16xf32>
    %c1_62 = arith.constant 1 : index
    %c15_63 = arith.constant 15 : index
    %231 = memref.load %arg3[%c1_62, %c15_63] : memref<6x27xf32, #tpu.memory_space<smem>>
    %232 = vector.broadcast %231 : f32 to vector<16x16xf32>
    %233 = arith.mulf %232, %36 : vector<16x16xf32>
    %234 = arith.addf %230, %233 : vector<16x16xf32>
    %c1_64 = arith.constant 1 : index
    %c16_65 = arith.constant 16 : index
    %235 = memref.load %arg3[%c1_64, %c16_65] : memref<6x27xf32, #tpu.memory_space<smem>>
    %236 = vector.broadcast %235 : f32 to vector<16x16xf32>
    %237 = arith.mulf %236, %38 : vector<16x16xf32>
    %238 = arith.addf %234, %237 : vector<16x16xf32>
    %c1_66 = arith.constant 1 : index
    %c17_67 = arith.constant 17 : index
    %239 = memref.load %arg3[%c1_66, %c17_67] : memref<6x27xf32, #tpu.memory_space<smem>>
    %240 = vector.broadcast %239 : f32 to vector<16x16xf32>
    %241 = arith.mulf %240, %40 : vector<16x16xf32>
    %242 = arith.addf %238, %241 : vector<16x16xf32>
    %c1_68 = arith.constant 1 : index
    %c18_69 = arith.constant 18 : index
    %243 = memref.load %arg3[%c1_68, %c18_69] : memref<6x27xf32, #tpu.memory_space<smem>>
    %244 = vector.broadcast %243 : f32 to vector<16x16xf32>
    %245 = arith.mulf %244, %42 : vector<16x16xf32>
    %246 = arith.addf %242, %245 : vector<16x16xf32>
    %c1_70 = arith.constant 1 : index
    %c19_71 = arith.constant 19 : index
    %247 = memref.load %arg3[%c1_70, %c19_71] : memref<6x27xf32, #tpu.memory_space<smem>>
    %248 = vector.broadcast %247 : f32 to vector<16x16xf32>
    %249 = arith.mulf %248, %44 : vector<16x16xf32>
    %250 = arith.addf %246, %249 : vector<16x16xf32>
    %c1_72 = arith.constant 1 : index
    %c20_73 = arith.constant 20 : index
    %251 = memref.load %arg3[%c1_72, %c20_73] : memref<6x27xf32, #tpu.memory_space<smem>>
    %252 = vector.broadcast %251 : f32 to vector<16x16xf32>
    %253 = arith.mulf %252, %46 : vector<16x16xf32>
    %254 = arith.addf %250, %253 : vector<16x16xf32>
    %c1_74 = arith.constant 1 : index
    %c21_75 = arith.constant 21 : index
    %255 = memref.load %arg3[%c1_74, %c21_75] : memref<6x27xf32, #tpu.memory_space<smem>>
    %256 = vector.broadcast %255 : f32 to vector<16x16xf32>
    %257 = arith.mulf %256, %48 : vector<16x16xf32>
    %258 = arith.addf %254, %257 : vector<16x16xf32>
    %c1_76 = arith.constant 1 : index
    %c22_77 = arith.constant 22 : index
    %259 = memref.load %arg3[%c1_76, %c22_77] : memref<6x27xf32, #tpu.memory_space<smem>>
    %260 = vector.broadcast %259 : f32 to vector<16x16xf32>
    %261 = arith.mulf %260, %50 : vector<16x16xf32>
    %262 = arith.addf %258, %261 : vector<16x16xf32>
    %c1_78 = arith.constant 1 : index
    %c23_79 = arith.constant 23 : index
    %263 = memref.load %arg3[%c1_78, %c23_79] : memref<6x27xf32, #tpu.memory_space<smem>>
    %264 = vector.broadcast %263 : f32 to vector<16x16xf32>
    %265 = arith.mulf %264, %52 : vector<16x16xf32>
    %266 = arith.addf %262, %265 : vector<16x16xf32>
    %c1_80 = arith.constant 1 : index
    %c24_81 = arith.constant 24 : index
    %267 = memref.load %arg3[%c1_80, %c24_81] : memref<6x27xf32, #tpu.memory_space<smem>>
    %268 = vector.broadcast %267 : f32 to vector<16x16xf32>
    %269 = arith.mulf %268, %54 : vector<16x16xf32>
    %270 = arith.addf %266, %269 : vector<16x16xf32>
    %c1_82 = arith.constant 1 : index
    %c25_83 = arith.constant 25 : index
    %271 = memref.load %arg3[%c1_82, %c25_83] : memref<6x27xf32, #tpu.memory_space<smem>>
    %272 = vector.broadcast %271 : f32 to vector<16x16xf32>
    %273 = arith.mulf %272, %56 : vector<16x16xf32>
    %274 = arith.addf %270, %273 : vector<16x16xf32>
    %c1_84 = arith.constant 1 : index
    %c26_85 = arith.constant 26 : index
    %275 = memref.load %arg3[%c1_84, %c26_85] : memref<6x27xf32, #tpu.memory_space<smem>>
    %276 = vector.broadcast %275 : f32 to vector<16x16xf32>
    %277 = arith.mulf %276, %58 : vector<16x16xf32>
    %278 = arith.addf %274, %277 : vector<16x16xf32>
    %c2_86 = arith.constant 2 : index
    %279 = memref.load %arg4[%c2_86] : memref<6xf32, #tpu.memory_space<smem>>
    %280 = vector.broadcast %279 : f32 to vector<16x16xf32>
    %c2_87 = arith.constant 2 : index
    %c0_88 = arith.constant 0 : index
    %281 = memref.load %arg3[%c2_87, %c0_88] : memref<6x27xf32, #tpu.memory_space<smem>>
    %282 = vector.broadcast %281 : f32 to vector<16x16xf32>
    %283 = arith.mulf %282, %6 : vector<16x16xf32>
    %284 = arith.addf %280, %283 : vector<16x16xf32>
    %c2_89 = arith.constant 2 : index
    %c1_90 = arith.constant 1 : index
    %285 = memref.load %arg3[%c2_89, %c1_90] : memref<6x27xf32, #tpu.memory_space<smem>>
    %286 = vector.broadcast %285 : f32 to vector<16x16xf32>
    %287 = arith.mulf %286, %8 : vector<16x16xf32>
    %288 = arith.addf %284, %287 : vector<16x16xf32>
    %c2_91 = arith.constant 2 : index
    %c2_92 = arith.constant 2 : index
    %289 = memref.load %arg3[%c2_91, %c2_92] : memref<6x27xf32, #tpu.memory_space<smem>>
    %290 = vector.broadcast %289 : f32 to vector<16x16xf32>
    %291 = arith.mulf %290, %10 : vector<16x16xf32>
    %292 = arith.addf %288, %291 : vector<16x16xf32>
    %c2_93 = arith.constant 2 : index
    %c3_94 = arith.constant 3 : index
    %293 = memref.load %arg3[%c2_93, %c3_94] : memref<6x27xf32, #tpu.memory_space<smem>>
    %294 = vector.broadcast %293 : f32 to vector<16x16xf32>
    %295 = arith.mulf %294, %12 : vector<16x16xf32>
    %296 = arith.addf %292, %295 : vector<16x16xf32>
    %c2_95 = arith.constant 2 : index
    %c4_96 = arith.constant 4 : index
    %297 = memref.load %arg3[%c2_95, %c4_96] : memref<6x27xf32, #tpu.memory_space<smem>>
    %298 = vector.broadcast %297 : f32 to vector<16x16xf32>
    %299 = arith.mulf %298, %14 : vector<16x16xf32>
    %300 = arith.addf %296, %299 : vector<16x16xf32>
    %c2_97 = arith.constant 2 : index
    %c5_98 = arith.constant 5 : index
    %301 = memref.load %arg3[%c2_97, %c5_98] : memref<6x27xf32, #tpu.memory_space<smem>>
    %302 = vector.broadcast %301 : f32 to vector<16x16xf32>
    %303 = arith.mulf %302, %16 : vector<16x16xf32>
    %304 = arith.addf %300, %303 : vector<16x16xf32>
    %c2_99 = arith.constant 2 : index
    %c6_100 = arith.constant 6 : index
    %305 = memref.load %arg3[%c2_99, %c6_100] : memref<6x27xf32, #tpu.memory_space<smem>>
    %306 = vector.broadcast %305 : f32 to vector<16x16xf32>
    %307 = arith.mulf %306, %18 : vector<16x16xf32>
    %308 = arith.addf %304, %307 : vector<16x16xf32>
    %c2_101 = arith.constant 2 : index
    %c7_102 = arith.constant 7 : index
    %309 = memref.load %arg3[%c2_101, %c7_102] : memref<6x27xf32, #tpu.memory_space<smem>>
    %310 = vector.broadcast %309 : f32 to vector<16x16xf32>
    %311 = arith.mulf %310, %20 : vector<16x16xf32>
    %312 = arith.addf %308, %311 : vector<16x16xf32>
    %c2_103 = arith.constant 2 : index
    %c8_104 = arith.constant 8 : index
    %313 = memref.load %arg3[%c2_103, %c8_104] : memref<6x27xf32, #tpu.memory_space<smem>>
    %314 = vector.broadcast %313 : f32 to vector<16x16xf32>
    %315 = arith.mulf %314, %22 : vector<16x16xf32>
    %316 = arith.addf %312, %315 : vector<16x16xf32>
    %c2_105 = arith.constant 2 : index
    %c9_106 = arith.constant 9 : index
    %317 = memref.load %arg3[%c2_105, %c9_106] : memref<6x27xf32, #tpu.memory_space<smem>>
    %318 = vector.broadcast %317 : f32 to vector<16x16xf32>
    %319 = arith.mulf %318, %24 : vector<16x16xf32>
    %320 = arith.addf %316, %319 : vector<16x16xf32>
    %c2_107 = arith.constant 2 : index
    %c10_108 = arith.constant 10 : index
    %321 = memref.load %arg3[%c2_107, %c10_108] : memref<6x27xf32, #tpu.memory_space<smem>>
    %322 = vector.broadcast %321 : f32 to vector<16x16xf32>
    %323 = arith.mulf %322, %26 : vector<16x16xf32>
    %324 = arith.addf %320, %323 : vector<16x16xf32>
    %c2_109 = arith.constant 2 : index
    %c11_110 = arith.constant 11 : index
    %325 = memref.load %arg3[%c2_109, %c11_110] : memref<6x27xf32, #tpu.memory_space<smem>>
    %326 = vector.broadcast %325 : f32 to vector<16x16xf32>
    %327 = arith.mulf %326, %28 : vector<16x16xf32>
    %328 = arith.addf %324, %327 : vector<16x16xf32>
    %c2_111 = arith.constant 2 : index
    %c12_112 = arith.constant 12 : index
    %329 = memref.load %arg3[%c2_111, %c12_112] : memref<6x27xf32, #tpu.memory_space<smem>>
    %330 = vector.broadcast %329 : f32 to vector<16x16xf32>
    %331 = arith.mulf %330, %30 : vector<16x16xf32>
    %332 = arith.addf %328, %331 : vector<16x16xf32>
    %c2_113 = arith.constant 2 : index
    %c13_114 = arith.constant 13 : index
    %333 = memref.load %arg3[%c2_113, %c13_114] : memref<6x27xf32, #tpu.memory_space<smem>>
    %334 = vector.broadcast %333 : f32 to vector<16x16xf32>
    %335 = arith.mulf %334, %32 : vector<16x16xf32>
    %336 = arith.addf %332, %335 : vector<16x16xf32>
    %c2_115 = arith.constant 2 : index
    %c14_116 = arith.constant 14 : index
    %337 = memref.load %arg3[%c2_115, %c14_116] : memref<6x27xf32, #tpu.memory_space<smem>>
    %338 = vector.broadcast %337 : f32 to vector<16x16xf32>
    %339 = arith.mulf %338, %34 : vector<16x16xf32>
    %340 = arith.addf %336, %339 : vector<16x16xf32>
    %c2_117 = arith.constant 2 : index
    %c15_118 = arith.constant 15 : index
    %341 = memref.load %arg3[%c2_117, %c15_118] : memref<6x27xf32, #tpu.memory_space<smem>>
    %342 = vector.broadcast %341 : f32 to vector<16x16xf32>
    %343 = arith.mulf %342, %36 : vector<16x16xf32>
    %344 = arith.addf %340, %343 : vector<16x16xf32>
    %c2_119 = arith.constant 2 : index
    %c16_120 = arith.constant 16 : index
    %345 = memref.load %arg3[%c2_119, %c16_120] : memref<6x27xf32, #tpu.memory_space<smem>>
    %346 = vector.broadcast %345 : f32 to vector<16x16xf32>
    %347 = arith.mulf %346, %38 : vector<16x16xf32>
    %348 = arith.addf %344, %347 : vector<16x16xf32>
    %c2_121 = arith.constant 2 : index
    %c17_122 = arith.constant 17 : index
    %349 = memref.load %arg3[%c2_121, %c17_122] : memref<6x27xf32, #tpu.memory_space<smem>>
    %350 = vector.broadcast %349 : f32 to vector<16x16xf32>
    %351 = arith.mulf %350, %40 : vector<16x16xf32>
    %352 = arith.addf %348, %351 : vector<16x16xf32>
    %c2_123 = arith.constant 2 : index
    %c18_124 = arith.constant 18 : index
    %353 = memref.load %arg3[%c2_123, %c18_124] : memref<6x27xf32, #tpu.memory_space<smem>>
    %354 = vector.broadcast %353 : f32 to vector<16x16xf32>
    %355 = arith.mulf %354, %42 : vector<16x16xf32>
    %356 = arith.addf %352, %355 : vector<16x16xf32>
    %c2_125 = arith.constant 2 : index
    %c19_126 = arith.constant 19 : index
    %357 = memref.load %arg3[%c2_125, %c19_126] : memref<6x27xf32, #tpu.memory_space<smem>>
    %358 = vector.broadcast %357 : f32 to vector<16x16xf32>
    %359 = arith.mulf %358, %44 : vector<16x16xf32>
    %360 = arith.addf %356, %359 : vector<16x16xf32>
    %c2_127 = arith.constant 2 : index
    %c20_128 = arith.constant 20 : index
    %361 = memref.load %arg3[%c2_127, %c20_128] : memref<6x27xf32, #tpu.memory_space<smem>>
    %362 = vector.broadcast %361 : f32 to vector<16x16xf32>
    %363 = arith.mulf %362, %46 : vector<16x16xf32>
    %364 = arith.addf %360, %363 : vector<16x16xf32>
    %c2_129 = arith.constant 2 : index
    %c21_130 = arith.constant 21 : index
    %365 = memref.load %arg3[%c2_129, %c21_130] : memref<6x27xf32, #tpu.memory_space<smem>>
    %366 = vector.broadcast %365 : f32 to vector<16x16xf32>
    %367 = arith.mulf %366, %48 : vector<16x16xf32>
    %368 = arith.addf %364, %367 : vector<16x16xf32>
    %c2_131 = arith.constant 2 : index
    %c22_132 = arith.constant 22 : index
    %369 = memref.load %arg3[%c2_131, %c22_132] : memref<6x27xf32, #tpu.memory_space<smem>>
    %370 = vector.broadcast %369 : f32 to vector<16x16xf32>
    %371 = arith.mulf %370, %50 : vector<16x16xf32>
    %372 = arith.addf %368, %371 : vector<16x16xf32>
    %c2_133 = arith.constant 2 : index
    %c23_134 = arith.constant 23 : index
    %373 = memref.load %arg3[%c2_133, %c23_134] : memref<6x27xf32, #tpu.memory_space<smem>>
    %374 = vector.broadcast %373 : f32 to vector<16x16xf32>
    %375 = arith.mulf %374, %52 : vector<16x16xf32>
    %376 = arith.addf %372, %375 : vector<16x16xf32>
    %c2_135 = arith.constant 2 : index
    %c24_136 = arith.constant 24 : index
    %377 = memref.load %arg3[%c2_135, %c24_136] : memref<6x27xf32, #tpu.memory_space<smem>>
    %378 = vector.broadcast %377 : f32 to vector<16x16xf32>
    %379 = arith.mulf %378, %54 : vector<16x16xf32>
    %380 = arith.addf %376, %379 : vector<16x16xf32>
    %c2_137 = arith.constant 2 : index
    %c25_138 = arith.constant 25 : index
    %381 = memref.load %arg3[%c2_137, %c25_138] : memref<6x27xf32, #tpu.memory_space<smem>>
    %382 = vector.broadcast %381 : f32 to vector<16x16xf32>
    %383 = arith.mulf %382, %56 : vector<16x16xf32>
    %384 = arith.addf %380, %383 : vector<16x16xf32>
    %c2_139 = arith.constant 2 : index
    %c26_140 = arith.constant 26 : index
    %385 = memref.load %arg3[%c2_139, %c26_140] : memref<6x27xf32, #tpu.memory_space<smem>>
    %386 = vector.broadcast %385 : f32 to vector<16x16xf32>
    %387 = arith.mulf %386, %58 : vector<16x16xf32>
    %388 = arith.addf %384, %387 : vector<16x16xf32>
    %c3_141 = arith.constant 3 : index
    %389 = memref.load %arg4[%c3_141] : memref<6xf32, #tpu.memory_space<smem>>
    %390 = vector.broadcast %389 : f32 to vector<16x16xf32>
    %c3_142 = arith.constant 3 : index
    %c0_143 = arith.constant 0 : index
    %391 = memref.load %arg3[%c3_142, %c0_143] : memref<6x27xf32, #tpu.memory_space<smem>>
    %392 = vector.broadcast %391 : f32 to vector<16x16xf32>
    %393 = arith.mulf %392, %6 : vector<16x16xf32>
    %394 = arith.addf %390, %393 : vector<16x16xf32>
    %c3_144 = arith.constant 3 : index
    %c1_145 = arith.constant 1 : index
    %395 = memref.load %arg3[%c3_144, %c1_145] : memref<6x27xf32, #tpu.memory_space<smem>>
    %396 = vector.broadcast %395 : f32 to vector<16x16xf32>
    %397 = arith.mulf %396, %8 : vector<16x16xf32>
    %398 = arith.addf %394, %397 : vector<16x16xf32>
    %c3_146 = arith.constant 3 : index
    %c2_147 = arith.constant 2 : index
    %399 = memref.load %arg3[%c3_146, %c2_147] : memref<6x27xf32, #tpu.memory_space<smem>>
    %400 = vector.broadcast %399 : f32 to vector<16x16xf32>
    %401 = arith.mulf %400, %10 : vector<16x16xf32>
    %402 = arith.addf %398, %401 : vector<16x16xf32>
    %c3_148 = arith.constant 3 : index
    %c3_149 = arith.constant 3 : index
    %403 = memref.load %arg3[%c3_148, %c3_149] : memref<6x27xf32, #tpu.memory_space<smem>>
    %404 = vector.broadcast %403 : f32 to vector<16x16xf32>
    %405 = arith.mulf %404, %12 : vector<16x16xf32>
    %406 = arith.addf %402, %405 : vector<16x16xf32>
    %c3_150 = arith.constant 3 : index
    %c4_151 = arith.constant 4 : index
    %407 = memref.load %arg3[%c3_150, %c4_151] : memref<6x27xf32, #tpu.memory_space<smem>>
    %408 = vector.broadcast %407 : f32 to vector<16x16xf32>
    %409 = arith.mulf %408, %14 : vector<16x16xf32>
    %410 = arith.addf %406, %409 : vector<16x16xf32>
    %c3_152 = arith.constant 3 : index
    %c5_153 = arith.constant 5 : index
    %411 = memref.load %arg3[%c3_152, %c5_153] : memref<6x27xf32, #tpu.memory_space<smem>>
    %412 = vector.broadcast %411 : f32 to vector<16x16xf32>
    %413 = arith.mulf %412, %16 : vector<16x16xf32>
    %414 = arith.addf %410, %413 : vector<16x16xf32>
    %c3_154 = arith.constant 3 : index
    %c6_155 = arith.constant 6 : index
    %415 = memref.load %arg3[%c3_154, %c6_155] : memref<6x27xf32, #tpu.memory_space<smem>>
    %416 = vector.broadcast %415 : f32 to vector<16x16xf32>
    %417 = arith.mulf %416, %18 : vector<16x16xf32>
    %418 = arith.addf %414, %417 : vector<16x16xf32>
    %c3_156 = arith.constant 3 : index
    %c7_157 = arith.constant 7 : index
    %419 = memref.load %arg3[%c3_156, %c7_157] : memref<6x27xf32, #tpu.memory_space<smem>>
    %420 = vector.broadcast %419 : f32 to vector<16x16xf32>
    %421 = arith.mulf %420, %20 : vector<16x16xf32>
    %422 = arith.addf %418, %421 : vector<16x16xf32>
    %c3_158 = arith.constant 3 : index
    %c8_159 = arith.constant 8 : index
    %423 = memref.load %arg3[%c3_158, %c8_159] : memref<6x27xf32, #tpu.memory_space<smem>>
    %424 = vector.broadcast %423 : f32 to vector<16x16xf32>
    %425 = arith.mulf %424, %22 : vector<16x16xf32>
    %426 = arith.addf %422, %425 : vector<16x16xf32>
    %c3_160 = arith.constant 3 : index
    %c9_161 = arith.constant 9 : index
    %427 = memref.load %arg3[%c3_160, %c9_161] : memref<6x27xf32, #tpu.memory_space<smem>>
    %428 = vector.broadcast %427 : f32 to vector<16x16xf32>
    %429 = arith.mulf %428, %24 : vector<16x16xf32>
    %430 = arith.addf %426, %429 : vector<16x16xf32>
    %c3_162 = arith.constant 3 : index
    %c10_163 = arith.constant 10 : index
    %431 = memref.load %arg3[%c3_162, %c10_163] : memref<6x27xf32, #tpu.memory_space<smem>>
    %432 = vector.broadcast %431 : f32 to vector<16x16xf32>
    %433 = arith.mulf %432, %26 : vector<16x16xf32>
    %434 = arith.addf %430, %433 : vector<16x16xf32>
    %c3_164 = arith.constant 3 : index
    %c11_165 = arith.constant 11 : index
    %435 = memref.load %arg3[%c3_164, %c11_165] : memref<6x27xf32, #tpu.memory_space<smem>>
    %436 = vector.broadcast %435 : f32 to vector<16x16xf32>
    %437 = arith.mulf %436, %28 : vector<16x16xf32>
    %438 = arith.addf %434, %437 : vector<16x16xf32>
    %c3_166 = arith.constant 3 : index
    %c12_167 = arith.constant 12 : index
    %439 = memref.load %arg3[%c3_166, %c12_167] : memref<6x27xf32, #tpu.memory_space<smem>>
    %440 = vector.broadcast %439 : f32 to vector<16x16xf32>
    %441 = arith.mulf %440, %30 : vector<16x16xf32>
    %442 = arith.addf %438, %441 : vector<16x16xf32>
    %c3_168 = arith.constant 3 : index
    %c13_169 = arith.constant 13 : index
    %443 = memref.load %arg3[%c3_168, %c13_169] : memref<6x27xf32, #tpu.memory_space<smem>>
    %444 = vector.broadcast %443 : f32 to vector<16x16xf32>
    %445 = arith.mulf %444, %32 : vector<16x16xf32>
    %446 = arith.addf %442, %445 : vector<16x16xf32>
    %c3_170 = arith.constant 3 : index
    %c14_171 = arith.constant 14 : index
    %447 = memref.load %arg3[%c3_170, %c14_171] : memref<6x27xf32, #tpu.memory_space<smem>>
    %448 = vector.broadcast %447 : f32 to vector<16x16xf32>
    %449 = arith.mulf %448, %34 : vector<16x16xf32>
    %450 = arith.addf %446, %449 : vector<16x16xf32>
    %c3_172 = arith.constant 3 : index
    %c15_173 = arith.constant 15 : index
    %451 = memref.load %arg3[%c3_172, %c15_173] : memref<6x27xf32, #tpu.memory_space<smem>>
    %452 = vector.broadcast %451 : f32 to vector<16x16xf32>
    %453 = arith.mulf %452, %36 : vector<16x16xf32>
    %454 = arith.addf %450, %453 : vector<16x16xf32>
    %c3_174 = arith.constant 3 : index
    %c16_175 = arith.constant 16 : index
    %455 = memref.load %arg3[%c3_174, %c16_175] : memref<6x27xf32, #tpu.memory_space<smem>>
    %456 = vector.broadcast %455 : f32 to vector<16x16xf32>
    %457 = arith.mulf %456, %38 : vector<16x16xf32>
    %458 = arith.addf %454, %457 : vector<16x16xf32>
    %c3_176 = arith.constant 3 : index
    %c17_177 = arith.constant 17 : index
    %459 = memref.load %arg3[%c3_176, %c17_177] : memref<6x27xf32, #tpu.memory_space<smem>>
    %460 = vector.broadcast %459 : f32 to vector<16x16xf32>
    %461 = arith.mulf %460, %40 : vector<16x16xf32>
    %462 = arith.addf %458, %461 : vector<16x16xf32>
    %c3_178 = arith.constant 3 : index
    %c18_179 = arith.constant 18 : index
    %463 = memref.load %arg3[%c3_178, %c18_179] : memref<6x27xf32, #tpu.memory_space<smem>>
    %464 = vector.broadcast %463 : f32 to vector<16x16xf32>
    %465 = arith.mulf %464, %42 : vector<16x16xf32>
    %466 = arith.addf %462, %465 : vector<16x16xf32>
    %c3_180 = arith.constant 3 : index
    %c19_181 = arith.constant 19 : index
    %467 = memref.load %arg3[%c3_180, %c19_181] : memref<6x27xf32, #tpu.memory_space<smem>>
    %468 = vector.broadcast %467 : f32 to vector<16x16xf32>
    %469 = arith.mulf %468, %44 : vector<16x16xf32>
    %470 = arith.addf %466, %469 : vector<16x16xf32>
    %c3_182 = arith.constant 3 : index
    %c20_183 = arith.constant 20 : index
    %471 = memref.load %arg3[%c3_182, %c20_183] : memref<6x27xf32, #tpu.memory_space<smem>>
    %472 = vector.broadcast %471 : f32 to vector<16x16xf32>
    %473 = arith.mulf %472, %46 : vector<16x16xf32>
    %474 = arith.addf %470, %473 : vector<16x16xf32>
    %c3_184 = arith.constant 3 : index
    %c21_185 = arith.constant 21 : index
    %475 = memref.load %arg3[%c3_184, %c21_185] : memref<6x27xf32, #tpu.memory_space<smem>>
    %476 = vector.broadcast %475 : f32 to vector<16x16xf32>
    %477 = arith.mulf %476, %48 : vector<16x16xf32>
    %478 = arith.addf %474, %477 : vector<16x16xf32>
    %c3_186 = arith.constant 3 : index
    %c22_187 = arith.constant 22 : index
    %479 = memref.load %arg3[%c3_186, %c22_187] : memref<6x27xf32, #tpu.memory_space<smem>>
    %480 = vector.broadcast %479 : f32 to vector<16x16xf32>
    %481 = arith.mulf %480, %50 : vector<16x16xf32>
    %482 = arith.addf %478, %481 : vector<16x16xf32>
    %c3_188 = arith.constant 3 : index
    %c23_189 = arith.constant 23 : index
    %483 = memref.load %arg3[%c3_188, %c23_189] : memref<6x27xf32, #tpu.memory_space<smem>>
    %484 = vector.broadcast %483 : f32 to vector<16x16xf32>
    %485 = arith.mulf %484, %52 : vector<16x16xf32>
    %486 = arith.addf %482, %485 : vector<16x16xf32>
    %c3_190 = arith.constant 3 : index
    %c24_191 = arith.constant 24 : index
    %487 = memref.load %arg3[%c3_190, %c24_191] : memref<6x27xf32, #tpu.memory_space<smem>>
    %488 = vector.broadcast %487 : f32 to vector<16x16xf32>
    %489 = arith.mulf %488, %54 : vector<16x16xf32>
    %490 = arith.addf %486, %489 : vector<16x16xf32>
    %c3_192 = arith.constant 3 : index
    %c25_193 = arith.constant 25 : index
    %491 = memref.load %arg3[%c3_192, %c25_193] : memref<6x27xf32, #tpu.memory_space<smem>>
    %492 = vector.broadcast %491 : f32 to vector<16x16xf32>
    %493 = arith.mulf %492, %56 : vector<16x16xf32>
    %494 = arith.addf %490, %493 : vector<16x16xf32>
    %c3_194 = arith.constant 3 : index
    %c26_195 = arith.constant 26 : index
    %495 = memref.load %arg3[%c3_194, %c26_195] : memref<6x27xf32, #tpu.memory_space<smem>>
    %496 = vector.broadcast %495 : f32 to vector<16x16xf32>
    %497 = arith.mulf %496, %58 : vector<16x16xf32>
    %498 = arith.addf %494, %497 : vector<16x16xf32>
    %c4_196 = arith.constant 4 : index
    %499 = memref.load %arg4[%c4_196] : memref<6xf32, #tpu.memory_space<smem>>
    %500 = vector.broadcast %499 : f32 to vector<16x16xf32>
    %c4_197 = arith.constant 4 : index
    %c0_198 = arith.constant 0 : index
    %501 = memref.load %arg3[%c4_197, %c0_198] : memref<6x27xf32, #tpu.memory_space<smem>>
    %502 = vector.broadcast %501 : f32 to vector<16x16xf32>
    %503 = arith.mulf %502, %6 : vector<16x16xf32>
    %504 = arith.addf %500, %503 : vector<16x16xf32>
    %c4_199 = arith.constant 4 : index
    %c1_200 = arith.constant 1 : index
    %505 = memref.load %arg3[%c4_199, %c1_200] : memref<6x27xf32, #tpu.memory_space<smem>>
    %506 = vector.broadcast %505 : f32 to vector<16x16xf32>
    %507 = arith.mulf %506, %8 : vector<16x16xf32>
    %508 = arith.addf %504, %507 : vector<16x16xf32>
    %c4_201 = arith.constant 4 : index
    %c2_202 = arith.constant 2 : index
    %509 = memref.load %arg3[%c4_201, %c2_202] : memref<6x27xf32, #tpu.memory_space<smem>>
    %510 = vector.broadcast %509 : f32 to vector<16x16xf32>
    %511 = arith.mulf %510, %10 : vector<16x16xf32>
    %512 = arith.addf %508, %511 : vector<16x16xf32>
    %c4_203 = arith.constant 4 : index
    %c3_204 = arith.constant 3 : index
    %513 = memref.load %arg3[%c4_203, %c3_204] : memref<6x27xf32, #tpu.memory_space<smem>>
    %514 = vector.broadcast %513 : f32 to vector<16x16xf32>
    %515 = arith.mulf %514, %12 : vector<16x16xf32>
    %516 = arith.addf %512, %515 : vector<16x16xf32>
    %c4_205 = arith.constant 4 : index
    %c4_206 = arith.constant 4 : index
    %517 = memref.load %arg3[%c4_205, %c4_206] : memref<6x27xf32, #tpu.memory_space<smem>>
    %518 = vector.broadcast %517 : f32 to vector<16x16xf32>
    %519 = arith.mulf %518, %14 : vector<16x16xf32>
    %520 = arith.addf %516, %519 : vector<16x16xf32>
    %c4_207 = arith.constant 4 : index
    %c5_208 = arith.constant 5 : index
    %521 = memref.load %arg3[%c4_207, %c5_208] : memref<6x27xf32, #tpu.memory_space<smem>>
    %522 = vector.broadcast %521 : f32 to vector<16x16xf32>
    %523 = arith.mulf %522, %16 : vector<16x16xf32>
    %524 = arith.addf %520, %523 : vector<16x16xf32>
    %c4_209 = arith.constant 4 : index
    %c6_210 = arith.constant 6 : index
    %525 = memref.load %arg3[%c4_209, %c6_210] : memref<6x27xf32, #tpu.memory_space<smem>>
    %526 = vector.broadcast %525 : f32 to vector<16x16xf32>
    %527 = arith.mulf %526, %18 : vector<16x16xf32>
    %528 = arith.addf %524, %527 : vector<16x16xf32>
    %c4_211 = arith.constant 4 : index
    %c7_212 = arith.constant 7 : index
    %529 = memref.load %arg3[%c4_211, %c7_212] : memref<6x27xf32, #tpu.memory_space<smem>>
    %530 = vector.broadcast %529 : f32 to vector<16x16xf32>
    %531 = arith.mulf %530, %20 : vector<16x16xf32>
    %532 = arith.addf %528, %531 : vector<16x16xf32>
    %c4_213 = arith.constant 4 : index
    %c8_214 = arith.constant 8 : index
    %533 = memref.load %arg3[%c4_213, %c8_214] : memref<6x27xf32, #tpu.memory_space<smem>>
    %534 = vector.broadcast %533 : f32 to vector<16x16xf32>
    %535 = arith.mulf %534, %22 : vector<16x16xf32>
    %536 = arith.addf %532, %535 : vector<16x16xf32>
    %c4_215 = arith.constant 4 : index
    %c9_216 = arith.constant 9 : index
    %537 = memref.load %arg3[%c4_215, %c9_216] : memref<6x27xf32, #tpu.memory_space<smem>>
    %538 = vector.broadcast %537 : f32 to vector<16x16xf32>
    %539 = arith.mulf %538, %24 : vector<16x16xf32>
    %540 = arith.addf %536, %539 : vector<16x16xf32>
    %c4_217 = arith.constant 4 : index
    %c10_218 = arith.constant 10 : index
    %541 = memref.load %arg3[%c4_217, %c10_218] : memref<6x27xf32, #tpu.memory_space<smem>>
    %542 = vector.broadcast %541 : f32 to vector<16x16xf32>
    %543 = arith.mulf %542, %26 : vector<16x16xf32>
    %544 = arith.addf %540, %543 : vector<16x16xf32>
    %c4_219 = arith.constant 4 : index
    %c11_220 = arith.constant 11 : index
    %545 = memref.load %arg3[%c4_219, %c11_220] : memref<6x27xf32, #tpu.memory_space<smem>>
    %546 = vector.broadcast %545 : f32 to vector<16x16xf32>
    %547 = arith.mulf %546, %28 : vector<16x16xf32>
    %548 = arith.addf %544, %547 : vector<16x16xf32>
    %c4_221 = arith.constant 4 : index
    %c12_222 = arith.constant 12 : index
    %549 = memref.load %arg3[%c4_221, %c12_222] : memref<6x27xf32, #tpu.memory_space<smem>>
    %550 = vector.broadcast %549 : f32 to vector<16x16xf32>
    %551 = arith.mulf %550, %30 : vector<16x16xf32>
    %552 = arith.addf %548, %551 : vector<16x16xf32>
    %c4_223 = arith.constant 4 : index
    %c13_224 = arith.constant 13 : index
    %553 = memref.load %arg3[%c4_223, %c13_224] : memref<6x27xf32, #tpu.memory_space<smem>>
    %554 = vector.broadcast %553 : f32 to vector<16x16xf32>
    %555 = arith.mulf %554, %32 : vector<16x16xf32>
    %556 = arith.addf %552, %555 : vector<16x16xf32>
    %c4_225 = arith.constant 4 : index
    %c14_226 = arith.constant 14 : index
    %557 = memref.load %arg3[%c4_225, %c14_226] : memref<6x27xf32, #tpu.memory_space<smem>>
    %558 = vector.broadcast %557 : f32 to vector<16x16xf32>
    %559 = arith.mulf %558, %34 : vector<16x16xf32>
    %560 = arith.addf %556, %559 : vector<16x16xf32>
    %c4_227 = arith.constant 4 : index
    %c15_228 = arith.constant 15 : index
    %561 = memref.load %arg3[%c4_227, %c15_228] : memref<6x27xf32, #tpu.memory_space<smem>>
    %562 = vector.broadcast %561 : f32 to vector<16x16xf32>
    %563 = arith.mulf %562, %36 : vector<16x16xf32>
    %564 = arith.addf %560, %563 : vector<16x16xf32>
    %c4_229 = arith.constant 4 : index
    %c16_230 = arith.constant 16 : index
    %565 = memref.load %arg3[%c4_229, %c16_230] : memref<6x27xf32, #tpu.memory_space<smem>>
    %566 = vector.broadcast %565 : f32 to vector<16x16xf32>
    %567 = arith.mulf %566, %38 : vector<16x16xf32>
    %568 = arith.addf %564, %567 : vector<16x16xf32>
    %c4_231 = arith.constant 4 : index
    %c17_232 = arith.constant 17 : index
    %569 = memref.load %arg3[%c4_231, %c17_232] : memref<6x27xf32, #tpu.memory_space<smem>>
    %570 = vector.broadcast %569 : f32 to vector<16x16xf32>
    %571 = arith.mulf %570, %40 : vector<16x16xf32>
    %572 = arith.addf %568, %571 : vector<16x16xf32>
    %c4_233 = arith.constant 4 : index
    %c18_234 = arith.constant 18 : index
    %573 = memref.load %arg3[%c4_233, %c18_234] : memref<6x27xf32, #tpu.memory_space<smem>>
    %574 = vector.broadcast %573 : f32 to vector<16x16xf32>
    %575 = arith.mulf %574, %42 : vector<16x16xf32>
    %576 = arith.addf %572, %575 : vector<16x16xf32>
    %c4_235 = arith.constant 4 : index
    %c19_236 = arith.constant 19 : index
    %577 = memref.load %arg3[%c4_235, %c19_236] : memref<6x27xf32, #tpu.memory_space<smem>>
    %578 = vector.broadcast %577 : f32 to vector<16x16xf32>
    %579 = arith.mulf %578, %44 : vector<16x16xf32>
    %580 = arith.addf %576, %579 : vector<16x16xf32>
    %c4_237 = arith.constant 4 : index
    %c20_238 = arith.constant 20 : index
    %581 = memref.load %arg3[%c4_237, %c20_238] : memref<6x27xf32, #tpu.memory_space<smem>>
    %582 = vector.broadcast %581 : f32 to vector<16x16xf32>
    %583 = arith.mulf %582, %46 : vector<16x16xf32>
    %584 = arith.addf %580, %583 : vector<16x16xf32>
    %c4_239 = arith.constant 4 : index
    %c21_240 = arith.constant 21 : index
    %585 = memref.load %arg3[%c4_239, %c21_240] : memref<6x27xf32, #tpu.memory_space<smem>>
    %586 = vector.broadcast %585 : f32 to vector<16x16xf32>
    %587 = arith.mulf %586, %48 : vector<16x16xf32>
    %588 = arith.addf %584, %587 : vector<16x16xf32>
    %c4_241 = arith.constant 4 : index
    %c22_242 = arith.constant 22 : index
    %589 = memref.load %arg3[%c4_241, %c22_242] : memref<6x27xf32, #tpu.memory_space<smem>>
    %590 = vector.broadcast %589 : f32 to vector<16x16xf32>
    %591 = arith.mulf %590, %50 : vector<16x16xf32>
    %592 = arith.addf %588, %591 : vector<16x16xf32>
    %c4_243 = arith.constant 4 : index
    %c23_244 = arith.constant 23 : index
    %593 = memref.load %arg3[%c4_243, %c23_244] : memref<6x27xf32, #tpu.memory_space<smem>>
    %594 = vector.broadcast %593 : f32 to vector<16x16xf32>
    %595 = arith.mulf %594, %52 : vector<16x16xf32>
    %596 = arith.addf %592, %595 : vector<16x16xf32>
    %c4_245 = arith.constant 4 : index
    %c24_246 = arith.constant 24 : index
    %597 = memref.load %arg3[%c4_245, %c24_246] : memref<6x27xf32, #tpu.memory_space<smem>>
    %598 = vector.broadcast %597 : f32 to vector<16x16xf32>
    %599 = arith.mulf %598, %54 : vector<16x16xf32>
    %600 = arith.addf %596, %599 : vector<16x16xf32>
    %c4_247 = arith.constant 4 : index
    %c25_248 = arith.constant 25 : index
    %601 = memref.load %arg3[%c4_247, %c25_248] : memref<6x27xf32, #tpu.memory_space<smem>>
    %602 = vector.broadcast %601 : f32 to vector<16x16xf32>
    %603 = arith.mulf %602, %56 : vector<16x16xf32>
    %604 = arith.addf %600, %603 : vector<16x16xf32>
    %c4_249 = arith.constant 4 : index
    %c26_250 = arith.constant 26 : index
    %605 = memref.load %arg3[%c4_249, %c26_250] : memref<6x27xf32, #tpu.memory_space<smem>>
    %606 = vector.broadcast %605 : f32 to vector<16x16xf32>
    %607 = arith.mulf %606, %58 : vector<16x16xf32>
    %608 = arith.addf %604, %607 : vector<16x16xf32>
    %c5_251 = arith.constant 5 : index
    %609 = memref.load %arg4[%c5_251] : memref<6xf32, #tpu.memory_space<smem>>
    %610 = vector.broadcast %609 : f32 to vector<16x16xf32>
    %c5_252 = arith.constant 5 : index
    %c0_253 = arith.constant 0 : index
    %611 = memref.load %arg3[%c5_252, %c0_253] : memref<6x27xf32, #tpu.memory_space<smem>>
    %612 = vector.broadcast %611 : f32 to vector<16x16xf32>
    %613 = arith.mulf %612, %6 : vector<16x16xf32>
    %614 = arith.addf %610, %613 : vector<16x16xf32>
    %c5_254 = arith.constant 5 : index
    %c1_255 = arith.constant 1 : index
    %615 = memref.load %arg3[%c5_254, %c1_255] : memref<6x27xf32, #tpu.memory_space<smem>>
    %616 = vector.broadcast %615 : f32 to vector<16x16xf32>
    %617 = arith.mulf %616, %8 : vector<16x16xf32>
    %618 = arith.addf %614, %617 : vector<16x16xf32>
    %c5_256 = arith.constant 5 : index
    %c2_257 = arith.constant 2 : index
    %619 = memref.load %arg3[%c5_256, %c2_257] : memref<6x27xf32, #tpu.memory_space<smem>>
    %620 = vector.broadcast %619 : f32 to vector<16x16xf32>
    %621 = arith.mulf %620, %10 : vector<16x16xf32>
    %622 = arith.addf %618, %621 : vector<16x16xf32>
    %c5_258 = arith.constant 5 : index
    %c3_259 = arith.constant 3 : index
    %623 = memref.load %arg3[%c5_258, %c3_259] : memref<6x27xf32, #tpu.memory_space<smem>>
    %624 = vector.broadcast %623 : f32 to vector<16x16xf32>
    %625 = arith.mulf %624, %12 : vector<16x16xf32>
    %626 = arith.addf %622, %625 : vector<16x16xf32>
    %c5_260 = arith.constant 5 : index
    %c4_261 = arith.constant 4 : index
    %627 = memref.load %arg3[%c5_260, %c4_261] : memref<6x27xf32, #tpu.memory_space<smem>>
    %628 = vector.broadcast %627 : f32 to vector<16x16xf32>
    %629 = arith.mulf %628, %14 : vector<16x16xf32>
    %630 = arith.addf %626, %629 : vector<16x16xf32>
    %c5_262 = arith.constant 5 : index
    %c5_263 = arith.constant 5 : index
    %631 = memref.load %arg3[%c5_262, %c5_263] : memref<6x27xf32, #tpu.memory_space<smem>>
    %632 = vector.broadcast %631 : f32 to vector<16x16xf32>
    %633 = arith.mulf %632, %16 : vector<16x16xf32>
    %634 = arith.addf %630, %633 : vector<16x16xf32>
    %c5_264 = arith.constant 5 : index
    %c6_265 = arith.constant 6 : index
    %635 = memref.load %arg3[%c5_264, %c6_265] : memref<6x27xf32, #tpu.memory_space<smem>>
    %636 = vector.broadcast %635 : f32 to vector<16x16xf32>
    %637 = arith.mulf %636, %18 : vector<16x16xf32>
    %638 = arith.addf %634, %637 : vector<16x16xf32>
    %c5_266 = arith.constant 5 : index
    %c7_267 = arith.constant 7 : index
    %639 = memref.load %arg3[%c5_266, %c7_267] : memref<6x27xf32, #tpu.memory_space<smem>>
    %640 = vector.broadcast %639 : f32 to vector<16x16xf32>
    %641 = arith.mulf %640, %20 : vector<16x16xf32>
    %642 = arith.addf %638, %641 : vector<16x16xf32>
    %c5_268 = arith.constant 5 : index
    %c8_269 = arith.constant 8 : index
    %643 = memref.load %arg3[%c5_268, %c8_269] : memref<6x27xf32, #tpu.memory_space<smem>>
    %644 = vector.broadcast %643 : f32 to vector<16x16xf32>
    %645 = arith.mulf %644, %22 : vector<16x16xf32>
    %646 = arith.addf %642, %645 : vector<16x16xf32>
    %c5_270 = arith.constant 5 : index
    %c9_271 = arith.constant 9 : index
    %647 = memref.load %arg3[%c5_270, %c9_271] : memref<6x27xf32, #tpu.memory_space<smem>>
    %648 = vector.broadcast %647 : f32 to vector<16x16xf32>
    %649 = arith.mulf %648, %24 : vector<16x16xf32>
    %650 = arith.addf %646, %649 : vector<16x16xf32>
    %c5_272 = arith.constant 5 : index
    %c10_273 = arith.constant 10 : index
    %651 = memref.load %arg3[%c5_272, %c10_273] : memref<6x27xf32, #tpu.memory_space<smem>>
    %652 = vector.broadcast %651 : f32 to vector<16x16xf32>
    %653 = arith.mulf %652, %26 : vector<16x16xf32>
    %654 = arith.addf %650, %653 : vector<16x16xf32>
    %c5_274 = arith.constant 5 : index
    %c11_275 = arith.constant 11 : index
    %655 = memref.load %arg3[%c5_274, %c11_275] : memref<6x27xf32, #tpu.memory_space<smem>>
    %656 = vector.broadcast %655 : f32 to vector<16x16xf32>
    %657 = arith.mulf %656, %28 : vector<16x16xf32>
    %658 = arith.addf %654, %657 : vector<16x16xf32>
    %c5_276 = arith.constant 5 : index
    %c12_277 = arith.constant 12 : index
    %659 = memref.load %arg3[%c5_276, %c12_277] : memref<6x27xf32, #tpu.memory_space<smem>>
    %660 = vector.broadcast %659 : f32 to vector<16x16xf32>
    %661 = arith.mulf %660, %30 : vector<16x16xf32>
    %662 = arith.addf %658, %661 : vector<16x16xf32>
    %c5_278 = arith.constant 5 : index
    %c13_279 = arith.constant 13 : index
    %663 = memref.load %arg3[%c5_278, %c13_279] : memref<6x27xf32, #tpu.memory_space<smem>>
    %664 = vector.broadcast %663 : f32 to vector<16x16xf32>
    %665 = arith.mulf %664, %32 : vector<16x16xf32>
    %666 = arith.addf %662, %665 : vector<16x16xf32>
    %c5_280 = arith.constant 5 : index
    %c14_281 = arith.constant 14 : index
    %667 = memref.load %arg3[%c5_280, %c14_281] : memref<6x27xf32, #tpu.memory_space<smem>>
    %668 = vector.broadcast %667 : f32 to vector<16x16xf32>
    %669 = arith.mulf %668, %34 : vector<16x16xf32>
    %670 = arith.addf %666, %669 : vector<16x16xf32>
    %c5_282 = arith.constant 5 : index
    %c15_283 = arith.constant 15 : index
    %671 = memref.load %arg3[%c5_282, %c15_283] : memref<6x27xf32, #tpu.memory_space<smem>>
    %672 = vector.broadcast %671 : f32 to vector<16x16xf32>
    %673 = arith.mulf %672, %36 : vector<16x16xf32>
    %674 = arith.addf %670, %673 : vector<16x16xf32>
    %c5_284 = arith.constant 5 : index
    %c16_285 = arith.constant 16 : index
    %675 = memref.load %arg3[%c5_284, %c16_285] : memref<6x27xf32, #tpu.memory_space<smem>>
    %676 = vector.broadcast %675 : f32 to vector<16x16xf32>
    %677 = arith.mulf %676, %38 : vector<16x16xf32>
    %678 = arith.addf %674, %677 : vector<16x16xf32>
    %c5_286 = arith.constant 5 : index
    %c17_287 = arith.constant 17 : index
    %679 = memref.load %arg3[%c5_286, %c17_287] : memref<6x27xf32, #tpu.memory_space<smem>>
    %680 = vector.broadcast %679 : f32 to vector<16x16xf32>
    %681 = arith.mulf %680, %40 : vector<16x16xf32>
    %682 = arith.addf %678, %681 : vector<16x16xf32>
    %c5_288 = arith.constant 5 : index
    %c18_289 = arith.constant 18 : index
    %683 = memref.load %arg3[%c5_288, %c18_289] : memref<6x27xf32, #tpu.memory_space<smem>>
    %684 = vector.broadcast %683 : f32 to vector<16x16xf32>
    %685 = arith.mulf %684, %42 : vector<16x16xf32>
    %686 = arith.addf %682, %685 : vector<16x16xf32>
    %c5_290 = arith.constant 5 : index
    %c19_291 = arith.constant 19 : index
    %687 = memref.load %arg3[%c5_290, %c19_291] : memref<6x27xf32, #tpu.memory_space<smem>>
    %688 = vector.broadcast %687 : f32 to vector<16x16xf32>
    %689 = arith.mulf %688, %44 : vector<16x16xf32>
    %690 = arith.addf %686, %689 : vector<16x16xf32>
    %c5_292 = arith.constant 5 : index
    %c20_293 = arith.constant 20 : index
    %691 = memref.load %arg3[%c5_292, %c20_293] : memref<6x27xf32, #tpu.memory_space<smem>>
    %692 = vector.broadcast %691 : f32 to vector<16x16xf32>
    %693 = arith.mulf %692, %46 : vector<16x16xf32>
    %694 = arith.addf %690, %693 : vector<16x16xf32>
    %c5_294 = arith.constant 5 : index
    %c21_295 = arith.constant 21 : index
    %695 = memref.load %arg3[%c5_294, %c21_295] : memref<6x27xf32, #tpu.memory_space<smem>>
    %696 = vector.broadcast %695 : f32 to vector<16x16xf32>
    %697 = arith.mulf %696, %48 : vector<16x16xf32>
    %698 = arith.addf %694, %697 : vector<16x16xf32>
    %c5_296 = arith.constant 5 : index
    %c22_297 = arith.constant 22 : index
    %699 = memref.load %arg3[%c5_296, %c22_297] : memref<6x27xf32, #tpu.memory_space<smem>>
    %700 = vector.broadcast %699 : f32 to vector<16x16xf32>
    %701 = arith.mulf %700, %50 : vector<16x16xf32>
    %702 = arith.addf %698, %701 : vector<16x16xf32>
    %c5_298 = arith.constant 5 : index
    %c23_299 = arith.constant 23 : index
    %703 = memref.load %arg3[%c5_298, %c23_299] : memref<6x27xf32, #tpu.memory_space<smem>>
    %704 = vector.broadcast %703 : f32 to vector<16x16xf32>
    %705 = arith.mulf %704, %52 : vector<16x16xf32>
    %706 = arith.addf %702, %705 : vector<16x16xf32>
    %c5_300 = arith.constant 5 : index
    %c24_301 = arith.constant 24 : index
    %707 = memref.load %arg3[%c5_300, %c24_301] : memref<6x27xf32, #tpu.memory_space<smem>>
    %708 = vector.broadcast %707 : f32 to vector<16x16xf32>
    %709 = arith.mulf %708, %54 : vector<16x16xf32>
    %710 = arith.addf %706, %709 : vector<16x16xf32>
    %c5_302 = arith.constant 5 : index
    %c25_303 = arith.constant 25 : index
    %711 = memref.load %arg3[%c5_302, %c25_303] : memref<6x27xf32, #tpu.memory_space<smem>>
    %712 = vector.broadcast %711 : f32 to vector<16x16xf32>
    %713 = arith.mulf %712, %56 : vector<16x16xf32>
    %714 = arith.addf %710, %713 : vector<16x16xf32>
    %c5_304 = arith.constant 5 : index
    %c26_305 = arith.constant 26 : index
    %715 = memref.load %arg3[%c5_304, %c26_305] : memref<6x27xf32, #tpu.memory_space<smem>>
    %716 = vector.broadcast %715 : f32 to vector<16x16xf32>
    %717 = arith.mulf %716, %58 : vector<16x16xf32>
    %718 = arith.addf %714, %717 : vector<16x16xf32>
    %719 = arith.maximumf %168, %278 : vector<16x16xf32>
    %720 = arith.subf %168, %719 : vector<16x16xf32>
    %721 = math.exp %720 : vector<16x16xf32>
    %722 = arith.subf %278, %719 : vector<16x16xf32>
    %723 = math.exp %722 : vector<16x16xf32>
    %724 = arith.addf %721, %723 : vector<16x16xf32>
    %cst = arith.constant 1.000000e+00 : f32
    %725 = vector.broadcast %cst : f32 to vector<16x16xf32>
    %726 = arith.divf %725, %724 : vector<16x16xf32>
    %727 = arith.mulf %721, %726 : vector<16x16xf32>
    %c0_306 = arith.constant 0 : index
    %c0_307 = arith.constant 0 : index
    %c0_308 = arith.constant 0 : index
    %c0_309 = arith.constant 0 : index
    %728 = vector.load %arg5[%c0_306, %c0_307, %c0_308, %c0_309] : memref<1x2x16x16xf32, #tpu.memory_space<vmem>>, vector<1x1x16x16xf32>
    %729 = vector.shape_cast %728 : vector<1x1x16x16xf32> to vector<16x16xf32>
    %730 = vector.shape_cast %727 : vector<16x16xf32> to vector<1x1x16x16xf32>
    tpu.vector_store %arg5[%c0_306, %c0_307, %c0_308, %c0_309], %730 {strides = array<i32>} : memref<1x2x16x16xf32, #tpu.memory_space<vmem>>, vector<1x1x16x16xf32>,
    %731 = arith.mulf %723, %726 : vector<16x16xf32>
    %c0_310 = arith.constant 0 : index
    %c1_311 = arith.constant 1 : index
    %c0_312 = arith.constant 0 : index
    %c0_313 = arith.constant 0 : index
    %732 = vector.load %arg5[%c0_310, %c1_311, %c0_312, %c0_313] : memref<1x2x16x16xf32, #tpu.memory_space<vmem>>, vector<1x1x16x16xf32>
    %733 = vector.shape_cast %732 : vector<1x1x16x16xf32> to vector<16x16xf32>
    %734 = vector.shape_cast %731 : vector<16x16xf32> to vector<1x1x16x16xf32>
    tpu.vector_store %arg5[%c0_310, %c1_311, %c0_312, %c0_313], %734 {strides = array<i32>} : memref<1x2x16x16xf32, #tpu.memory_space<vmem>>, vector<1x1x16x16xf32>,
    %735 = arith.maximumf %388, %498 : vector<16x16xf32>
    %736 = arith.maximumf %735, %608 : vector<16x16xf32>
    %737 = arith.subf %388, %736 : vector<16x16xf32>
    %738 = math.exp %737 : vector<16x16xf32>
    %739 = arith.subf %498, %736 : vector<16x16xf32>
    %740 = math.exp %739 : vector<16x16xf32>
    %741 = arith.subf %608, %736 : vector<16x16xf32>
    %742 = math.exp %741 : vector<16x16xf32>
    %743 = arith.addf %738, %740 : vector<16x16xf32>
    %744 = arith.addf %743, %742 : vector<16x16xf32>
    %cst_314 = arith.constant 1.000000e+00 : f32
    %745 = vector.broadcast %cst_314 : f32 to vector<16x16xf32>
    %746 = arith.divf %745, %744 : vector<16x16xf32>
    %747 = arith.mulf %738, %746 : vector<16x16xf32>
    %c0_315 = arith.constant 0 : index
    %c0_316 = arith.constant 0 : index
    %c0_317 = arith.constant 0 : index
    %c0_318 = arith.constant 0 : index
    %748 = vector.load %arg6[%c0_315, %c0_316, %c0_317, %c0_318] : memref<1x3x16x16xf32, #tpu.memory_space<vmem>>, vector<1x1x16x16xf32>
    %749 = vector.shape_cast %748 : vector<1x1x16x16xf32> to vector<16x16xf32>
    %750 = vector.shape_cast %747 : vector<16x16xf32> to vector<1x1x16x16xf32>
    tpu.vector_store %arg6[%c0_315, %c0_316, %c0_317, %c0_318], %750 {strides = array<i32>} : memref<1x3x16x16xf32, #tpu.memory_space<vmem>>, vector<1x1x16x16xf32>,
    %751 = arith.mulf %740, %746 : vector<16x16xf32>
    %c0_319 = arith.constant 0 : index
    %c1_320 = arith.constant 1 : index
    %c0_321 = arith.constant 0 : index
    %c0_322 = arith.constant 0 : index
    %752 = vector.load %arg6[%c0_319, %c1_320, %c0_321, %c0_322] : memref<1x3x16x16xf32, #tpu.memory_space<vmem>>, vector<1x1x16x16xf32>
    %753 = vector.shape_cast %752 : vector<1x1x16x16xf32> to vector<16x16xf32>
    %754 = vector.shape_cast %751 : vector<16x16xf32> to vector<1x1x16x16xf32>
    tpu.vector_store %arg6[%c0_319, %c1_320, %c0_321, %c0_322], %754 {strides = array<i32>} : memref<1x3x16x16xf32, #tpu.memory_space<vmem>>, vector<1x1x16x16xf32>,
    %755 = arith.mulf %742, %746 : vector<16x16xf32>
    %c0_323 = arith.constant 0 : index
    %c2_324 = arith.constant 2 : index
    %c0_325 = arith.constant 0 : index
    %c0_326 = arith.constant 0 : index
    %756 = vector.load %arg6[%c0_323, %c2_324, %c0_325, %c0_326] : memref<1x3x16x16xf32, #tpu.memory_space<vmem>>, vector<1x1x16x16xf32>
    %757 = vector.shape_cast %756 : vector<1x1x16x16xf32> to vector<16x16xf32>
    %758 = vector.shape_cast %755 : vector<16x16xf32> to vector<1x1x16x16xf32>
    tpu.vector_store %arg6[%c0_323, %c2_324, %c0_325, %c0_326], %758 {strides = array<i32>} : memref<1x3x16x16xf32, #tpu.memory_space<vmem>>, vector<1x1x16x16xf32>,
    %c0_327 = arith.constant 0 : index
    %c0_328 = arith.constant 0 : index
    %c0_329 = arith.constant 0 : index
    %c0_330 = arith.constant 0 : index
    %759 = vector.load %arg7[%c0_327, %c0_328, %c0_329, %c0_330] : memref<1x1x16x16xf32, #tpu.memory_space<vmem>>, vector<1x1x16x16xf32>
    %760 = vector.shape_cast %759 : vector<1x1x16x16xf32> to vector<16x16xf32>
    %761 = vector.shape_cast %718 : vector<16x16xf32> to vector<1x1x16x16xf32>
    tpu.vector_store %arg7[%c0_327, %c0_328, %c0_329, %c0_330], %761 {strides = array<i32>} : memref<1x1x16x16xf32, #tpu.memory_space<vmem>>, vector<1x1x16x16xf32>,
    return
  }
  func.func @transform_0(%arg0: i32, %arg1: i32) -> (i32, i32, i32, i32) {
    %c0_i32 = arith.constant 0 : i32
    %c0_i32_0 = arith.constant 0 : i32
    %c0_i32_1 = arith.constant 0 : i32
    %c0_i32_2 = arith.constant 0 : i32
    return %arg0, %c0_i32, %c0_i32_0, %c0_i32_1 : i32, i32, i32, i32
  }
  func.func @transform_1(%arg0: i32, %arg1: i32) -> (i32, i32) {
    %c0_i32 = arith.constant 0 : i32
    %c0_i32_0 = arith.constant 0 : i32
    %c0_i32_1 = arith.constant 0 : i32
    return %c0_i32, %c0_i32_0 : i32, i32
  }
  func.func @transform_2(%arg0: i32, %arg1: i32) -> i32 {
    %c0_i32 = arith.constant 0 : i32
    %c0_i32_0 = arith.constant 0 : i32
    return %c0_i32 : i32
  }
  func.func @transform_3(%arg0: i32, %arg1: i32) -> (i32, i32, i32, i32) {
    %c0_i32 = arith.constant 0 : i32
    %c0_i32_0 = arith.constant 0 : i32
    %c0_i32_1 = arith.constant 0 : i32
    return %arg0, %c0_i32, %arg1, %c0_i32_0 : i32, i32, i32, i32
  }
  func.func @transform_4(%arg0: i32, %arg1: i32) -> (i32, i32, i32, i32) {
    %c0_i32 = arith.constant 0 : i32
    %c0_i32_0 = arith.constant 0 : i32
    %c0_i32_1 = arith.constant 0 : i32
    return %arg0, %c0_i32, %arg1, %c0_i32_0 : i32, i32, i32, i32
  }
  func.func @transform_5(%arg0: i32, %arg1: i32) -> (i32, i32, i32, i32) {
    %c0_i32 = arith.constant 0 : i32
    %c0_i32_0 = arith.constant 0 : i32
    %c0_i32_1 = arith.constant 0 : i32
    return %arg0, %c0_i32, %arg1, %c0_i32_0 : i32, i32, i32, i32
  }
}

</mosaic_0001>

<bundles_post_ra>
// kernel: dss_trainer_forward.1
= control target key start
LH: loop header
LB: loop body
LE: loop exit
PB: predicated region body
PF: predicated region fallthrough
CT: control target
= control target key end

     0   :  { %s5876_s0 = inlined_call_operand.vmem [shape: f32[2,3,18,18], index: 0, kind: input, shape index: {}]   ;;  %s5877_s1 = inlined_call_operand.vmem [shape: f32[6,27], index: 1, kind: input, shape index: {}]   ;;  %s5878_s2 = inlined_call_operand.vmem [shape: f32[6], index: 2, kind: input, shape index: {}]   ;;  %s5879_s3 = inlined_call_operand.hbm [shape: f32[2,2,16,16], index: 3, kind: output, shape index: {0}]   ;;  %s5880_s4 = inlined_call_operand.hbm [shape: f32[2,3,16,16], index: 4, kind: output, shape index: {1}]   ;;  %s5881_s5 = inlined_call_operand.hbm [shape: f32[2,1,16,16], index: 5, kind: output, shape index: {2}]  }
   0x1   :  { %5888 = sst [smem:[#allocation21_spill]] %s5876_s0 }
   0x2   :  { %11 = vsyncpa [#allocation4], 0 }
   0x3   :  { %12 = vsyncpa [#allocation6], 0 }
   0x4   :  { %13 = vsyncpa [#allocation3], 0 }
   0x5   :  { %15 = vsyncpa [#allocation3 + $0x1], 0 }
   0x6   :  { %16 = vsyncpa [#allocation9], 0 }
   0x7   :  { %18 = vsyncpa [#allocation9 + $0x1], 0  ;;  %s3967_s18 = smov 0   ;;  %s3969_s19 = smov 0  }
   0x8   :  { %s3971_s20 = smov 0   ;;  %s3973_s21 = smov 0  }
   0x9   :  { %s3975_s22 = smov 0   ;;  %s3977_s23 = smov 0  }
   0xa LB: > { %s3998_s24 = sadd.s32 4294967295, %s3929_s23   ;;  %s5883_s25 = sadd.s32 4294967294, %s3929_s23   ;;  %s3929_s23 = sphi %s3977_s23, %s24_s23   ;;  %s3925_s22 = sphi %s3975_s22, %s5912_s22   ;;  %s3921_s21 = sphi %s3973_s21, %s5911_s21   ;;  %s3917_s20 = sphi %s3971_s20, %s5910_s20   ;;  %s3913_s19 = sphi %s3969_s19, %s5909_s19   ;;  %s3909_s18 = sphi %s3967_s18, %s5908_s18  }
   0xb   : > { %s36_s26 = sadd.s32 1, %s3925_s22  ;;  %s113_s27 = sadd.s32 1, %s3917_s20 }
   0xc   : > { %p38_p0 = scmp.ge.s32.totalorder %s36_s26, 2  ;;  %p123_p1 = scmp.ne.s32.totalorder %s3917_s20, %s3913_s19 }
   0xd   : > { %p124_p2 = scmp.eq.s32.totalorder %s3998_s24, 1  ;;  %p129_p3 = scmp.ne.s32.totalorder %s3913_s19, %s3909_s18 }
   0xe   : > { %s5914_s26 = smov (%p38_p0, %s36_s26), 0  ;;  %p130_p5 = scmp.eq.s32.totalorder %s5883_s25, 1 }
   0xf   : > { %p4010_p4 = por %p124_p2, %p123_p1  ;;  %s108_s29 = ssub.s32 %s3925_s22, %s5914_s26 }
  0x10   : > { %p3412_p6 = scmp.ge.s32.totalorder %s3929_s23, 1  ;;  %p111_p7 = scmp.eq.s32.totalorder %s108_s29, 0 }
  0x11   : > { %p4019_p8 = por %p130_p5, %p129_p3  ;;  %p193_p9 = scmp.lt.s32.totalorder %s3929_s23, 3 }
  0x12   : > { %s4025_s6 = scalar_select %p111_p7, %s3917_s20, %s113_s27  }
  0x13   : > { %p194_p10 = pnand %p3412_p6, %p193_p9  ;;  %p3639_p11 = scmp.eq.s32.totalorder %s3998_s24, 0 }
  0x14   : > { %s205_s9 = sshll.u32 %s5877_s1, 4  ;;  %s215_s12 = sshll.u32 %s5878_s2, 4  ;;  %s206_s9 = int_to_ptr.vmem [resolvable:$true] %s205_s9  ;;  %s216_s12 = int_to_ptr.vmem [resolvable:$true] %s215_s12 }
  0x15   : > { %p3622_p12 = pneg %p194_p10  ;;  %s3931_s13 = smov [#allocation2]  }
  0x16   : > { %s3932_s14 = smov [#allocation5]   ;;  %236 = sbr.rel (%p194_p10) target bundleno = 737 (0x2e1), region = 32 }
  0x17   : > { %p3623_p13 = pnand %p3639_p11, %p3622_p12 }
  0x19   : > { %3625 = dma.vmem_to_smem (!%p3623_p13), %s206_s9, 128, %s3931_s13, [#allocation4]  }
  0x1a   : > { %3628 = dma.vmem_to_smem (!%p3623_p13), %s216_s12, 16, %s3932_s14, [#allocation6]  }
  0x1b   : > { %3892 = dma.done.wait (%p3639_p11), [#allocation4], 128  }
  0x1c   : > { %3894 = vsyncadd (%p3639_p11), [#allocation4], 4294967168 }
  0x1d   : > { %3896 = dma.done.wait (%p3639_p11), [#allocation6], 16  }
  0x1e   : > { %3898 = vsyncadd (%p3639_p11), [#allocation6], 4294967280 }
  0x1f   : > { %248 = sfence }
  0x20   : > { %p281_p0 = scmp.lt.s32.totalorder %s3921_s21, 1  ;;  %s3423_s15 = sld [smem:[#allocation2 + $0x2]]  ;;  %vm344_vm0 = vcmask 1046528   ;;  %vm404_vm1 = vcmask 1045504   ;;  %vm3098_vm2 = vcmask 130048  }
  0x21   : > { %s3422_s16 = sld [smem:[#allocation2 + $0x1]]  ;;  %s5886_s11 = smov 126  }
  0x22   : > { %s282_s17 = scalar_select %p281_p0, %s3921_s21, 1 }
  0x23   : > { %s3426_s29 = sld [smem:[#allocation2 + $0x5]]  ;;  %s5884_s12 = smov 127  }
  0x24   : > { %s3606_s27 = smul.u32 72, %s282_s17  ;;  %s5891_s0 = sld [smem:[#allocation21_spill]] }
  0x25   : > { %s3425_s10 = sld [smem:[#allocation2 + $0x4]] }
  0x26   : > { %v323_v0 = vstv %s3423_s15  ;;  %s3429_s13 = sld [smem:[#allocation2 + $0x8]] }
  0x27   : > { %v309_v2 = vstv %s3422_s16  ;;  %s3428_s14 = sld [smem:[#allocation2 + $0x7]] }
  0x28   : > { %s3431_s15 = sld [smem:[#allocation2 + $0xa]] }
  0x29   : > { %v376_v7 = vstv %s3426_s29  ;;  %s3434_s16 = sld [smem:[#allocation2 + $0xd]] }
  0x2a   : > { %s4049_s9 = scalar_lea.vmem %s5891_s0, %s3606_s27  ;;  %s3432_s17 = sld [smem:[#allocation2 + $0xb]] }
  0x2b   : > { %v4052_v1 = vld [vmem:[%s4049_s9] sm:$0xff]  ;;  %v4059_v5 = vld [vmem:[%s4049_s9 + $0x8] sm:$0xff]  ;;  %v4062_v6 = vld [vmem:[%s4049_s9 + $0x10] sm:$0x3]  ;;  %v355_v8 = vstv %s3425_s10  ;;  %s3435_s27 = sld [smem:[#allocation2 + $0xe]] }
  0x2c   : > { %v324_v3 = vmul.f32 %v323_v0, %v4052_v1  ;;  %v310_v4 = vmul.f32 %v309_v2, %v4052_v1  ;;  %v325_v9 = vmul.f32 %v323_v0, %v4059_v5  ;;  %v311_v10 = vmul.f32 %v309_v2, %v4059_v5  ;;  %v4094_v43 = vld [vmem:[%s4049_s9 + $0x20] sm:$0xff]  ;;  %v4097_v45 = vld [vmem:[%s4049_s9 + $0x18] sm:$0xff]  ;;  %v4108_v56 = vld [vmem:[%s4049_s9 + $0x28] sm:$0x3]  ;;  %s3438_s29 = sld [smem:[#allocation2 + $0x11]] }
  0x2d   : > { %v356_v11 = vmul.f32 %v355_v8, %v4052_v1  ;;  %v378_v12 = vmul.f32 %v376_v7, %v4059_v5  ;;  %v379_v13 = vmul.f32 %v376_v7, %v4062_v6  ;;  %v377_v14 = vmul.f32 %v376_v7, %v4052_v1  ;;  %s3437_s7 = sld [smem:[#allocation2 + $0x10]] }
  0x2e   : > { %328 = vrot.lane.b32.xlu1 %v324_v3, %s5886_s11  ;;  %314 = vrot.lane.b32.xlu0 %v310_v4, %s5884_s12  ;;  %v357_v15 = vmul.f32 %v355_v8, %v4059_v5  ;;  %v358_v18 = vmul.f32 %v355_v8, %v4062_v6  ;;  %v436_v19 = vstv %s3429_s13  ;;  %v415_v24 = vstv %s3428_s14  ;;  %s3440_s8 = sld [smem:[#allocation2 + $0x13]] }
  0x2f   : > { %v362_v16 = vrot.slane %v356_v11, 1  ;;  %v384_v20 = vrot.slane %v378_v12, 1  ;;  %v386_v21 = vrot.slane %v379_v13, 1  ;;  %v383_v22 = vrot.slane %v377_v14, 1  ;;  %s3443_s10 = sld [smem:[#allocation2 + $0x16]] }
  0x30   : > { %v363_v17 = vrot.slane %v357_v15, 1  ;;  %v365_v25 = vrot.slane %v358_v18, 1  ;;  %v437_v26 = vmul.f32 %v436_v19, %v4052_v1  ;;  %v438_v27 = vmul.f32 %v436_v19, %v4059_v5  ;;  %s3441_s13 = sld [smem:[#allocation2 + $0x14]] }
  0x31   : > { %v387_v28 = vsel %vm344_vm0, %v384_v20, %v386_v21  ;;  %v385_v29 = vsel %vm344_vm0, %v383_v22, %v384_v20  ;;  %v417_v30 = vmul.f32 %v415_v24, %v4059_v5  ;;  %v418_v31 = vmul.f32 %v415_v24, %v4062_v6  ;;  %s3444_s14 = sld [smem:[#allocation2 + $0x17]] }
  0x32   : > { %v364_v23 = vsel %vm344_vm0, %v362_v16, %v363_v17  ;;  %v366_v32 = vsel %vm344_vm0, %v363_v17, %v365_v25  ;;  %v416_v33 = vmul.f32 %v415_v24, %v4052_v1  ;;  %v443_v34 = vrot.slane %v437_v26, 2 }
  0x33   : > { %367 = vrot.lane.b32.xlu2 %v364_v23, %s5884_s12  ;;  %v444_v35 = vrot.slane %v438_v27, 2  ;;  %v423_v36 = vrot.slane %v417_v30, 2  ;;  %v425_v37 = vrot.slane %v418_v31, 2  ;;  %v439_v42 = vmul.f32 %v436_v19, %v4062_v6  ;;  %v4139_v27 = vld [vmem:[%s4049_s9 + $0x38] sm:$0xff] }
  0x34   : > { %v422_v38 = vrot.slane %v416_v33, 2  ;;  %v463_v44 = vstv %s3431_s15  ;;  %v508_v46 = vstv %s3434_s16  ;;  %v477_v55 = vstv %s3432_s17  ;;  %s3447_s15 = sld [smem:[#allocation2 + $0x1a]] }
  0x35   : > { %v445_v39 = vsel %vm404_vm1, %v443_v34, %v444_v35  ;;  %v426_v40 = vsel %vm404_vm1, %v423_v36, %v425_v37  ;;  %v446_v47 = vrot.slane %v439_v42, 2  ;;  %v465_v48 = vmul.f32 %v463_v44, %v4094_v43  ;;  %s3446_s16 = sld [smem:[#allocation2 + $0x19]] }
  0x36   : > { %330 = vrot.lane.b32.xlu1 %v325_v9, %s5886_s11  ;;  %316 = vrot.lane.b32.xlu0 %v311_v10, %s5884_s12  ;;  %v424_v41 = vsel %vm404_vm1, %v422_v38, %v423_v36  ;;  %v464_v49 = vmul.f32 %v463_v44, %v4097_v45  ;;  %v509_v50 = vmul.f32 %v508_v46, %v4097_v45  ;;  %v529_v57 = vstv %s3435_s27  ;;  %s3450_s17 = sld [smem:[#allocation2 + $0x81]] }
  0x37   : > { %v510_v51 = vmul.f32 %v508_v46, %v4094_v43  ;;  %v447_v52 = vsel %vm404_vm1, %v444_v35, %v446_v47  ;;  %v479_v58 = vmul.f32 %v477_v55, %v4094_v43  ;;  %v531_v59 = vmul.f32 %v529_v57, %v4094_v43  ;;  %s3453_s27 = sld [smem:[#allocation2 + $0x84]] }
  0x38   : > { %v515_v53 = vrot.slane %v509_v50, 1  ;;  %v532_v60 = vmul.f32 %v529_v57, %v4108_v56  ;;  %v530_v61 = vmul.f32 %v529_v57, %v4097_v45  ;;  %v478_v63 = vmul.f32 %v477_v55, %v4097_v45 }
  0x39   : > { %v516_v54 = vrot.slane %v510_v51, 1  ;;  %v511_v0 = vmul.f32 %v508_v46, %v4108_v56  ;;  %v537_v2 = vrot.slane %v531_v59, 1  ;;  %v588_v7 = vstv %s3438_s29  ;;  %s3451_s29 = sld [smem:[#allocation2 + $0x82]] }
  0x3a   : > { %v539_v3 = vrot.slane %v532_v60, 1  ;;  %v536_v4 = vrot.slane %v530_v61, 1  ;;  %v567_v8 = vstv %s3437_s7  ;;  %v589_v12 = vmul.f32 %v588_v7, %v4097_v45  ;;  %s3454_s7 = sld [smem:[#allocation2 + $0x85]] }
  0x3b   : > { %369 = vrot.lane.b32.xlu2 %v366_v32, %s5884_s12  ;;  %v517_v62 = vsel %vm344_vm0, %v515_v53, %v516_v54  ;;  %v518_v9 = vrot.slane %v511_v0, 1  ;;  %v590_v13 = vmul.f32 %v588_v7, %v4094_v43  ;;  %v569_v14 = vmul.f32 %v567_v8, %v4094_v43 }
  0x3c   : > { %v540_v10 = vsel %vm344_vm0, %v537_v2, %v539_v3  ;;  %v538_v11 = vsel %vm344_vm0, %v536_v4, %v537_v2  ;;  %v570_v15 = vmul.f32 %v567_v8, %v4108_v56  ;;  %v568_v17 = vmul.f32 %v567_v8, %v4097_v45 }
  0x3d   : > { %v519_v16 = vsel %vm344_vm0, %v516_v54, %v518_v9  ;;  %v595_v18 = vrot.slane %v589_v12, 2  ;;  %v596_v19 = vrot.slane %v590_v13, 2  ;;  %v575_v20 = vrot.slane %v569_v14, 2 }
  0x3e   : > { %390 = vrot.lane.b32.xlu1 %v387_v28, %s5886_s11  ;;  %388 = vrot.lane.b32.xlu0 %v385_v29, %s5886_s11  ;;  %v577_v21 = vrot.slane %v570_v15, 2  ;;  %v574_v22 = vrot.slane %v568_v17, 2  ;;  %v591_v26 = vmul.f32 %v588_v7, %v4108_v56  ;;  %v615_v28 = vstv %s3440_s8  ;;  %v4142_v29 = vld [vmem:[%s4049_s9 + $0x30] sm:$0xff]  ;;  %s3457_s8 = sld [smem:[#allocation2 + $0x88]] }
  0x3f   : > { %v597_v23 = vsel %vm404_vm1, %v595_v18, %v596_v19  ;;  %v660_v30 = vstv %s3443_s10  ;;  %v617_v32 = vmul.f32 %v615_v28, %v4139_v27  ;;  %v616_v33 = vmul.f32 %v615_v28, %v4142_v29  ;;  %s3456_s10 = sld [smem:[#allocation2 + $0x87]] }
  0x40   : > { %v578_v24 = vsel %vm404_vm1, %v575_v20, %v577_v21  ;;  %v576_v25 = vsel %vm404_vm1, %v574_v22, %v575_v20  ;;  %v598_v31 = vrot.slane %v591_v26, 2  ;;  %v661_v34 = vmul.f32 %v660_v30, %v4142_v29 }
  0x41   : > { %v662_v35 = vmul.f32 %v660_v30, %v4139_v27  ;;  %v740_v54 = vstv %s3447_s15  ;;  %v719_v55 = vstv %s3446_s16  ;;  %v769_v14 = vstv %s3450_s17  ;;  %s4229_s15 = sld [smem:[#allocation2 + $0x8b]] }
  0x42   : > { %v599_v36 = vsel %vm404_vm1, %v596_v19, %v598_v31  ;;  %v667_v37 = vrot.slane %v661_v34, 1  ;;  %v741_v60 = vmul.f32 %v740_v54, %v4142_v29  ;;  %v742_v61 = vmul.f32 %v740_v54, %v4139_v27  ;;  %s3463_s16 = sld [smem:[#allocation2 + $0x8e]] }
  0x43   : > { %427 = vrot.lane.b32.xlu2 %v424_v41, %s5884_s12  ;;  %v668_v38 = vrot.slane %v662_v35, 1  ;;  %v681_v41 = vstv %s3444_s14  ;;  %v720_v2 = vmul.f32 %v719_v55, %v4142_v29  ;;  %v814_v15 = vstv %s3453_s27  ;;  %s3462_s14 = sld [smem:[#allocation2 + $0x8d]] }
  0x44   : > { %v683_v44 = vmul.f32 %v681_v41, %v4139_v27  ;;  %v682_v47 = vmul.f32 %v681_v41, %v4142_v29  ;;  %v747_v3 = vrot.slane %v741_v60, 2  ;;  %v748_v4 = vrot.slane %v742_v61, 2  ;;  %s3466_s17 = sld [smem:[#allocation2 + $0x91]] }
  0x45   : > { %v726_v9 = vrot.slane %v720_v2, 2  ;;  %v771_v17 = vmul.f32 %v769_v14, %v4059_v5  ;;  %v770_v18 = vmul.f32 %v769_v14, %v4052_v1  ;;  %v815_v19 = vmul.f32 %v814_v15, %v4052_v1  ;;  %s3465_s27 = sld [smem:[#allocation2 + $0x90]] }
  0x46   : > { %448 = vrot.lane.b32.xlu1 %v445_v39, %s5886_s11  ;;  %429 = vrot.lane.b32.xlu0 %v426_v40, %s5884_s12  ;;  %v629_v39 = vstv %s3441_s13  ;;  %v4153_v40 = vld [vmem:[%s4049_s9 + $0x40] sm:$0x3]  ;;  %v689_v51 = vrot.slane %v683_v44, 1  ;;  %v688_v53 = vrot.slane %v682_v47, 1  ;;  %v816_v20 = vmul.f32 %v814_v15, %v4059_v5  ;;  %s3459_s13 = sld [smem:[#allocation2 + $0x8a]] }
  0x47   : > { %v631_v42 = vmul.f32 %v629_v39, %v4139_v27  ;;  %v684_v46 = vmul.f32 %v681_v41, %v4153_v40  ;;  %v663_v50 = vmul.f32 %v660_v30, %v4153_v40  ;;  %v743_v13 = vmul.f32 %v740_v54, %v4153_v40 }
  0x48   : > { %v690_v59 = vsel %vm344_vm0, %v688_v53, %v689_v51  ;;  %v821_v22 = vrot.slane %v815_v19, 1  ;;  %v817_v35 = vmul.f32 %v814_v15, %v4062_v6  ;;  %v873_v41 = vstv %s3456_s10  ;;  %s3472_s10 = sld [smem:[#allocation2 + $0x97]] }
  0x49   : > { %v670_v57 = vrot.slane %v663_v50, 1  ;;  %v875_v50 = vmul.f32 %v873_v41, %v4059_v5  ;;  %v874_v53 = vmul.f32 %v873_v41, %v4052_v1  ;;  %v935_v19 = vstv %s4229_s15  ;;  %s3478_s15 = sld [smem:[#allocation2 + $0x101]] }
  0x4b   : > { %450 = vrot.lane.b32.xlu2 %v447_v52, %s5886_s11  ;;  %v691_v52 = vrot.slane %v684_v46, 1  ;;  %v671_v0 = vsel %vm344_vm0, %v668_v38, %v670_v57  ;;  %v881_v57 = vrot.slane %v875_v50, 2  ;;  %v880_v61 = vrot.slane %v874_v53, 2 }
  0x4d   : > { %v882_v2 = vsel %vm404_vm1, %v880_v61, %v881_v57 }
  0x4e   : > { %470 = vrot.lane.b32.xlu1 %v465_v48, %s5884_s12  ;;  %468 = vrot.lane.b32.xlu0 %v464_v49, %s5884_s12  ;;  %v669_v48 = vsel %vm344_vm0, %v667_v37, %v668_v38  ;;  %v630_v49 = vmul.f32 %v629_v39, %v4142_v29  ;;  %v894_v39 = vstv %s3457_s8  ;;  %s4292_s8 = sld [smem:[#allocation2 + $0x94]] }
  0x53   : > { %482 = vrot.lane.b32.xlu2 %v478_v63, %s5886_s11  ;;  %v722_v63 = vmul.f32 %v719_v55, %v4153_v40 }
  0x55   : > { %v729_v8 = vrot.slane %v722_v63, 2 }
  0x56   : > { %520 = vrot.lane.b32.xlu1 %v517_v62, %s5884_s12  ;;  %484 = vrot.lane.b32.xlu0 %v479_v58, %s5886_s11  ;;  %v692_v58 = vsel %vm344_vm0, %v689_v51, %v691_v52  ;;  %v721_v62 = vmul.f32 %v719_v55, %v4139_v27  ;;  %v876_v51 = vmul.f32 %v873_v41, %v4062_v6  ;;  %v1025_v41 = vstv %s3465_s27  ;;  %s4357_s27 = sld [smem:[#allocation2 + $0x102]] }
  0x58   : > { %v727_v7 = vrot.slane %v721_v62, 2 }
  0x5a   : > { %v728_v12 = vsel %vm404_vm1, %v726_v9, %v727_v7  ;;  %v966_v9 = vstv %s3462_s14  ;;  %s3474_s14 = sld [smem:[#allocation2 + $0x99]] }
  0x5b   : > { %522 = vrot.lane.b32.xlu2 %v519_v16, %s5884_s12  ;;  %v750_v16 = vrot.slane %v743_v13, 2  ;;  %v967_v14 = vmul.f32 %v966_v9, %v4097_v45  ;;  %v968_v15 = vmul.f32 %v966_v9, %v4094_v43 }
  0x5d   : > { %v751_v21 = vsel %vm404_vm1, %v748_v4, %v750_v16 }
  0x5e   : > { %543 = vrot.lane.b32.xlu1 %v540_v10, %s5886_s11  ;;  %541 = vrot.lane.b32.xlu0 %v538_v11, %s5886_s11  ;;  %v749_v10 = vsel %vm404_vm1, %v747_v3, %v748_v4  ;;  %v730_v11 = vsel %vm404_vm1, %v727_v7, %v729_v8  ;;  %v897_v3 = vmul.f32 %v894_v39, %v4062_v6  ;;  %v921_v4 = vstv %s3459_s13  ;;  %s3475_s13 = sld [smem:[#allocation2 + $0x9a]] }
  0x63   : > { %579 = vrot.lane.b32.xlu2 %v576_v25, %s5884_s12  ;;  %v835_v25 = vstv %s3454_s7  ;;  %s3471_s7 = sld [smem:[#allocation2 + $0x96]] }
  0x64   : > { %v837_v28 = vmul.f32 %v835_v25, %v4059_v5  ;;  %v838_v30 = vmul.f32 %v835_v25, %v4062_v6  ;;  %v836_v31 = vmul.f32 %v835_v25, %v4052_v1 }
  0x66   : > { %600 = vrot.lane.b32.xlu1 %v597_v23, %s5886_s11  ;;  %581 = vrot.lane.b32.xlu0 %v578_v24, %s5884_s12  ;;  %v822_v23 = vrot.slane %v816_v20, 1  ;;  %v783_v24 = vstv %s3451_s29  ;;  %v845_v37 = vrot.slane %v838_v30, 1  ;;  %v842_v38 = vrot.slane %v836_v31, 1  ;;  %s3468_s29 = sld [smem:[#allocation2 + $0x93]] }
  0x67   : > { %v785_v26 = vmul.f32 %v783_v24, %v4059_v5  ;;  %v784_v34 = vmul.f32 %v783_v24, %v4052_v1  ;;  %v987_v20 = vstv %s3463_s16  ;;  %v936_v31 = vmul.f32 %v935_v19, %v4097_v45  ;;  %s3481_s16 = sld [smem:[#allocation2 + $0x104]] }
  0x68   : > { %v989_v24 = vmul.f32 %v987_v20, %v4094_v43  ;;  %v990_v25 = vmul.f32 %v987_v20, %v4108_v56 }
  0x6b   : > { %602 = vrot.lane.b32.xlu2 %v599_v36, %s5886_s11  ;;  %v843_v36 = vrot.slane %v837_v28, 1 }
  0x6d   : > { %v846_v44 = vsel %vm344_vm0, %v843_v36, %v845_v37  ;;  %v844_v46 = vsel %vm344_vm0, %v842_v38, %v843_v36 }
  0x6e   : > { %622 = vrot.lane.b32.xlu1 %v617_v32, %s5884_s12  ;;  %620 = vrot.lane.b32.xlu0 %v616_v33, %s5884_s12  ;;  %v823_v33 = vsel %vm344_vm0, %v821_v22, %v822_v23 }
  0x73   : > { %634 = vrot.lane.b32.xlu2 %v630_v49, %s5886_s11  ;;  %v896_v49 = vmul.f32 %v894_v39, %v4059_v5 }
  0x75   : > { %v902_v55 = vrot.slane %v896_v49, 2 }
  0x76   : > { %672 = vrot.lane.b32.xlu1 %v669_v48, %s5884_s12  ;;  %636 = vrot.lane.b32.xlu0 %v631_v42, %s5886_s11  ;;  %v824_v42 = vrot.slane %v817_v35, 1  ;;  %v895_v48 = vmul.f32 %v894_v39, %v4052_v1  ;;  %v997_v35 = vrot.slane %v990_v25, 1  ;;  %v1046_v39 = vstv %s3466_s17  ;;  %s4351_s17 = sld [smem:[#allocation2]] }
  0x77   : > { %v1047_v49 = vmul.f32 %v1046_v39, %v4097_v45  ;;  %v1048_v50 = vmul.f32 %v1046_v39, %v4094_v43 }
  0x78   : > { %v825_v52 = vsel %vm344_vm0, %v822_v23, %v824_v42  ;;  %v901_v54 = vrot.slane %v895_v48, 2  ;;  %v937_v23 = vmul.f32 %v935_v19, %v4094_v43 }
  0x7a   : > { %v903_v63 = vsel %vm404_vm1, %v901_v54, %v902_v55  ;;  %v1026_v54 = vmul.f32 %v1025_v41, %v4097_v45 }
  0x7b   : > { %674 = vrot.lane.b32.xlu2 %v671_v0, %s5884_s12 }
  0x7e   : > { %695 = vrot.lane.b32.xlu1 %v692_v58, %s5886_s11  ;;  %693 = vrot.lane.b32.xlu0 %v690_v59, %s5886_s11  ;;  %v883_v58 = vrot.slane %v876_v51, 2  ;;  %v1027_v51 = vmul.f32 %v1025_v41, %v4094_v43 }
  0x80   : > { %v884_v0 = vsel %vm404_vm1, %v881_v57, %v883_v58  ;;  %v1054_v57 = vrot.slane %v1048_v50, 2  ;;  %v1033_v58 = vrot.slane %v1027_v51, 2 }
  0x83   : > { %731 = vrot.lane.b32.xlu2 %v728_v12, %s5884_s12  ;;  %v922_v12 = vmul.f32 %v921_v4, %v4097_v45 }
  0x86   : > { %752 = vrot.lane.b32.xlu1 %v749_v10, %s5886_s11  ;;  %733 = vrot.lane.b32.xlu0 %v730_v11, %s5884_s12  ;;  %v904_v10 = vrot.slane %v897_v3, 2  ;;  %v923_v11 = vmul.f32 %v921_v4, %v4094_v43 }
  0x88   : > { %v905_v16 = vsel %vm404_vm1, %v902_v55, %v904_v10  ;;  %v1053_v55 = vrot.slane %v1047_v49, 2 }
  0x8a   : > { %v1055_v4 = vsel %vm404_vm1, %v1053_v55, %v1054_v57 }
  0x8b   : > { %754 = vrot.lane.b32.xlu2 %v751_v21, %s5886_s11 }
  0x8d   : > { %v4196_v32 = vpop.permute.xlu2 %367 }
  0x8e   : > { %776 = vrot.lane.b32.xlu1 %v771_v17, %s5884_s12  ;;  %774 = vrot.lane.b32.xlu0 %v770_v18, %s5884_s12  ;;  %v973_v17 = vrot.slane %v967_v14, 1  ;;  %v974_v18 = vrot.slane %v968_v15, 1 }
  0x90   : > { %v975_v30 = vsel %vm344_vm0, %v973_v17, %v974_v18 }
  0x93   : > { %788 = vrot.lane.b32.xlu2 %v784_v34, %s5886_s11  ;;  %v995_v34 = vrot.slane %v989_v24, 1 }
  0x95   : > { %v4206_v47 = vpop.permute.xlu2 %369 }
  0x96   : > { %826 = vrot.lane.b32.xlu1 %v823_v33, %s5884_s12  ;;  %790 = vrot.lane.b32.xlu0 %v785_v26, %s5886_s11  ;;  %v988_v26 = vmul.f32 %v987_v20, %v4097_v45  ;;  %v969_v33 = vmul.f32 %v966_v9, %v4108_v56 }
  0x98   : > { %v994_v36 = vrot.slane %v988_v26, 1  ;;  %v976_v42 = vrot.slane %v969_v33, 1  ;;  %v1139_v33 = vstv %s3472_s10  ;;  %s3485_s10 = sld [smem:[#allocation2 + $0x108]] }
  0x9a   : > { %v977_v53 = vsel %vm344_vm0, %v974_v18, %v976_v42  ;;  %v1140_v42 = vmul.f32 %v1139_v33, %v4142_v29 }
  0x9b   : > { %828 = vrot.lane.b32.xlu2 %v825_v52, %s5884_s12  ;;  %v1028_v52 = vmul.f32 %v1025_v41, %v4108_v56  ;;  %v1142_v41 = vmul.f32 %v1139_v33, %v4153_v40 }
  0x9d   : > { %v4221_v62 = vpop.permute.xlu2 %427  ;;  %v1035_v61 = vrot.slane %v1028_v52, 2  ;;  %v1149_v52 = vrot.slane %v1142_v41, 1  ;;  %v1227_v41 = vstv %s3478_s15  ;;  %s4408_s15 = sld [smem:[#allocation2 + $0x80]] }
  0x9e   : > { %849 = vrot.lane.b32.xlu1 %v846_v44, %s5886_s11  ;;  %847 = vrot.lane.b32.xlu0 %v844_v46, %s5886_s11  ;;  %v998_v44 = vsel %vm344_vm0, %v995_v34, %v997_v35  ;;  %v996_v46 = vsel %vm344_vm0, %v994_v36, %v995_v34 }
  0x9f   : > { %v1036_v9 = vsel %vm404_vm1, %v1033_v58, %v1035_v61 }
  0xa0   : > { %v4216_v59 = vpop.permute.xlu1 %328  ;;  %v4218_v60 = vpop.permute.xlu0 %314 }
  0xa3   : > { %885 = vrot.lane.b32.xlu2 %v882_v2, %s5884_s12  ;;  %v1032_v2 = vrot.slane %v1026_v54, 2 }
  0xa5   : > { %v4238_v13 = vpop.permute.xlu2 %450  ;;  %v1034_v10 = vsel %vm404_vm1, %v1032_v2, %v1033_v58  ;;  %v1177_v58 = vstv %s3474_s14  ;;  %s3427_s14 = sld [smem:[#allocation2 + $0x6]] }
  0xa6   : > { %906 = vrot.lane.b32.xlu1 %v903_v63, %s5886_s11  ;;  %887 = vrot.lane.b32.xlu0 %v884_v0, %s5884_s12 }
  0xa8   : > { %v4231_v7 = vpop.permute.xlu1 %330  ;;  %v4233_v8 = vpop.permute.xlu0 %316 }
  0xab   : > { %908 = vrot.lane.b32.xlu2 %v905_v16, %s5886_s11  ;;  %v1118_v16 = vstv %s3471_s7  ;;  %s4359_s7 = sld [smem:[#allocation5]] }
  0xac   : > { %v1120_v24 = vmul.f32 %v1118_v16, %v4139_v27  ;;  %v1121_v50 = vmul.f32 %v1118_v16, %v4153_v40 }
  0xad   : > { %v4255_v28 = vpop.permute.xlu2 %482 }
  0xae   : > { %928 = vrot.lane.b32.xlu1 %v923_v11, %s5884_s12  ;;  %926 = vrot.lane.b32.xlu0 %v922_v12, %s5884_s12  ;;  %v1049_v11 = vmul.f32 %v1046_v39, %v4108_v56  ;;  %v1073_v12 = vstv %s3468_s29  ;;  %v1141_v39 = vmul.f32 %v1139_v33, %v4139_v27  ;;  %v1128_v61 = vrot.slane %v1121_v50, 1  ;;  %s3482_s29 = sld [smem:[#allocation2 + $0x105]] }
  0xaf   : > { %v1075_v18 = vmul.f32 %v1073_v12, %v4139_v27  ;;  %v1074_v19 = vmul.f32 %v1073_v12, %v4142_v29  ;;  %v1179_v12 = vmul.f32 %v1177_v58, %v4139_v27  ;;  %v1229_v50 = vmul.f32 %v1227_v41, %v4059_v5 }
  0xb0   : > { %v4246_v21 = vpop.permute.xlu1 %390  ;;  %v4248_v22 = vpop.permute.xlu0 %388  ;;  %v1056_v17 = vrot.slane %v1049_v11, 2  ;;  %v1147_v51 = vrot.slane %v1141_v39, 1 }
  0xb2   : > { %v1057_v25 = vsel %vm404_vm1, %v1054_v57, %v1056_v17  ;;  %v1198_v57 = vstv %s3475_s13  ;;  %v1150_v2 = vsel %vm344_vm0, %v1147_v51, %v1149_v52  ;;  %s3484_s13 = sld [smem:[#allocation2 + $0x107]] }
  0xb3   : > { %940 = vrot.lane.b32.xlu2 %v936_v31, %s5886_s11  ;;  %v1087_v31 = vstv %s4292_s8  ;;  %v1200_v11 = vmul.f32 %v1198_v57, %v4139_v27  ;;  %v1201_v39 = vmul.f32 %v1198_v57, %v4153_v40  ;;  %s3424_s8 = sld [smem:[#allocation2 + $0x3]] }
  0xb4   : > { %v1089_v36 = vmul.f32 %v1087_v31, %v4139_v27  ;;  %v1088_v49 = vmul.f32 %v1087_v31, %v4142_v29 }
  0xb5   : > { %v4269_v48 = vpop.permute.xlu2 %522 }
  0xb6   : > { %978 = vrot.lane.b32.xlu1 %v975_v30, %s5884_s12  ;;  %942 = vrot.lane.b32.xlu0 %v937_v23, %s5886_s11  ;;  %v1119_v23 = vmul.f32 %v1118_v16, %v4142_v29  ;;  %v1126_v30 = vrot.slane %v1120_v24, 1  ;;  %v1180_v16 = vmul.f32 %v1177_v58, %v4153_v40  ;;  %v1185_v24 = vrot.slane %v1179_v12, 2 }
  0xb7   : > { %v1208_v40 = vrot.slane %v1201_v39, 2 }
  0xb8   : > { %v4262_v37 = vpop.permute.xlu1 %448  ;;  %v4264_v38 = vpop.permute.xlu0 %429  ;;  %v1125_v26 = vrot.slane %v1119_v23, 1  ;;  %v1129_v17 = vsel %vm344_vm0, %v1126_v30, %v1128_v61  ;;  %v1206_v23 = vrot.slane %v1200_v11, 2  ;;  %v303_v61 = vstv %s4351_s17  ;;  %s4420_s17 = sld [smem:[#allocation2 + $0x83]] }
  0xb9   : > { %v1293_v11 = vstv %s3482_s29  ;;  %s4432_s29 = sld [smem:[#allocation2 + $0x10d]] }
  0xbb   : > { %980 = vrot.lane.b32.xlu2 %v977_v53, %s5884_s12  ;;  %v1146_v53 = vrot.slane %v1140_v42, 1 }
  0xbd   : > { %v4284_v3 = vpop.permute.xlu2 %579 }
  0xbe   : > { %1001 = vrot.lane.b32.xlu1 %v998_v44, %s5886_s11  ;;  %999 = vrot.lane.b32.xlu0 %v996_v46, %s5886_s11  ;;  %v1127_v46 = vsel %vm344_vm0, %v1125_v26, %v1126_v30 }
  0xc0   : > { %v4279_v63 = vpop.permute.xlu1 %470  ;;  %v4281_v0 = vpop.permute.xlu0 %468 }
  0xc3   : > { %1037 = vrot.lane.b32.xlu2 %v1034_v10, %s5884_s12  ;;  %v1199_v10 = vmul.f32 %v1198_v57, %v4142_v29 }
  0xc5   : > { %v4301_v20 = vpop.permute.xlu2 %602 }
  0xc6   : > { %1058 = vrot.lane.b32.xlu1 %v1055_v4, %s5886_s11  ;;  %1039 = vrot.lane.b32.xlu0 %v1036_v9, %s5884_s12  ;;  %v1148_v4 = vsel %vm344_vm0, %v1146_v53, %v1147_v51  ;;  %v1228_v51 = vmul.f32 %v1227_v41, %v4052_v1 }
  0xc8   : > { %v4294_v14 = vpop.permute.xlu1 %520  ;;  %v4296_v15 = vpop.permute.xlu0 %484 }
  0xcb   : > { %1060 = vrot.lane.b32.xlu2 %v1057_v25, %s5886_s11  ;;  %v1187_v25 = vrot.slane %v1180_v16, 2 }
  0xcd   : > { %v4318_v44 = vpop.permute.xlu2 %634  ;;  %v1188_v33 = vsel %vm404_vm1, %v1185_v24, %v1187_v25  ;;  %v1295_v25 = vmul.f32 %v1293_v11, %v4059_v5 }
  0xce   : > { %1080 = vrot.lane.b32.xlu1 %v1075_v18, %s5884_s12  ;;  %1078 = vrot.lane.b32.xlu0 %v1074_v19, %s5884_s12  ;;  %v1178_v18 = vmul.f32 %v1177_v58, %v4142_v29  ;;  %v1205_v19 = vrot.slane %v1199_v10, 2  ;;  %v1209_v58 = vsel %vm404_vm1, %v1206_v23, %v1208_v40  ;;  %v1241_v10 = vstv %s4357_s27  ;;  %s4429_s27 = sld [smem:[#allocation2 + $0x10a]] }
  0xcf   : > { %v1242_v39 = vmul.f32 %v1241_v10, %v4052_v1 }
  0xd0   : > { %v4309_v34 = vpop.permute.xlu1 %543  ;;  %v4311_v35 = vpop.permute.xlu0 %541  ;;  %v1184_v27 = vrot.slane %v1178_v18, 2  ;;  %v1207_v29 = vsel %vm404_vm1, %v1205_v19, %v1206_v23  ;;  %v304_v18 = vmul.f32 %v303_v61, %v4052_v1  ;;  %v337_v19 = vstv %s3424_s8  ;;  %s4450_s8 = sld [smem:[#allocation2 + $0xc]] }
  0xd1   : > { %v305_v23 = vmul.f32 %v303_v61, %v4059_v5  ;;  %v339_v40 = vmul.f32 %v337_v19, %v4059_v5 }
  0xd3   : > { %1092 = vrot.lane.b32.xlu2 %v1088_v49, %s5886_s11  ;;  %v1272_v49 = vstv %s3481_s16  ;;  %s4418_s16 = sld [smem:[#allocation5 + $0x1]] }
  0xd4   : > { %v1273_v53 = vmul.f32 %v1272_v49, %v4052_v1  ;;  %v1274_v57 = vmul.f32 %v1272_v49, %v4059_v5 }
  0xd5   : > { %v4332_v9 = vpop.permute.xlu2 %674 }
  0xd6   : > { %1130 = vrot.lane.b32.xlu1 %v1127_v46, %s5884_s12  ;;  %1094 = vrot.lane.b32.xlu0 %v1089_v36, %s5886_s11  ;;  %v1186_v36 = vsel %vm404_vm1, %v1184_v27, %v1185_v24  ;;  %v1243_v24 = vmul.f32 %v1241_v10, %v4059_v5  ;;  %v1296_v27 = vmul.f32 %v1293_v11, %v4062_v6 }
  0xd8   : > { %v4325_v54 = vpop.permute.xlu1 %600  ;;  %v4327_v55 = vpop.permute.xlu0 %581 }
  0xdb   : > { %1132 = vrot.lane.b32.xlu2 %v1129_v17, %s5884_s12  ;;  %v301_v17 = vstv %s4359_s7  ;;  %s4443_s7 = sld [smem:[#allocation2 + $0x9]] }
  0xdc   : > { %v306_v41 = vadd.f32 %v304_v18, %v301_v17  ;;  %v1352_v18 = vstv %s3485_s10  ;;  %s4454_s10 = sld [smem:[#allocation2 + $0x86]] }
  0xdd   : > { %v4347_v30 = vpop.permute.xlu2 %731 }
  0xde   : > { %1153 = vrot.lane.b32.xlu1 %v1150_v2, %s5886_s11  ;;  %1151 = vrot.lane.b32.xlu0 %v1148_v4, %s5886_s11  ;;  %5892 = vst [vmem:[#allocation15_spill] sm:$0xff] %v4347_v30  ;;  %v1279_v2 = vrot.slane %v1273_v53, 1  ;;  %v1280_v4 = vrot.slane %v1274_v57, 1  ;;  %v307_v53 = vadd.f32 %v305_v23, %v301_v17  ;;  %v1301_v57 = vrot.slane %v1295_v25, 1 }
  0xdf   : > { %v346_v30 = vrot.slane %v339_v40, 1  ;;  %v320_v23 = vadd.f32 %v4218_v60, %v306_v41 }
  0xe0   : > { %v4342_v26 = vpop.permute.xlu1 %622  ;;  %v4344_v31 = vpop.permute.xlu0 %620 }
  0xe3   : > { %1189 = vrot.lane.b32.xlu2 %v1186_v36, %s5884_s12  ;;  %v1281_v36 = vsel %vm344_vm0, %v1279_v2, %v1280_v4  ;;  %v340_v2 = vmul.f32 %v337_v19, %v4062_v6 }
  0xe5   : > { %v4368_v52 = vpop.permute.xlu2 %754  ;;  %v348_v60 = vrot.slane %v340_v2, 1 }
  0xe6   : > { %1210 = vrot.lane.b32.xlu1 %v1207_v29, %s5886_s11  ;;  %1191 = vrot.lane.b32.xlu0 %v1188_v33, %s5884_s12  ;;  %5893 = vst [vmem:[#allocation16_spill] sm:$0xff] %v4368_v52  ;;  %v1294_v29 = vmul.f32 %v1293_v11, %v4052_v1  ;;  %v1331_v52 = vstv %s3484_s13  ;;  %s4462_s13 = sld [smem:[#allocation2 + $0x10b]] }
  0xe7   : > { %v1334_v40 = vmul.f32 %v1331_v52, %v4062_v6 }
  0xe8   : > { %v4361_v42 = vpop.permute.xlu1 %672  ;;  %v4363_v46 = vpop.permute.xlu0 %636  ;;  %v1300_v61 = vrot.slane %v1294_v29, 1  ;;  %v1353_v29 = vmul.f32 %v1352_v18, %v4052_v1 }
  0xeb   : > { %1212 = vrot.lane.b32.xlu2 %v1209_v58, %s5886_s11  ;;  %v1303_v58 = vrot.slane %v1296_v27, 1  ;;  %v1302_v27 = vsel %vm344_vm0, %v1300_v61, %v1301_v57 }
  0xed   : > { %v4389_v33 = vpop.permute.xlu2 %788  ;;  %v1304_v25 = vsel %vm344_vm0, %v1301_v57, %v1303_v58  ;;  %v1359_v58 = vrot.slane %v1353_v29, 2 }
  0xee   : > { %1234 = vrot.lane.b32.xlu1 %v1229_v50, %s5884_s12  ;;  %1232 = vrot.lane.b32.xlu0 %v1228_v51, %s5884_s12  ;;  %v338_v50 = vmul.f32 %v337_v19, %v4052_v1  ;;  %v1275_v51 = vmul.f32 %v1272_v49, %v4062_v6 }
  0xf0   : > { %v4377_v12 = vpop.permute.xlu1 %695  ;;  %v4379_v16 = vpop.permute.xlu0 %693  ;;  %v345_v49 = vrot.slane %v338_v50, 1  ;;  %v1282_v17 = vrot.slane %v1275_v51, 1  ;;  %v1332_v50 = vmul.f32 %v1331_v52, %v4052_v1  ;;  %v334_v51 = vadd.f32 %v4216_v59, %v320_v23 }
  0xf1   : > { %5894 = vst [vmem:[#allocation17_spill] sm:$0xff] %v4377_v12  ;;  %v349_v59 = vsel %vm344_vm0, %v346_v30, %v348_v60 }
  0xf2   : > { %5895 = vst [vmem:[#allocation18_spill] sm:$0xff] %v4379_v16  ;;  %v1283_v41 = vsel %vm344_vm0, %v1280_v4, %v1282_v17  ;;  %v1341_v4 = vrot.slane %v1334_v40, 2  ;;  %v1338_v23 = vrot.slane %v1332_v50, 2 }
  0xf3   : > { %1246 = vrot.lane.b32.xlu2 %v1242_v39, %s5886_s11  ;;  %v1333_v39 = vmul.f32 %v1331_v52, %v4059_v5 }
  0xf5   : > { %v4410_v19 = vpop.permute.xlu2 %828  ;;  %v1339_v2 = vrot.slane %v1333_v39, 2 }
  0xf6   : > { %1284 = vrot.lane.b32.xlu1 %v1281_v36, %s5884_s12  ;;  %1248 = vrot.lane.b32.xlu0 %v1243_v24, %s5886_s11  ;;  %v321_v24 = vadd.f32 %v4233_v8, %v307_v53  ;;  %v4414_v36 = vmul.f32 %v1352_v18, %v4059_v5  ;;  %v397_v8 = vstv %s3427_s14  ;;  %v347_v53 = vsel %vm344_vm0, %v345_v49, %v346_v30  ;;  %s4470_s14 = sld [smem:[#allocation2 + $0x10e]] }
  0xf7   : > { %v398_v52 = vmul.f32 %v397_v8, %v4052_v1  ;;  %v1342_v39 = vsel %vm404_vm1, %v1339_v2, %v1341_v4  ;;  %v761_v4 = vstv %s4418_s16  ;;  %s4516_s16 = sld [smem:[#allocation2 + $0x110]] }
  0xf8   : > { %v4399_v11 = vpop.permute.xlu1 %752  ;;  %v4401_v10 = vpop.permute.xlu0 %733  ;;  %v335_v57 = vadd.f32 %v4231_v7, %v321_v24  ;;  %v5882_v61 = vrot.slane %v4414_v36, 2  ;;  %v399_v7 = vmul.f32 %v397_v8, %v4059_v5  ;;  %v352_v24 = vadd.f32 %v347_v53, %v334_v51 }
  0xf9   : > { %5896 = vst [vmem:[#allocation19_spill] sm:$0xff] %v4399_v11  ;;  %v405_v40 = vrot.slane %v398_v52, 2  ;;  %v797_v51 = vstv %s4420_s17  ;;  %v1340_v53 = vsel %vm404_vm1, %v1338_v23, %v1339_v2  ;;  %v4468_v52 = vstv %s4432_s29  ;;  %v4474_v2 = vld [vmem:[%s4049_s9] sm:$0xff]  ;;  %s4550_s17 = sld [smem:[#allocation2 + $0xf]] }
  0xfa   : > { %5897 = vst [vmem:[#allocation20_spill] sm:$0xff] %v4401_v10  ;;  %v353_v29 = vadd.f32 %v349_v59, %v335_v57  ;;  %v1361_v30 = vsel %vm404_vm1, %v1359_v58, %v5882_v61  ;;  %v406_v60 = vrot.slane %v399_v7, 2  ;;  %v1355_v57 = vmul.f32 %v1352_v18, %v4062_v6  ;;  %s4570_s29 = sld [smem:[#allocation2 + $0x8c]] }
  0xfb   : > { %1286 = vrot.lane.b32.xlu2 %v1283_v41, %s5884_s12  ;;  %v400_v41 = vmul.f32 %v397_v8, %v4062_v6  ;;  %v373_v58 = vadd.f32 %v4196_v32, %v352_v24  ;;  %v1379_v59 = vstv %s4429_s27  ;;  %v798_v32 = vmul.f32 %v4474_v2, %v797_v51  ;;  %s4564_s27 = sld [smem:[#allocation2 + $0x89]] }
  0xfc   : > { %v374_v8 = vadd.f32 %v4206_v47, %v353_v29  ;;  %v799_v7 = vmul.f32 %v797_v51, %v4059_v5  ;;  %v800_v47 = vmul.f32 %v797_v51, %v4062_v6  ;;  %v457_v51 = vstv %s4443_s7  ;;  %s4600_s7 = sld [smem:[#allocation2 + $0x113]] }
  0xfd   : > { %v394_v18 = vadd.f32 %v4248_v22, %v373_v58  ;;  %v408_v29 = vrot.slane %v400_v41, 2  ;;  %v1381_v22 = vmul.f32 %v1379_v59, %v4094_v43  ;;  %v1380_v58 = vmul.f32 %v1379_v59, %v4097_v45 }
  0xfe   : > { %1307 = vrot.lane.b32.xlu1 %v1304_v25, %s5886_s11  ;;  %1305 = vrot.lane.b32.xlu0 %v1302_v27, %s5886_s11  ;;  %v763_v25 = vstv %s4408_s15  ;;  %v4441_v27 = vpop.permute.xlu2 %885  ;;  %v395_v6 = vadd.f32 %v4246_v21, %v374_v8  ;;  %v807_v59 = vrot.slane %v800_v47, 1  ;;  %v5898_v12 = vrot.slane %v4414_v36, 2  ;;  %s4510_s15 = sld [smem:[#allocation2 + $0x111]] }
  0xff   : > { %v764_v50 = vmul.f32 %v763_v25, %v4052_v1  ;;  %v765_v1 = vmul.f32 %v763_v25, %v4059_v5  ;;  %v407_v25 = vsel %vm404_vm1, %v405_v40, %v406_v60  ;;  %v1425_v5 = vmul.f32 %v4468_v52, %v4097_v45 }
 0x100   : > { %v4437_v49 = vpop.permute.xlu1 %776  ;;  %v775_v17 = vpop.permute.xlu0 %774  ;;  %v4493_v40 = vmul.f32 %v4468_v52, %v4094_v43  ;;  %v412_v41 = vadd.f32 %v407_v25, %v394_v18  ;;  %v409_v11 = vsel %vm404_vm1, %v406_v60, %v408_v29  ;;  %v4500_v21 = vmul.f32 %v457_v51, %v4097_v45 }
 0x101   : > { %v856_v8 = vstv %s4454_s10  ;;  %v413_v36 = vadd.f32 %v409_v11, %v395_v6  ;;  %s4611_s10 = sld [smem:[#allocation2 + $0x8f]] }
 0x102   : > { %v1432_v60 = vrot.slane %v4493_v40, 1 }
 0x103   : > { %1343 = vrot.lane.b32.xlu2 %v1340_v53, %s5884_s12  ;;  %v767_v53 = vadd.f32 %v765_v1, %v761_v4  ;;  %v1431_v1 = vrot.slane %v1425_v5, 1 }
 0x105   : > { %v781_v18 = vadd.f32 %v4437_v49, %v767_v53  ;;  %v1433_v53 = vsel %vm344_vm0, %v1431_v1, %v1432_v60  ;;  %v1427_v1 = vmul.f32 %v4468_v52, %v4108_v56  ;;  %v4561_v52 = vld [vmem:[%s4049_s9 + $0x28] sm:$0x3] }
 0x106   : > { %1364 = vrot.lane.b32.xlu1 %v1361_v30, %s5886_s11  ;;  %1345 = vrot.lane.b32.xlu0 %v1342_v39, %s5884_s12  ;;  %v766_v30 = vadd.f32 %v764_v50, %v761_v4  ;;  %v1362_v39 = vrot.slane %v1355_v57, 2  ;;  %v4487_v61 = vpop.permute.xlu2 %908  ;;  %v804_v50 = vrot.slane %v798_v32, 1  ;;  %v805_v57 = vrot.slane %v799_v7, 1 }
 0x107   : > { %v491_v4 = vstv %s4450_s8  ;;  %v1445_v32 = vstv %s4470_s14  ;;  %s4607_s8 = sld [smem:[#allocation2 + $0x116]] }
 0x108   : > { %v4478_v23 = vpop.permute.xlu1 %826  ;;  %v791_v24 = vpop.permute.xlu0 %790  ;;  %v780_v10 = vadd.f32 %v775_v17, %v766_v30  ;;  %v1363_v16 = vsel %vm404_vm1, %v5898_v12, %v1362_v39  ;;  %v1393_v17 = vstv %s4462_s13  ;;  %v433_v12 = vadd.f32 %v4221_v62, %v412_v41  ;;  %s4623_s13 = sld [smem:[#allocation2 + $0x12]] }
 0x109   : > { %v806_v7 = vsel %vm344_vm0, %v804_v50, %v805_v57  ;;  %v808_v47 = vsel %vm344_vm0, %v805_v57, %v807_v59  ;;  %v795_v30 = vadd.f32 %v791_v24, %v781_v18  ;;  %v857_v39 = vmul.f32 %v4474_v2, %v856_v8  ;;  %v4541_v57 = vld [vmem:[%s4049_s9 + $0x10] sm:$0x3]  ;;  %v4545_v18 = vld [vmem:[%s4049_s9 + $0x18] sm:$0xff]  ;;  %s4636_s14 = sld [smem:[#allocation2 + $0x114]] }
 0x10a   : > { %v794_v49 = vadd.f32 %v4389_v33, %v780_v10  ;;  %v1395_v11 = vmul.f32 %v1393_v17, %v4094_v43  ;;  %v1448_v5 = vmul.f32 %v1445_v32, %v4108_v56  ;;  %v459_v33 = vmul.f32 %v457_v51, %v4094_v43 }
 0x10b   : > { %1366 = vrot.lane.b32.xlu2 %v1363_v16, %s5886_s11  ;;  %v1446_v16 = vmul.f32 %v1445_v32, %v4097_v45  ;;  %v492_v10 = vmul.f32 %v491_v4, %v4097_v45  ;;  %v4533_v24 = vmul.f32 %v491_v4, %v4094_v43  ;;  %v454_v41 = vadd.f32 %v4262_v37, %v433_v12 }
 0x10c   : > { %v434_v50 = vadd.f32 %v4264_v38, %v413_v36  ;;  %v859_v59 = vmul.f32 %v4541_v57, %v856_v8  ;;  %v1394_v45 = vmul.f32 %v4545_v18, %v1393_v17  ;;  %v811_v51 = vadd.f32 %v806_v7, %v794_v49 }
 0x10d   : > { %v1452_v12 = vrot.slane %v1446_v16, 1  ;;  %v498_v36 = vrot.slane %v492_v10, 1  ;;  %v499_v17 = vrot.slane %v4533_v24, 1  ;;  %v494_v49 = vmul.f32 %v4561_v52, %v491_v4 }
 0x10e   : > { %1386 = vrot.lane.b32.xlu1 %v1381_v22, %s5884_s12  ;;  %1384 = vrot.lane.b32.xlu0 %v1380_v58, %s5884_s12  ;;  %v4521_v22 = vld [vmem:[%s4049_s9 + $0x8] sm:$0xff]  ;;  %v1447_v58 = vmul.f32 %v1445_v32, %v4094_v43  ;;  %v4528_v6 = vpop.permute.xlu2 %940  ;;  %v812_v43 = vadd.f32 %v808_v47, %v795_v30  ;;  %v863_v32 = vrot.slane %v857_v39, 2  ;;  %v832_v7 = vadd.f32 %v4478_v23, %v811_v51 }
 0x10f   : > { %v858_v62 = vmul.f32 %v4521_v22, %v856_v8  ;;  %v1455_v8 = vrot.slane %v1448_v5, 1  ;;  %v4557_v47 = vstv %s4510_s15  ;;  %v455_v56 = vadd.f32 %v4238_v13, %v434_v50  ;;  %s4639_s15 = sld [smem:[#allocation2 + $0x117]] }
 0x110   : > { %v850_v25 = vpop.permute.xlu1 %849  ;;  %v848_v29 = vpop.permute.xlu0 %847  ;;  %v1453_v38 = vrot.slane %v1447_v58, 1  ;;  %v866_v39 = vrot.slane %v859_v59, 2  ;;  %v460_v58 = vadd.f32 %v4500_v21, %v454_v41  ;;  %v833_v23 = vadd.f32 %v4410_v19, %v812_v43  ;;  %v4580_v21 = vld [vmem:[%s4049_s9 + $0x20] sm:$0xff] }
 0x111   : > { %v864_v37 = vrot.slane %v858_v62, 2  ;;  %v853_v5 = vadd.f32 %v848_v29, %v832_v7  ;;  %v1434_v13 = vrot.slane %v1427_v1, 1  ;;  %v1505_v24 = vmul.f32 %v4545_v18, %v4557_v47 }
 0x112   : > { %v1456_v4 = vsel %vm344_vm0, %v1453_v38, %v1455_v8  ;;  %v1454_v10 = vsel %vm344_vm0, %v1452_v12, %v1453_v38  ;;  %v854_v50 = vadd.f32 %v850_v25, %v833_v23  ;;  %v4584_v19 = vmul.f32 %v4580_v21, %v4557_v47 }
 0x113   : > { %1398 = vrot.lane.b32.xlu2 %v1394_v45, %s5886_s11  ;;  %v865_v16 = vsel %vm404_vm1, %v863_v32, %v864_v37  ;;  %v461_v59 = vadd.f32 %v459_v33, %v455_v56  ;;  %v474_v45 = vadd.f32 %v4281_v0, %v460_v58  ;;  %v501_v51 = vrot.slane %v494_v49, 1 }
 0x114   : > { %v867_v43 = vsel %vm404_vm1, %v864_v37, %v866_v39  ;;  %v870_v32 = vadd.f32 %v865_v16, %v853_v5  ;;  %v1435_v25 = vsel %vm344_vm0, %v1432_v60, %v1434_v13  ;;  %v500_v8 = vsel %vm344_vm0, %v498_v36, %v499_v17 }
 0x115   : > { %v475_v38 = vadd.f32 %v4279_v63, %v461_v59  ;;  %v550_v12 = vstv %s4550_s17  ;;  %v1511_v0 = vrot.slane %v1505_v24, 2  ;;  %v871_v33 = vadd.f32 %v867_v43, %v854_v50  ;;  %s4683_s17 = sld [smem:[#allocation2 + $0x11a]] }
 0x116   : > { %1436 = vrot.lane.b32.xlu1 %v1433_v53, %s5884_s12  ;;  %1400 = vrot.lane.b32.xlu0 %v1395_v11, %s5886_s11  ;;  %v1483_v11 = vstv %s4516_s16  ;;  %v4577_v53 = vpop.permute.xlu2 %980  ;;  %v1512_v37 = vrot.slane %v4584_v19, 2  ;;  %v488_v60 = vadd.f32 %v4255_v28, %v474_v45  ;;  %v502_v36 = vsel %vm344_vm0, %v499_v17, %v501_v51  ;;  %s4643_s16 = sld [smem:[#allocation2 + $0x15]] }
 0x117   : > { %v1485_v29 = vmul.f32 %v4580_v21, %v1483_v11  ;;  %v1486_v41 = vmul.f32 %v4561_v52, %v1483_v11  ;;  %v1484_v1 = vmul.f32 %v4545_v18, %v1483_v11  ;;  %v489_v63 = vadd.f32 %v4296_v15, %v475_v38 }
 0x118   : > { %v907_v30 = vpop.permute.xlu1 %906  ;;  %v888_v62 = vpop.permute.xlu0 %887  ;;  %v915_v56 = vstv %s4564_s27  ;;  %v891_v11 = vadd.f32 %v4441_v27, %v870_v32  ;;  %v949_v23 = vstv %s4570_s29  ;;  %v551_v28 = vmul.f32 %v4545_v18, %v550_v12  ;;  %s4689_s27 = sld [smem:[#allocation2 + $0x119]] }
 0x119   : > { %v1491_v40 = vrot.slane %v1485_v29, 2  ;;  %v1493_v7 = vrot.slane %v1486_v41, 2  ;;  %v892_v58 = vadd.f32 %v888_v62, %v871_v33  ;;  %v1490_v5 = vrot.slane %v1484_v1, 2  ;;  %s4698_s29 = sld [smem:[#allocation2 + $0x92]] }
 0x11a   : > { %v552_v15 = vmul.f32 %v4580_v21, %v550_v12  ;;  %v553_v17 = vmul.f32 %v4561_v52, %v550_v12  ;;  %v912_v16 = vadd.f32 %v907_v30, %v891_v11  ;;  %v1513_v27 = vsel %vm404_vm1, %v1511_v0, %v1512_v37  ;;  %v4655_v11 = vld [vmem:[%s4049_s9 + $0x30] sm:$0xff] }
 0x11b   : > { %1438 = vrot.lane.b32.xlu2 %v1435_v25, %s5884_s12  ;;  %v1494_v62 = vsel %vm404_vm1, %v1491_v40, %v1493_v7  ;;  %v506_v24 = vadd.f32 %v502_v36, %v489_v63  ;;  %v950_v50 = vmul.f32 %v4545_v18, %v949_v23  ;;  %v913_v29 = vadd.f32 %v4487_v61, %v892_v58 }
 0x11c   : > { %v917_v41 = vmul.f32 %v4580_v21, %v915_v56  ;;  %v1492_v30 = vsel %vm404_vm1, %v1490_v5, %v1491_v40  ;;  %v1507_v59 = vmul.f32 %v4561_v52, %v4557_v47  ;;  %v557_v51 = vrot.slane %v551_v28, 2 }
 0x11d   : > { %v951_v43 = vmul.f32 %v4580_v21, %v949_v23  ;;  %v952_v32 = vmul.f32 %v4561_v52, %v949_v23  ;;  %v558_v61 = vrot.slane %v552_v15, 2  ;;  %v560_v25 = vrot.slane %v553_v17, 2 }
 0x11e   : > { %1459 = vrot.lane.b32.xlu1 %v1456_v4, %s5886_s11  ;;  %1457 = vrot.lane.b32.xlu0 %v1454_v10, %s5886_s11  ;;  %v4616_v13 = vpop.permute.xlu2 %1037  ;;  %v916_v4 = vmul.f32 %v4545_v18, %v915_v56  ;;  %v505_v10 = vadd.f32 %v500_v8, %v488_v60  ;;  %v1531_v38 = vstv %s4600_s7  ;;  %v956_v8 = vrot.slane %v950_v50, 1  ;;  %s4713_s7 = sld [smem:[#allocation2 + $0x18]] }
 0x11f   : > { %v4646_v33 = vstv %s4607_s8  ;;  %v919_v40 = vadd.f32 %v917_v41, %v913_v29  ;;  %v1008_v60 = vstv %s4611_s10  ;;  %v1514_v63 = vrot.slane %v1507_v59, 2  ;;  %s4723_s8 = sld [smem:[#allocation2 + $0x95]] }
 0x120   : > { %v929_v49 = vpop.permute.xlu1 %928  ;;  %v927_v39 = vpop.permute.xlu0 %926  ;;  %v526_v45 = vadd.f32 %v4294_v14, %v505_v10  ;;  %v918_v1 = vadd.f32 %v916_v4, %v912_v16  ;;  %v527_v14 = vadd.f32 %v4269_v48, %v506_v24  ;;  %v957_v36 = vrot.slane %v951_v43, 1  ;;  %v4651_v48 = vld [vmem:[%s4049_s9 + $0x38] sm:$0xff]  ;;  %s4751_s10 = sld [smem:[#allocation2 + $0x98]] }
 0x121   : > { %v959_v56 = vrot.slane %v952_v32, 1  ;;  %v1532_v58 = vmul.f32 %v4655_v11, %v1531_v38  ;;  %v559_v5 = vsel %vm404_vm1, %v557_v51, %v558_v61  ;;  %v933_v28 = vadd.f32 %v929_v49, %v919_v40 }
 0x122   : > { %v547_v47 = vadd.f32 %v4311_v35, %v526_v45  ;;  %v932_v7 = vadd.f32 %v927_v39, %v918_v1  ;;  %v1533_v35 = vmul.f32 %v4651_v48, %v1531_v38  ;;  %v1577_v39 = vmul.f32 %v4655_v11, %v4646_v33 }
 0x123   : > { %1495 = vrot.lane.b32.xlu2 %v1492_v30, %s5884_s12  ;;  %v4665_v15 = vmul.f32 %v4651_v48, %v4646_v33  ;;  %v548_v17 = vadd.f32 %v4309_v34, %v527_v14  ;;  %v561_v16 = vsel %vm404_vm1, %v558_v61, %v560_v25  ;;  %v609_v4 = vstv %s4623_s13  ;;  %s4764_s13 = sld [smem:[#allocation2 + $0x181]] }
 0x124   : > { %v1010_v10 = vmul.f32 %v4580_v21, %v1008_v60  ;;  %v1515_v24 = vsel %vm404_vm1, %v1512_v37, %v1514_v63  ;;  %v564_v50 = vadd.f32 %v559_v5, %v547_v47  ;;  %v958_v29 = vsel %vm344_vm0, %v956_v8, %v957_v36  ;;  %v4694_v8 = vld [vmem:[%s4049_s9 + $0x40] sm:$0x3] }
 0x125   : > { %v960_v34 = vsel %vm344_vm0, %v957_v36, %v959_v56  ;;  %v1583_v41 = vrot.slane %v1577_v39, 1  ;;  %v1545_v30 = vstv %s4636_s14  ;;  %v1597_v59 = vstv %s4639_s15  ;;  %s4771_s14 = sld [smem:[#allocation2 + $0x184]] }
 0x126   : > { %1516 = vrot.lane.b32.xlu1 %v1513_v27, %s5886_s11  ;;  %1497 = vrot.lane.b32.xlu0 %v1494_v62, %s5884_s12  ;;  %v4658_v23 = vpop.permute.xlu2 %1060  ;;  %v1009_v27 = vmul.f32 %v4545_v18, %v1008_v60  ;;  %v946_v62 = vadd.f32 %v4528_v6, %v932_v7  ;;  %v1584_v6 = vrot.slane %v4665_v15, 1  ;;  %v565_v19 = vadd.f32 %v561_v16, %v548_v17  ;;  %s4793_s15 = sld [smem:[#allocation2 + $0x185]] }
 0x127   : > { %v610_v37 = vmul.f32 %v4655_v11, %v609_v4  ;;  %v643_v45 = vstv %s4643_s16  ;;  %v1011_v32 = vmul.f32 %v4561_v52, %v1008_v60  ;;  %v1016_v38 = vrot.slane %v1010_v10, 2  ;;  %s4797_s16 = sld [smem:[#allocation2 + $0x182]] }
 0x128   : > { %v979_v12 = vpop.permute.xlu1 %978  ;;  %v943_v0 = vpop.permute.xlu0 %942  ;;  %v963_v61 = vadd.f32 %v958_v29, %v946_v62  ;;  %v1015_v1 = vrot.slane %v1009_v27, 2  ;;  %v1547_v14 = vmul.f32 %v4651_v48, %v1545_v30  ;;  %v1599_v47 = vmul.f32 %v4651_v48, %v1597_v59 }
 0x129   : > { %v947_v49 = vadd.f32 %v943_v0, %v933_v28  ;;  %v1600_v0 = vmul.f32 %v4694_v8, %v1597_v59  ;;  %v1598_v40 = vmul.f32 %v4655_v11, %v1597_v59  ;;  %v585_v60 = vadd.f32 %v4284_v3, %v564_v50 }
 0x12a   : > { %v4704_v63 = vmul.f32 %v4655_v11, %v643_v45  ;;  %v984_v36 = vadd.f32 %v979_v12, %v963_v61  ;;  %v1585_v56 = vsel %vm344_vm0, %v1583_v41, %v1584_v6  ;;  %v1018_v5 = vrot.slane %v1011_v32, 2 }
 0x12b   : > { %1518 = vrot.lane.b32.xlu2 %v1515_v24, %s5886_s11  ;;  %v964_v25 = vadd.f32 %v960_v34, %v947_v49  ;;  %v1546_v28 = vmul.f32 %v4655_v11, %v1545_v30  ;;  %v606_v3 = vadd.f32 %v4325_v54, %v585_v60  ;;  %v1579_v17 = vmul.f32 %v4694_v8, %v4646_v33 }
 0x12c   : > { %v1017_v16 = vsel %vm404_vm1, %v1015_v1, %v1016_v38  ;;  %v1607_v27 = vrot.slane %v1600_v0, 1  ;;  %v1604_v62 = vrot.slane %v1598_v40, 1  ;;  %v611_v54 = vmul.f32 %v4651_v48, %v609_v4 }
 0x12d   : > { %v985_v39 = vadd.f32 %v4577_v53, %v964_v25  ;;  %v650_v53 = vrot.slane %v4704_v63, 1  ;;  %v4728_v10 = vstv %s4683_s17  ;;  %v646_v24 = vmul.f32 %v4694_v8, %v643_v45  ;;  %s4819_s17 = sld [smem:[#allocation2 + $0x100]] }
 0x12e   : > { %1538 = vrot.lane.b32.xlu1 %v1533_v35, %s5884_s12  ;;  %1536 = vrot.lane.b32.xlu0 %v1532_v58, %s5884_s12  ;;  %v4700_v7 = vpop.permute.xlu2 %1092  ;;  %v586_v35 = vadd.f32 %v4327_v55, %v565_v19  ;;  %v4711_v58 = vmul.f32 %v4651_v48, %v643_v45  ;;  %v1605_v55 = vrot.slane %v1599_v47, 1  ;;  %v1019_v29 = vsel %vm404_vm1, %v1016_v38, %v1018_v5 }
 0x12f   : > { %v1635_v41 = vstv %s4689_s27  ;;  %v612_v30 = vadd.f32 %v610_v37, %v606_v3  ;;  %v1586_v19 = vrot.slane %v1579_v17, 1  ;;  %v1657_v45 = vmul.f32 %v4655_v11, %v4728_v10  ;;  %s4825_s27 = sld [smem:[#allocation2 + $0x188]] }
 0x130   : > { %v1002_v51 = vpop.permute.xlu1 %1001  ;;  %v1000_v43 = vpop.permute.xlu0 %999  ;;  %v607_v33 = vadd.f32 %v4301_v20, %v586_v35  ;;  %v651_v4 = vrot.slane %v4711_v58, 1  ;;  %v1067_v20 = vstv %s4698_s29  ;;  %v4745_v25 = vmul.f32 %v4651_v48, %v4728_v10  ;;  %s4832_s29 = sld [smem:[#allocation2 + $0x187]] }
 0x131   : > { %v1005_v12 = vadd.f32 %v1000_v43, %v984_v36  ;;  %v1006_v49 = vadd.f32 %v1002_v51, %v985_v39  ;;  %v1608_v51 = vsel %vm344_vm0, %v1605_v55, %v1607_v27  ;;  %v1606_v43 = vsel %vm344_vm0, %v1604_v62, %v1605_v55 }
 0x132   : > { %v1637_v37 = vmul.f32 %v4651_v48, %v1635_v41  ;;  %v1638_v1 = vmul.f32 %v4694_v8, %v1635_v41  ;;  %v613_v38 = vadd.f32 %v611_v54, %v607_v33  ;;  %v653_v47 = vrot.slane %v646_v24, 1 }
 0x133   : > { %1550 = vrot.lane.b32.xlu2 %v1546_v28, %s5886_s11  ;;  %v1022_v59 = vadd.f32 %v1017_v16, %v1005_v12  ;;  %v1023_v61 = vadd.f32 %v1019_v29, %v1006_v49  ;;  %v702_v0 = vstv %s4713_s7  ;;  %v1587_v63 = vsel %vm344_vm0, %v1584_v6, %v1586_v19  ;;  %s4836_s7 = sld [smem:[#allocation5 + $0x2]] }
 0x134   : > { %v1636_v36 = vmul.f32 %v4655_v11, %v1635_v41  ;;  %v1663_v35 = vrot.slane %v1657_v45, 2  ;;  %v1101_v58 = vstv %s4723_s8  ;;  %v1643_v28 = vrot.slane %v1637_v37, 2  ;;  %s4841_s8 = sld [smem:[#allocation2 + $0x103]] }
 0x135   : > { %v1043_v40 = vadd.f32 %v4616_v13, %v1022_v59  ;;  %v1664_v13 = vrot.slane %v4745_v25, 2  ;;  %v1645_v3 = vrot.slane %v1638_v1, 2  ;;  %v652_v6 = vsel %vm344_vm0, %v650_v53, %v651_v4 }
 0x136   : > { %1588 = vrot.lane.b32.xlu1 %v1585_v56, %s5884_s12  ;;  %1552 = vrot.lane.b32.xlu0 %v1547_v14, %s5886_s11  ;;  %v4741_v32 = vpop.permute.xlu2 %1132  ;;  %v626_v14 = vadd.f32 %v4344_v31, %v612_v30  ;;  %v627_v56 = vadd.f32 %v4342_v26, %v613_v38  ;;  %v1068_v31 = vmul.f32 %v4655_v11, %v1067_v20  ;;  %v1160_v30 = vstv %s4751_s10  ;;  %s4884_s10 = sld [smem:[#allocation2 + $0x106]] }
 0x137   : > { %v703_v39 = vmul.f32 %v4655_v11, %v702_v0  ;;  %v654_v16 = vsel %vm344_vm0, %v651_v4, %v653_v47  ;;  %v1069_v27 = vmul.f32 %v4651_v48, %v1067_v20  ;;  %v704_v62 = vmul.f32 %v4651_v48, %v702_v0 }
 0x138   : > { %v1059_v50 = vpop.permute.xlu1 %1058  ;;  %v1040_v34 = vpop.permute.xlu0 %1039  ;;  %v640_v15 = vadd.f32 %v4318_v44, %v626_v14  ;;  %v641_v26 = vadd.f32 %v4363_v46, %v627_v56  ;;  %v1642_v44 = vrot.slane %v1636_v36, 2  ;;  %v1102_v46 = vmul.f32 %v4655_v11, %v1101_v58  ;;  %v5899_v36 = vld [vmem:[#allocation18_spill] sm:$0xff] }
 0x139   : > { %v1044_v60 = vadd.f32 %v1040_v34, %v1023_v61  ;;  %v1064_v5 = vadd.f32 %v1059_v50, %v1043_v40  ;;  %v1103_v54 = vmul.f32 %v4651_v48, %v1101_v58  ;;  %v1104_v53 = vmul.f32 %v4694_v8, %v1101_v58 }
 0x13a   : > { %v705_v33 = vmul.f32 %v4694_v8, %v702_v0  ;;  %v1646_v50 = vsel %vm404_vm1, %v1643_v28, %v1645_v3  ;;  %v657_v29 = vadd.f32 %v652_v6, %v640_v15  ;;  %v658_v34 = vadd.f32 %v654_v16, %v641_v26 }
 0x13b   : > { %1590 = vrot.lane.b32.xlu2 %v1587_v63, %s5884_s12  ;;  %v1065_v55 = vadd.f32 %v4658_v23, %v1044_v60  ;;  %v1070_v24 = vadd.f32 %v1068_v31, %v1064_v5  ;;  %v1665_v23 = vsel %vm404_vm1, %v1663_v35, %v1664_v13  ;;  %v709_v41 = vrot.slane %v703_v39, 2 }
 0x13c   : > { %v1644_v19 = vsel %vm404_vm1, %v1642_v44, %v1643_v28  ;;  %v1108_v20 = vrot.slane %v1102_v46, 1  ;;  %v1109_v45 = vrot.slane %v1103_v54, 1  ;;  %v1111_v61 = vrot.slane %v1104_v53, 1 }
 0x13d   : > { %v1071_v4 = vadd.f32 %v1069_v27, %v1065_v55  ;;  %v678_v37 = vadd.f32 %v4361_v42, %v657_v29  ;;  %v712_v1 = vrot.slane %v705_v33, 2  ;;  %v1685_v14 = vstv %s4764_s13  ;;  %s4886_s13 = sld [smem:[#allocation2 + $0x18d]] }
 0x13e   : > { %1611 = vrot.lane.b32.xlu1 %v1608_v51, %s5886_s11  ;;  %1609 = vrot.lane.b32.xlu0 %v1606_v43, %s5886_s11  ;;  %v4780_v49 = vpop.permute.xlu2 %1189  ;;  %v1659_v51 = vmul.f32 %v4694_v8, %v4728_v10  ;;  %v710_v43 = vrot.slane %v704_v62, 2  ;;  %v679_v10 = vadd.f32 %v4332_v9, %v658_v34  ;;  %v1161_v40 = vmul.f32 %v4655_v11, %v1160_v30 }
 0x13f   : > { %v1162_v60 = vmul.f32 %v4651_v48, %v1160_v30  ;;  %v1730_v63 = vstv %s4771_s14  ;;  %v699_v56 = vadd.f32 %v5899_v36, %v678_v37  ;;  %v1110_v58 = vsel %vm344_vm0, %v1108_v20, %v1109_v45  ;;  %s4893_s14 = sld [smem:[#allocation2 + $0x18a]] }
 0x140   : > { %v1081_v12 = vpop.permute.xlu1 %1080  ;;  %v1079_v17 = vpop.permute.xlu0 %1078  ;;  %v1666_v35 = vrot.slane %v1659_v51, 2  ;;  %v1112_v5 = vsel %vm344_vm0, %v1109_v45, %v1111_v61  ;;  %v1687_v9 = vmul.f32 %v4521_v22, %v1685_v14  ;;  %v1686_v28 = vmul.f32 %v4474_v2, %v1685_v14  ;;  %v5902_v61 = vld [vmem:[#allocation20_spill] sm:$0xff] }
 0x141   : > { %v1084_v59 = vadd.f32 %v1079_v17, %v1070_v24  ;;  %v1085_v38 = vadd.f32 %v1081_v12, %v1071_v4  ;;  %v711_v15 = vsel %vm404_vm1, %v709_v41, %v710_v43  ;;  %v1731_v6 = vmul.f32 %v4474_v2, %v1730_v63 }
 0x142   : > { %v4815_v26 = vmul.f32 %v4521_v22, %v1730_v63  ;;  %v1167_v12 = vrot.slane %v1161_v40, 2  ;;  %v1168_v17 = vrot.slane %v1162_v60, 2  ;;  %v1163_v16 = vmul.f32 %v4694_v8, %v1160_v30 }
 0x143   : > { %1647 = vrot.lane.b32.xlu2 %v1644_v19, %s5884_s12  ;;  %v1098_v42 = vadd.f32 %v4700_v7, %v1084_v59  ;;  %v5900_v7 = vld [vmem:[#allocation17_spill] sm:$0xff]  ;;  %v713_v55 = vsel %vm404_vm1, %v710_v43, %v712_v1  ;;  %v1667_v62 = vsel %vm404_vm1, %v1664_v13, %v1666_v35  ;;  %v716_v46 = vadd.f32 %v711_v15, %v699_v56  ;;  %v5901_v19 = vld [vmem:[#allocation15_spill] sm:$0xff] }
 0x144   : > { %v700_v39 = vadd.f32 %v5900_v7, %v679_v10  ;;  %v1751_v54 = vstv %s4793_s15  ;;  %v1737_v33 = vrot.slane %v1731_v6, 1  ;;  %v1738_v24 = vrot.slane %v4815_v26, 1  ;;  %v5903_v56 = vld [vmem:[#allocation19_spill] sm:$0xff]  ;;  %s4895_s15 = sld [smem:[#allocation2 + $0x18e]] }
 0x145   : > { %v1115_v27 = vadd.f32 %v1110_v58, %v1098_v42  ;;  %v1169_v13 = vsel %vm404_vm1, %v1167_v12, %v1168_v17  ;;  %v1170_v34 = vrot.slane %v1163_v16, 2  ;;  %v1753_v4 = vmul.f32 %v4521_v22, %v1751_v54 }
 0x146   : > { %1668 = vrot.lane.b32.xlu1 %v1665_v23, %s5886_s11  ;;  %1649 = vrot.lane.b32.xlu0 %v1646_v50, %s5884_s12  ;;  %v4810_v3 = vpop.permute.xlu2 %1212  ;;  %v1699_v23 = vstv %s4797_s16  ;;  %v717_v50 = vadd.f32 %v713_v55, %v700_v39  ;;  %v1754_v59 = vmul.f32 %v4541_v57, %v1751_v54  ;;  %v737_v51 = vadd.f32 %v5901_v19, %v716_v46  ;;  %s4910_s16 = sld [smem:[#allocation2 + $0x18b]] }
 0x147   : > { %v1701_v43 = vmul.f32 %v4521_v22, %v1699_v23  ;;  %v1752_v20 = vmul.f32 %v4474_v2, %v1751_v54  ;;  %v1171_v14 = vsel %vm404_vm1, %v1168_v17, %v1170_v34  ;;  %v1221_v10 = vstv %s4819_s17  ;;  %s4919_s17 = sld [smem:[#allocation2 + $0x109]] }
 0x148   : > { %v1131_v47 = vpop.permute.xlu1 %1130  ;;  %v1095_v0 = vpop.permute.xlu0 %1094  ;;  %v738_v37 = vadd.f32 %v5902_v61, %v717_v50  ;;  %v1759_v40 = vrot.slane %v1753_v4, 1  ;;  %v1761_v60 = vrot.slane %v1754_v59, 1  ;;  %v4855_v36 = vstv %s4825_s27  ;;  %s4936_s27 = sld [smem:[#allocation2 + $0x191]] }
 0x149   : > { %v1099_v31 = vadd.f32 %v1095_v0, %v1085_v38  ;;  %v1136_v53 = vadd.f32 %v1131_v47, %v1115_v27  ;;  %v1739_v38 = vsel %vm344_vm0, %v1737_v33, %v1738_v24  ;;  %v1700_v47 = vmul.f32 %v4474_v2, %v1699_v23 }
 0x14a   : > { %v1733_v0 = vmul.f32 %v4541_v57, %v1730_v63  ;;  %v758_v42 = vadd.f32 %v5903_v56, %v737_v51  ;;  %v1219_v26 = vstv %s4836_s7  ;;  %v1811_v7 = vmul.f32 %v4474_v2, %v4855_v36  ;;  %s4969_s7 = sld [smem:[#allocation2 + $0x10c]] }
 0x14b   : > { %v1116_v44 = vadd.f32 %v1112_v5, %v1099_v31  ;;  %1670 = vrot.lane.b32.xlu2 %v1667_v62, %s5886_s11  ;;  %v1758_v31 = vrot.slane %v1752_v20, 1  ;;  %v1222_v5 = vmul.f32 %v4474_v2, %v1221_v10  ;;  %v1762_v16 = vsel %vm344_vm0, %v1759_v40, %v1761_v60 }
 0x14c   : > { %v1740_v39 = vrot.slane %v1733_v0, 1  ;;  %v4873_v27 = vmul.f32 %v4521_v22, %v4855_v36  ;;  %v1223_v33 = vmul.f32 %v4521_v22, %v1221_v10  ;;  %v1817_v50 = vrot.slane %v1811_v7, 2 }
 0x14d   : > { %v1137_v41 = vadd.f32 %v4741_v32, %v1116_v44  ;;  %v1760_v55 = vsel %vm344_vm0, %v1758_v31, %v1759_v40  ;;  %v1224_v23 = vadd.f32 %v1222_v5, %v1219_v26  ;;  %v1314_v5 = vstv %s4884_s10 }
 0x14e   : > { %1692 = vrot.lane.b32.xlu1 %v1687_v9, %s5884_s12  ;;  %1690 = vrot.lane.b32.xlu0 %v1686_v28, %s5884_s12  ;;  %v4846_v45 = vpop.permute.xlu2 %1246  ;;  %v1789_v9 = vstv %s4832_s29  ;;  %v5904_v28 = vld [vmem:[#allocation16_spill] sm:$0xff]  ;;  %v1225_v56 = vadd.f32 %v1223_v33, %v1219_v26  ;;  %s4952_s29 = sld [smem:[#allocation2 + $0x190]] }
 0x14f   : > { %v759_v63 = vadd.f32 %v5904_v28, %v738_v37  ;;  %v1791_v44 = vmul.f32 %v4521_v22, %v1789_v9  ;;  %v1792_v62 = vmul.f32 %v4541_v57, %v1789_v9  ;;  %v1790_v4 = vmul.f32 %v4474_v2, %v1789_v9 }
 0x150   : > { %v1154_v29 = vpop.permute.xlu1 %1153  ;;  %v1152_v25 = vpop.permute.xlu0 %1151  ;;  %v4908_v9 = vstv %s4886_s13  ;;  %s5042_s13 = sld [smem:[#allocation2 + $0x10f]] }
 0x151   : > { %v1157_v30 = vadd.f32 %v1152_v25, %v1136_v53  ;;  %v1158_v1 = vadd.f32 %v1154_v29, %v1137_v41  ;;  %v1797_v59 = vrot.slane %v1791_v44, 2  ;;  %v1799_v19 = vrot.slane %v1792_v62, 2 }
 0x152   : > { %v4932_v44 = vmul.f32 %v4580_v21, %v4908_v9  ;;  %v1317_v62 = vmul.f32 %v4541_v57, %v1314_v5 }
 0x153   : > { %v1174_v32 = vadd.f32 %v1169_v13, %v1157_v30  ;;  %v1175_v58 = vadd.f32 %v1171_v14, %v1158_v1  ;;  %1704 = vrot.lane.b32.xlu2 %v1700_v47, %s5886_s11  ;;  %v1741_v13 = vsel %vm344_vm0, %v1738_v24, %v1740_v39  ;;  %v1796_v47 = vrot.slane %v1790_v4, 2 }
 0x154   : > { %v1800_v31 = vsel %vm404_vm1, %v1797_v59, %v1799_v19  ;;  %v1315_v39 = vmul.f32 %v4474_v2, %v1314_v5  ;;  %v1324_v19 = vrot.slane %v1317_v62, 2 }
 0x155   : > { %v1195_v35 = vadd.f32 %v4780_v49, %v1174_v32  ;;  %v1255_v49 = vstv %s4841_s8  ;;  %v1798_v28 = vsel %vm404_vm1, %v1796_v47, %v1797_v59  ;;  %s5021_s8 = sand.u32 1, %s3913_s19  }
 0x156   : > { %1742 = vrot.lane.b32.xlu1 %v1739_v38, %s5884_s12  ;;  %1706 = vrot.lane.b32.xlu0 %v1701_v43, %s5886_s11  ;;  %v4877_v46 = vpop.permute.xlu2 %1286  ;;  %v1256_v29 = vmul.f32 %v4474_v2, %v1255_v49  ;;  %v1257_v25 = vmul.f32 %v4521_v22, %v1255_v49  ;;  %v1258_v51 = vmul.f32 %v4541_v57, %v1255_v49  ;;  %s3419_s10 = sshll.u32 %s5021_s8, 5 }
 0x157   : > { %v1316_v49 = vmul.f32 %v4521_v22, %v1314_v5 }
 0x158   : > { %v1211_v15 = vpop.permute.xlu1 %1210  ;;  %v1192_v6 = vpop.permute.xlu0 %1191  ;;  %v1262_v32 = vrot.slane %v1256_v29, 1  ;;  %v1263_v38 = vrot.slane %v1257_v25, 1  ;;  %v1265_v40 = vrot.slane %v1258_v51, 1 }
 0x159   : > { %v1216_v12 = vadd.f32 %v1211_v15, %v1195_v35  ;;  %v1196_v17 = vadd.f32 %v1192_v6, %v1175_v58  ;;  %v1322_v59 = vrot.slane %v1316_v49, 2  ;;  %v1885_v49 = vmul.f32 %v4561_v52, %v4908_v9 }
 0x15a   : > { %v1264_v58 = vsel %vm344_vm0, %v1262_v32, %v1263_v38  ;;  %v1266_v15 = vsel %vm344_vm0, %v1263_v38, %v1265_v40 }
 0x15b   : > { %v3050_v54 = vmax.f32 %v758_v42, %v1216_v12  ;;  %v1217_v53 = vadd.f32 %v4810_v3, %v1196_v17  ;;  %v1818_v3 = vrot.slane %v4873_v27, 2  ;;  %1744 = vrot.lane.b32.xlu2 %v1741_v13, %s5884_s12  ;;  %v1325_v47 = vsel %vm404_vm1, %v1322_v59, %v1324_v19 }
 0x15d   : > { %v3052_v34 = vsub.f32 %v758_v42, %v3050_v54  ;;  %v3058_v41 = vsub.f32 %v1216_v12, %v3050_v54  ;;  %v3051_v30 = vmax.f32 %v759_v63, %v1217_v53  ;;  %v1819_v42 = vsel %vm404_vm1, %v1817_v50, %v1818_v3 }
 0x15e   : > { %1765 = vrot.lane.b32.xlu1 %v1762_v16, %s5886_s11  ;;  %1763 = vrot.lane.b32.xlu0 %v1760_v55, %s5886_s11  ;;  %v4898_v60 = vpop.permute.xlu2 %1343  ;;  %v1903_v12 = vstv %s4895_s15  ;;  %v1883_v55 = vmul.f32 %v4545_v18, %v4908_v9  ;;  %v1407_v9 = vstv %s4969_s7  ;;  %s5062_s15 = scalar_lea.vmem [#allocation7], %s3419_s10  ;;  %s3531_s7 = sld [smem:[#allocation2 + $0x19a]] }
 0x15f   : > { %v3054_v24 = vmul.f32 1.442695, %v3052_v34  ;;  %v3060_v43 = vmul.f32 1.442695, %v3058_v41  ;;  %v3053_v20 = vsub.f32 %v759_v63, %v3051_v30  ;;  %v3059_v61 = vsub.f32 %v1217_v53, %v3051_v30  ;;  %s3530_s10 = sld [smem:[#allocation2 + $0x199]] }
 0x160   : > { %v1235_v37 = vpop.permute.xlu1 %1234  ;;  %v1233_v1 = vpop.permute.xlu0 %1232  ;;  %v1813_v63 = vmul.f32 %v4541_v57, %v4855_v36  ;;  %v1905_v57 = vmul.f32 %v4580_v21, %v1903_v12  ;;  %v1906_v13 = vmul.f32 %v4561_v52, %v1903_v12  ;;  %v1321_v34 = vrot.slane %v1315_v39, 2 }
 0x161   : > { %3698 = vpow2.f32 %v3054_v24  ;;  %v3056_v14 = vmul.f32 1.442695, %v3053_v20  ;;  %v3062_v10 = vmul.f32 1.442695, %v3059_v61  ;;  %v1238_v0 = vadd.f32 %v1233_v1, %v1224_v23 }
 0x162   : > { %3700 = vpow2.f32 %v3060_v43  ;;  %v1239_v26 = vadd.f32 %v1235_v37, %v1225_v56  ;;  %v1820_v33 = vrot.slane %v1813_v63, 2  ;;  %v1904_v41 = vmul.f32 %v4545_v18, %v1903_v12 }
 0x163   : > { %3702 = vpow2.f32 %v3056_v14  ;;  %v1252_v35 = vadd.f32 %v4846_v45, %v1238_v0  ;;  %v1837_v45 = vstv %s4893_s14  ;;  %1801 = vrot.lane.b32.xlu2 %v1798_v28, %s5884_s12  ;;  %v1889_v51 = vrot.slane %v1883_v55, 1  ;;  %s5058_s14 = sld [smem:[#allocation2 + $0x193]] }
 0x164   : > { %3704 = vpow2.f32 %v3062_v10  ;;  %v1839_v50 = vmul.f32 %v4580_v21, %v1837_v45  ;;  %v1838_v29 = vmul.f32 %v4545_v18, %v1837_v45  ;;  %v1890_v24 = vrot.slane %v4932_v44, 1 }
 0x165   : > { %v1269_v7 = vadd.f32 %v1264_v58, %v1252_v35  ;;  %v1851_v43 = vstv %s4910_s16  ;;  %v1821_v20 = vsel %vm404_vm1, %v1818_v3, %v1820_v33  ;;  %v1911_v61 = vrot.slane %v1905_v57, 1  ;;  %s3527_s16 = sld [smem:[#allocation2 + $0x196]] }
 0x166   : > { %1822 = vrot.lane.b32.xlu1 %v1819_v42, %s5886_s11  ;;  %1803 = vrot.lane.b32.xlu0 %v1800_v31, %s5884_s12  ;;  %v4948_v25 = vpop.permute.xlu2 %1366  ;;  %v1913_v37 = vrot.slane %v1906_v13, 1  ;;  %v1373_v1 = vstv %s4919_s17  ;;  %v1910_v38 = vrot.slane %v1904_v41, 1  ;;  %v1323_v3 = vsel %vm404_vm1, %v1321_v34, %v1322_v59  ;;  %s5089_s17 = sld [smem:[#allocation2 + $0x194]] }
 0x167   : > { %v4921_v6 = vpop.eup %3698  ;;  %v1853_v10 = vmul.f32 %v4580_v21, %v1851_v43  ;;  %v4977_v0 = vstv %s4936_s27  ;;  %v4983_v31 = vmul.f32 %v4545_v18, %v1373_v1  ;;  %v4990_v5 = vmul.f32 %v4580_v21, %v1373_v1  ;;  %s3528_s27 = sld [smem:[#allocation2 + $0x197]] }
 0x168   : > { %v4925_v17 = vpop.eup %3700  ;;  %v1285_v16 = vpop.permute.xlu1 %1284  ;;  %v4987_v58 = vsel %vm344_vm0, %v1911_v61, %v1913_v37  ;;  %v1941_v63 = vstv %s4952_s29  ;;  %v1892_v59 = vrot.slane %v1885_v49, 1  ;;  %s5110_s29 = sld [smem:[#allocation2 + $0x112]] }
 0x169   : > { %v1249_v36 = vpop.permute.xlu0 %1248  ;;  %v4938_v2 = vpop.eup %3702  ;;  %v4942_v54 = vadd.f32 %v4925_v17, %v4921_v6  ;;  %v1290_v22 = vadd.f32 %v1285_v16, %v1269_v7  ;;  %v4999_v7 = vmul.f32 %v4545_v18, %v4977_v0  ;;  %v5003_v16 = vmul.f32 %v4580_v21, %v4977_v0 }
 0x16a   : > { %v1253_v53 = vadd.f32 %v1249_v36, %v1239_v26  ;;  %v4944_v23 = vpop.eup %3704  ;;  %v1912_v26 = vsel %vm344_vm0, %v1910_v38, %v1911_v61  ;;  %v1852_v36 = vmul.f32 %v4545_v18, %v1851_v43  ;;  %v1408_v61 = vmul.f32 %v4545_v18, %v1407_v9 }
 0x16b   : > { %3706 = vrcp.f32 %v4942_v54  ;;  %v4958_v30 = vadd.f32 %v4944_v23, %v4938_v2  ;;  %1824 = vrot.lane.b32.xlu2 %v1821_v20, %s5886_s11  ;;  %vm3071_vm4 = vweird.f32 %v4942_v54  ;;  %v1969_v20 = vrot.slane %v4999_v7, 2 }
 0x16c   : > { %v1270_v4 = vadd.f32 %v1266_v15, %v1253_v53  ;;  %v3077_v15 = vand.u32 2147483648, %v4942_v54  ;;  %v5014_v53 = vmul.f32 %v4561_v52, %v1941_v63  ;;  %v1893_v18 = vsel %vm344_vm0, %v1890_v24, %v1892_v59 }
 0x16d   : > { %3708 = vrcp.f32 %v4958_v30  ;;  %v3090_v52 = vand.u32 2147483647, %v4958_v30  ;;  %v3092_v34 = vand.u32 2147483648, %v4958_v30  ;;  %vm3086_vm8 = vweird.f32 %v4958_v30 }
 0x16e   : > { %1844 = vrot.lane.b32.xlu1 %v1839_v50, %s5884_s12  ;;  %1842 = vrot.lane.b32.xlu0 %v1838_v29, %s5884_s12  ;;  %v1291_v32 = vadd.f32 %v4877_v46, %v1270_v4  ;;  %v1891_v46 = vsel %vm344_vm0, %v1889_v51, %v1890_v24  ;;  %v4992_v28 = vpop.permute.xlu2 %1398  ;;  %v3075_v50 = vand.u32 2147483647, %v4942_v54  ;;  %v1951_v44 = vrot.slane %v5014_v53, 2 }
 0x16f   : > { %vm3091_vm10 = vcmp.eq.f32.partialorder %v3090_v52, 8.507059e+37 }
 0x170   : > { %v1308_v14 = vpop.permute.xlu1 %1307  ;;  %vm3076_vm7 = vcmp.eq.f32.partialorder %v3075_v50, 8.507059e+37 }
 0x171   : > { %v1306_v27 = vpop.permute.xlu0 %1305  ;;  %v3707_v40 = vpop.eup %3706  ;;  %v1312_v56 = vadd.f32 %v1308_v14, %v1291_v32 }
 0x172   : > { %v1311_v42 = vadd.f32 %v1306_v27, %v1290_v22  ;;  %v3067_v35 = vmul.f32 %v3707_v40, %v4942_v54  ;;  %v5011_v22 = vmul.f32 %v4580_v21, %v1941_v63  ;;  %vm3072_vm3 = vweird.f32 %v3707_v40 }
 0x173   : > { %v3709_v39 = vpop.eup %3708  ;;  %v1329_v57 = vadd.f32 %v1325_v47, %v1312_v56  ;;  %1856 = vrot.lane.b32.xlu2 %v1852_v36, %s5886_s11  ;;  %vm3073_vm5 = vmor %vm3071_vm4, %vm3072_vm3  ;;  %v1466_v36 = vstv %s5042_s13  ;;  %s3498_s13 = sld [smem:[#allocation2 + $0x115]] }
 0x174   : > { %v1328_v45 = vadd.f32 %v1323_v3, %v1311_v42  ;;  %v3068_v12 = vsub.f32 1.0, %v3067_v35  ;;  %v3082_v55 = vmul.f32 %v3709_v39, %v4958_v30  ;;  %vm3087_vm6 = vweird.f32 %v3709_v39  ;;  %v5045_v30 = vld [vmem:[%s4049_s9 + $0x18] sm:$0xff] }
 0x175   : > { %vm3088_vm9 = vmor %vm3086_vm8, %vm3087_vm6  ;;  %v3093_v3 = vor.u32 1.1754944e-38, %v3092_v34  ;;  %v1467_v50 = vmul.f32 %v5045_v30, %v1466_v36 }
 0x176   : > { %v1349_v62 = vadd.f32 %v4898_v60, %v1328_v45  ;;  %v3069_v33 = vmul.f32 %v3707_v40, %v3068_v12  ;;  %1894 = vrot.lane.b32.xlu1 %v1891_v46, %s5884_s12  ;;  %1858 = vrot.lane.b32.xlu0 %v1853_v10, %s5886_s11  ;;  %v3078_v60 = vor.u32 1.1754944e-38, %v3077_v15  ;;  %v3083_v29 = vsub.f32 1.0, %v3082_v55  ;;  %v5031_v37 = vpop.permute.xlu2 %1438 }
 0x177   : > { %v1409_v10 = vmul.f32 %v4580_v21, %v1407_v9  ;;  %v1970_v21 = vrot.slane %v5003_v16, 2 }
 0x178   : > { %v3070_v13 = vadd.f32 %v3707_v40, %v3069_v33  ;;  %v1365_v41 = vpop.permute.xlu1 %1364  ;;  %v3084_v19 = vmul.f32 %v3709_v39, %v3083_v29 }
 0x179   : > { %v1346_v4 = vpop.permute.xlu0 %1345  ;;  %v1370_v51 = vadd.f32 %v1365_v41, %v1349_v62  ;;  %v1971_v7 = vsel %vm404_vm1, %v1969_v20, %v1970_v21  ;;  %v1989_v62 = vstv %s5058_s14  ;;  %s3501_s14 = sld [smem:[#allocation2 + $0x118]] }
 0x17a   : > { %v1350_v54 = vadd.f32 %v1346_v4, %v1329_v57  ;;  %v3074_v43 = vsel %vm3073_vm5, %v3707_v40, %v3070_v13  ;;  %v3085_v32 = vadd.f32 %v3709_v39, %v3084_v19  ;;  %v1991_v52 = vmul.f32 %v4651_v48, %v1989_v62 }
 0x17b   : > { %v3079_v1 = vsel %vm3076_vm7, %v3078_v60, %v3074_v43  ;;  %v1376_v42 = vadd.f32 %v4983_v31, %v1370_v51  ;;  %1896 = vrot.lane.b32.xlu2 %v1893_v18, %s5884_s12  ;;  %v1990_v34 = vmul.f32 %v4655_v11, %v1989_v62  ;;  %v1473_v51 = vrot.slane %v1467_v50, 2 }
 0x17c   : > { %v1371_v38 = vadd.f32 %v4948_v25, %v1350_v54  ;;  %v3096_v14 = vmul.f32 %v4921_v6, %v3079_v1  ;;  %v3101_v27 = vmul.f32 %v4925_v17, %v3079_v1  ;;  %v3089_v47 = vsel %vm3088_vm9, %v3709_v39, %v3085_v32 }
 0x17d   : > { %v1942_v6 = vmul.f32 %v5045_v30, %v1941_v63  ;;  %v3094_v25 = vsel %vm3091_vm10, %v3093_v3, %v3089_v47  ;;  %v1949_v17 = vrot.slane %v5011_v22, 2 }
 0x17e   : > { %1917 = vrot.lane.b32.xlu1 %v4987_v58, %s5886_s11  ;;  %1915 = vrot.lane.b32.xlu0 %v1912_v26, %s5886_s11  ;;  %v3097_v24 = vmul.f32 %v4938_v2, %v3094_v25  ;;  %v3102_v40 = vmul.f32 %v4944_v23, %v3094_v25  ;;  %v1377_v56 = vadd.f32 %v4990_v5, %v1371_v38  ;;  %v1414_v2 = vrot.slane %v1408_v61, 1  ;;  %v5067_v23 = vld [vmem:[%s4049_s9 + $0x28] sm:$0x3]  ;;  %v5075_v45 = vpop.permute.xlu2 %1495 }
 0x17f   : > { %3099 = vst.msk [vmem:[%s5062_s15] sm:$0xff] %vm3098_vm2, %v3096_v14  ;;  %v1415_v58 = vrot.slane %v1409_v10, 1  ;;  %v1410_v31 = vmul.f32 %v5067_v23, %v1407_v9  ;;  %v1948_v15 = vrot.slane %v1942_v6, 2  ;;  %v1952_v39 = vsel %vm404_vm1, %v1949_v17, %v1951_v44  ;;  %v5095_v9 = vld [vmem:[%s4049_s9 + $0x20] sm:$0xff] }
 0x180   : > { %v1387_v46 = vpop.permute.xlu1 %1386  ;;  %3588 = vst.msk [vmem:[%s5062_s15 + $0x10] sm:$0xff] %vm3098_vm2, %v3101_v27  ;;  %v1965_v55 = vmul.f32 %v5067_v23, %v4977_v0  ;;  %v1468_v60 = vmul.f32 %v5095_v9, %v1466_v36  ;;  %v2034_v0 = vstv %s3527_s16  ;;  %v1469_v43 = vmul.f32 %v5067_v23, %v1466_v36  ;;  %s5154_s16 = sld [smem:[#allocation2 + $0x201]] }
 0x181   : > { %v1385_v35 = vpop.permute.xlu0 %1384  ;;  %v1391_v5 = vadd.f32 %v1387_v46, %v1377_v56  ;;  %3100 = vst.msk [vmem:[%s5062_s15 + $0x8] sm:$0xff] %vm3098_vm2, %v3097_v24  ;;  %v1416_v12 = vsel %vm344_vm0, %v1414_v2, %v1415_v58  ;;  %v1417_v16 = vrot.slane %v1410_v31, 1  ;;  %v1950_v49 = vsel %vm404_vm1, %v1948_v15, %v1949_v17 }
 0x182   : > { %v1390_v63 = vadd.f32 %v1385_v35, %v1376_v42  ;;  %3589 = vst.msk [vmem:[%s5062_s15 + $0x18] sm:$0xff] %vm3098_vm2, %v3102_v40  ;;  %v1972_v13 = vrot.slane %v1965_v55, 2  ;;  %v2035_v59 = vmul.f32 %v4655_v11, %v2034_v0  ;;  %v5103_v19 = vmul.f32 %v4651_v48, %v2034_v0  ;;  %v5135_v55 = vld [vmem:[%s4049_s9 + $0x30] sm:$0xff] }
 0x183   : > { %v1418_v33 = vsel %vm344_vm0, %v1415_v58, %v1417_v16  ;;  %1953 = vrot.lane.b32.xlu2 %v1950_v49, %s5884_s12  ;;  %v1474_v54 = vrot.slane %v1468_v60, 2  ;;  %v2003_v38 = vstv %s5089_s17  ;;  %v2055_v14 = vstv %s3528_s27  ;;  %s3537_s17 = sld [smem:[#allocation2 + $0x204]] }
 0x184   : > { %v1404_v26 = vadd.f32 %v4992_v28, %v1390_v63  ;;  %v1973_v61 = vsel %vm404_vm1, %v1970_v21, %v1972_v13  ;;  %v2041_v1 = vrot.slane %v2035_v59, 1  ;;  %v2042_v32 = vrot.slane %v5103_v19, 1  ;;  %s5170_s27 = sld [smem:[#allocation2 + $0x202]] }
 0x185   : > { %v1475_v10 = vsel %vm404_vm1, %v1473_v51, %v1474_v54  ;;  %v1476_v47 = vrot.slane %v1469_v43, 2  ;;  %v2005_v6 = vmul.f32 %v4651_v48, %v2003_v38  ;;  %v2057_v25 = vmul.f32 %v4651_v48, %v2055_v14 }
 0x186   : > { %1974 = vrot.lane.b32.xlu1 %v1971_v7, %s5886_s11  ;;  %1955 = vrot.lane.b32.xlu0 %v1952_v39, %s5884_s12  ;;  %v1421_v28 = vadd.f32 %v1416_v12, %v1404_v26  ;;  %v1519_v41 = vpop.permute.xlu2 %1518  ;;  %v2058_v21 = vmul.f32 %v4694_v8, %v2055_v14  ;;  %v2043_v24 = vsel %vm344_vm0, %v2041_v1, %v2042_v32  ;;  %v2114_v63 = vstv %s3531_s7  ;;  %v5129_v7 = vld [vmem:[%s4049_s9 + $0x38] sm:$0xff]  ;;  %s5194_s7 = sld [smem:[#allocation2 + $0x180]] }
 0x187   : > { %v2056_v40 = vmul.f32 %v4655_v11, %v2055_v14  ;;  %v1477_v56 = vsel %vm404_vm1, %v1474_v54, %v1476_v47  ;;  %v2004_v42 = vmul.f32 %v4655_v11, %v2003_v38  ;;  %v2037_v35 = vmul.f32 %v4694_v8, %v2034_v0 }
 0x188   : > { %v1437_v22 = vpop.permute.xlu1 %1436  ;;  %v2063_v48 = vrot.slane %v2057_v25, 1  ;;  %v2065_v2 = vrot.slane %v2058_v21, 1  ;;  %v1559_v16 = vstv %s3498_s13  ;;  %v2115_v62 = vmul.f32 %v5135_v55, %v2114_v63  ;;  %v5165_v25 = vld [vmem:[%s4049_s9 + $0x40] sm:$0x3]  ;;  %s3540_s13 = sld [smem:[#allocation2 + $0x207]] }
 0x189   : > { %v1401_v53 = vpop.permute.xlu0 %1400  ;;  %v1442_v29 = vadd.f32 %v1437_v22, %v1421_v28  ;;  %v2062_v31 = vrot.slane %v2056_v40, 1  ;;  %v2044_v36 = vrot.slane %v2037_v35, 1  ;;  %v5140_v22 = vmul.f32 %v5129_v7, %v2114_v63 }
 0x18a   : > { %v1405_v57 = vadd.f32 %v1401_v53, %v1391_v5  ;;  %v1525_v5 = vstv %s5110_s29  ;;  %v2066_v49 = vsel %vm344_vm0, %v2063_v48, %v2065_v2  ;;  %v1562_v1 = vmul.f32 %v4694_v8, %v1559_v16  ;;  %s5173_s29 = sld [smem:[#allocation2 + $0x205]] }
 0x18b   : > { %1976 = vrot.lane.b32.xlu2 %v1973_v61, %s5886_s11  ;;  %v1527_v11 = vmul.f32 %v5129_v7, %v1525_v5  ;;  %v1526_v28 = vmul.f32 %v5135_v55, %v1525_v5  ;;  %v2064_v50 = vsel %vm344_vm0, %v2062_v31, %v2063_v48  ;;  %v2045_v13 = vsel %vm344_vm0, %v2042_v32, %v2044_v36  ;;  %v5180_v31 = vld [vmem:[%s4049_s9 + $0x8] sm:$0xff] }
 0x18c   : > { %v1422_v4 = vadd.f32 %v1418_v33, %v1405_v57  ;;  %v1561_v57 = vmul.f32 %v5129_v7, %v1559_v16  ;;  %v2117_v21 = vmul.f32 %v5165_v25, %v2114_v63  ;;  %v2188_v35 = vstv %s3537_s17  ;;  %v5184_v63 = vld [vmem:[%s4049_s9] sm:$0xff]  ;;  %s3511_s17 = sld [smem:[#allocation2 + $0x186]] }
 0x18e   : > { %v1443_v20 = vadd.f32 %v5031_v37, %v1422_v4  ;;  %1996 = vrot.lane.b32.xlu1 %v1991_v52, %s5884_s12  ;;  %1994 = vrot.lane.b32.xlu0 %v1990_v34, %s5884_s12  ;;  %v1551_v17 = vpop.permute.xlu2 %1550  ;;  %v2121_v34 = vrot.slane %v2115_v62, 2  ;;  %v1567_v61 = vrot.slane %v1561_v57, 1 }
 0x190   : > { %v1460_v27 = vpop.permute.xlu1 %1459 }
 0x191   : > { %v1458_v3 = vpop.permute.xlu0 %1457  ;;  %v1464_v37 = vadd.f32 %v1460_v27, %v1443_v20 }
 0x192   : > { %v1463_v18 = vadd.f32 %v1458_v3, %v1442_v29  ;;  %v1560_v29 = vmul.f32 %v5135_v55, %v1559_v16 }
 0x193   : > { %v1481_v58 = vadd.f32 %v1477_v56, %v1464_v37  ;;  %2008 = vrot.lane.b32.xlu2 %v2004_v42, %s5886_s11 }
 0x194   : > { %v1480_v44 = vadd.f32 %v1475_v10, %v1463_v18  ;;  %v1566_v20 = vrot.slane %v1560_v29, 1  ;;  %v1569_v18 = vrot.slane %v1562_v1, 1  ;;  %v1679_v1 = vstv %s5194_s7  ;;  %s5258_s7 = sld [smem:[#allocation2 + $0x20b]] }
 0x196   : > { %v1501_v46 = vadd.f32 %v5075_v45, %v1480_v44  ;;  %2046 = vrot.lane.b32.xlu1 %v2043_v24, %s5884_s12  ;;  %2010 = vrot.lane.b32.xlu0 %v2005_v6, %s5886_s11  ;;  %v2093_v45 = vstv %s3530_s10  ;;  %v5142_v53 = vpop.permute.xlu2 %1590  ;;  %v1568_v37 = vsel %vm344_vm0, %v1566_v20, %v1567_v61  ;;  %v1618_v6 = vstv %s3501_s14  ;;  %s3541_s10 = sld [smem:[#allocation2 + $0x208]] }
 0x197   : > { %v2095_v60 = vmul.f32 %v5129_v7, %v2093_v45  ;;  %v2096_v0 = vmul.f32 %v4694_v8, %v2093_v45  ;;  %v2094_v52 = vmul.f32 %v5135_v55, %v2093_v45  ;;  %v2143_v44 = vstv %s5154_s16  ;;  %s3508_s14 = sld [smem:[#allocation2 + $0x183]] }
 0x198   : > { %v1517_v15 = vpop.permute.xlu1 %1516  ;;  %v1570_v56 = vsel %vm344_vm0, %v1567_v61, %v1569_v18  ;;  %v1619_v42 = vmul.f32 %v5135_v55, %v1618_v6  ;;  %v2145_v5 = vmul.f32 %v5180_v31, %v2143_v44  ;;  %v2189_v45 = vmul.f32 %v5184_v63, %v2188_v35  ;;  %s5210_s16 = sld [smem:[#allocation5 + $0x3]] }
 0x199   : > { %v1498_v26 = vpop.permute.xlu0 %1497  ;;  %v1522_v39 = vadd.f32 %v1517_v15, %v1501_v46  ;;  %v2101_v19 = vrot.slane %v2095_v60, 2  ;;  %v2103_v51 = vrot.slane %v2096_v0, 2  ;;  %v2100_v14 = vrot.slane %v2094_v52, 2 }
 0x19a   : > { %v1502_v12 = vadd.f32 %v1498_v26, %v1481_v58  ;;  %v1620_v46 = vmul.f32 %v5129_v7, %v1618_v6  ;;  %v2124_v58 = vrot.slane %v2117_v21, 2  ;;  %v2144_v15 = vmul.f32 %v5184_v63, %v2143_v44 }
 0x19b   : > { %v1528_v59 = vadd.f32 %v1526_v28, %v1522_v39  ;;  %2048 = vrot.lane.b32.xlu2 %v2045_v13, %s5884_s12  ;;  %v2104_v47 = vsel %vm404_vm1, %v2101_v19, %v2103_v51  ;;  %v2102_v8 = vsel %vm404_vm1, %v2100_v14, %v2101_v19  ;;  %v5189_v39 = vmul.f32 %v5180_v31, %v2188_v35 }
 0x19c   : > { %v1523_v33 = vadd.f32 %v1519_v41, %v1502_v12  ;;  %v2122_v41 = vrot.slane %v5140_v22, 2  ;;  %v1625_v12 = vrot.slane %v1619_v42, 2  ;;  %v1626_v16 = vrot.slane %v1620_v46, 2 }
 0x19d   : > { %v1621_v36 = vmul.f32 %v5165_v25, %v1618_v6  ;;  %v2195_v62 = vrot.slane %v2189_v45, 1  ;;  %v2196_v22 = vrot.slane %v5189_v39, 1  ;;  %v1680_v6 = vmul.f32 %v5184_v63, %v1679_v1 }
 0x19e   : > { %2069 = vrot.lane.b32.xlu1 %v2066_v49, %s5886_s11  ;;  %2067 = vrot.lane.b32.xlu0 %v2064_v50, %s5886_s11  ;;  %v1529_v4 = vadd.f32 %v1527_v11, %v1523_v33  ;;  %v5158_v27 = vpop.permute.xlu2 %1647  ;;  %v2123_v10 = vsel %vm404_vm1, %v2121_v34, %v2122_v41  ;;  %v2125_v28 = vsel %vm404_vm1, %v2122_v41, %v2124_v58  ;;  %v2157_v33 = vstv %s5170_s27  ;;  %v5206_v41 = vld [vmem:[%s4049_s9 + $0x10] sm:$0x3]  ;;  %s5245_s27 = sld [smem:[#allocation2 + $0x20a]] }
 0x19f   : > { %v2209_v50 = vstv %s5173_s29  ;;  %v1627_v29 = vsel %vm404_vm1, %v1625_v12, %v1626_v16  ;;  %v2159_v52 = vmul.f32 %v5180_v31, %v2157_v33  ;;  %v2158_v20 = vmul.f32 %v5184_v63, %v2157_v33  ;;  %s3546_s29 = sld [smem:[#allocation2 + $0x20d]] }
 0x1a0   : > { %v1539_v54 = vpop.permute.xlu1 %1538  ;;  %v2211_v34 = vmul.f32 %v5180_v31, %v2209_v50 }
 0x1a1   : > { %v1537_v43 = vpop.permute.xlu0 %1536  ;;  %v1543_v32 = vadd.f32 %v1539_v54, %v1529_v4  ;;  %v2212_v4 = vmul.f32 %v5206_v41, %v2209_v50  ;;  %v2197_v54 = vsel %vm344_vm0, %v2195_v62, %v2196_v22 }
 0x1a2   : > { %v1542_v38 = vadd.f32 %v1537_v43, %v1528_v59  ;;  %v2210_v59 = vmul.f32 %v5184_v63, %v2209_v50 }
 0x1a3   : > { %2105 = vrot.lane.b32.xlu2 %v2102_v8, %s5884_s12  ;;  %v2219_v14 = vrot.slane %v2212_v4, 1  ;;  %v2247_v8 = vstv %s3540_s13  ;;  %s5274_s13 = sld [smem:[#allocation2 + $0x189]] }
 0x1a4   : > { %v1556_v3 = vadd.f32 %v1551_v17, %v1542_v38  ;;  %v2217_v38 = vrot.slane %v2211_v34, 1  ;;  %v2250_v58 = vmul.f32 %v5206_v41, %v2247_v8  ;;  %v2248_v39 = vmul.f32 %v5184_v63, %v2247_v8 }
 0x1a6   : > { %2126 = vrot.lane.b32.xlu1 %v2123_v10, %s5886_s11  ;;  %2107 = vrot.lane.b32.xlu0 %v2104_v47, %s5884_s12  ;;  %v1573_v17 = vadd.f32 %v1568_v37, %v1556_v3  ;;  %v1671_v26 = vpop.permute.xlu2 %1670  ;;  %v2216_v3 = vrot.slane %v2210_v59, 1  ;;  %v2268_v47 = vstv %s3541_s10  ;;  %v1772_v59 = vstv %s3511_s17  ;;  %s3547_s10 = sld [smem:[#allocation2 + $0x20e]] }
 0x1a7   : > { %v2269_v42 = vmul.f32 %v5184_v63, %v2268_v47  ;;  %s3517_s17 = sld [smem:[#allocation2 + $0x18c]] }
 0x1a8   : > { %v1589_v24 = vpop.permute.xlu1 %1588 }
 0x1a9   : > { %v1553_v40 = vpop.permute.xlu0 %1552  ;;  %v1594_v48 = vadd.f32 %v1589_v24, %v1573_v17  ;;  %v1713_v17 = vstv %s3508_s14  ;;  %v2220_v24 = vsel %vm344_vm0, %v2217_v38, %v2219_v14  ;;  %v2275_v12 = vrot.slane %v2269_v42, 2  ;;  %s3550_s14 = sld [smem:[#allocation2 + $0x211]] }
 0x1aa   : > { %v1557_v2 = vadd.f32 %v1553_v40, %v1543_v32  ;;  %v2191_v32 = vmul.f32 %v5206_v41, %v2188_v35  ;;  %v2218_v40 = vsel %vm344_vm0, %v2216_v3, %v2217_v38  ;;  %v1716_v50 = vmul.f32 %v5206_v41, %v1713_v17 }
 0x1ab   : > { %2128 = vrot.lane.b32.xlu2 %v2125_v28, %s5886_s11  ;;  %v1773_v38 = vmul.f32 %v5184_v63, %v1772_v59  ;;  %v1774_v14 = vmul.f32 %v5180_v31, %v1772_v59  ;;  %v2340_v3 = vstv %s3546_s29  ;;  %s5314_s29 = sld [smem:[#allocation2 + $0x213]] }
 0x1ac   : > { %v1574_v11 = vadd.f32 %v1570_v56, %v1557_v2  ;;  %v2198_v44 = vrot.slane %v2191_v32, 1  ;;  %v1677_v56 = vstv %s5210_s16  ;;  %v2249_v2 = vmul.f32 %v5180_v31, %v2247_v8  ;;  %s3549_s16 = sld [smem:[#allocation2 + $0x210]] }
 0x1ad   : > { %v1723_v4 = vrot.slane %v1716_v50, 1 }
 0x1ae   : > { %v1595_v49 = vadd.f32 %v5142_v53, %v1574_v11  ;;  %2150 = vrot.lane.b32.xlu1 %v2145_v5, %s5884_s12  ;;  %2148 = vrot.lane.b32.xlu0 %v2144_v15, %s5884_s12  ;;  %v1628_v53 = vrot.slane %v1621_v36, 2  ;;  %v1705_v19 = vpop.permute.xlu2 %1704  ;;  %v1714_v5 = vmul.f32 %v5184_v63, %v1713_v17  ;;  %v1715_v15 = vmul.f32 %v5180_v31, %v1713_v17 }
 0x1af   : > { %v1682_v11 = vadd.f32 %v1680_v6, %v1677_v56  ;;  %v2199_v45 = vsel %vm344_vm0, %v2196_v22, %v2198_v44  ;;  %v2255_v36 = vrot.slane %v2249_v2, 2  ;;  %v2341_v17 = vmul.f32 %v5045_v30, %v2340_v3 }
 0x1b0   : > { %v1612_v60 = vpop.permute.xlu1 %1611  ;;  %v1629_v43 = vsel %vm404_vm1, %v1626_v16, %v1628_v53  ;;  %v1720_v33 = vrot.slane %v1714_v5, 1  ;;  %v1721_v22 = vrot.slane %v1715_v15, 1  ;;  %v5269_v44 = vmul.f32 %v5095_v9, %v2340_v3 }
 0x1b1   : > { %v1610_v0 = vpop.permute.xlu0 %1609  ;;  %v1616_v57 = vadd.f32 %v1612_v60, %v1595_v49  ;;  %v2257_v49 = vrot.slane %v2250_v58, 2  ;;  %v2347_v2 = vrot.slane %v2341_v17, 1  ;;  %v2309_v5 = vstv %s5258_s7  ;;  %s3555_s7 = sld [smem:[#allocation2 + $0x216]] }
 0x1b2   : > { %v1615_v13 = vadd.f32 %v1610_v0, %v1594_v48  ;;  %v5233_v48 = vmul.f32 %v5180_v31, %v2268_v47  ;;  %v2254_v0 = vrot.slane %v2248_v39, 2  ;;  %v1722_v34 = vsel %vm344_vm0, %v1720_v33, %v1721_v22 }
 0x1b3   : > { %v1633_v10 = vadd.f32 %v1629_v43, %v1616_v57  ;;  %2162 = vrot.lane.b32.xlu2 %v2158_v20, %s5886_s11  ;;  %v2295_v20 = vstv %s5245_s27  ;;  %v1724_v32 = vsel %vm344_vm0, %v1721_v22, %v1723_v4  ;;  %v2348_v58 = vrot.slane %v5269_v44, 1  ;;  %s3520_s27 = sld [smem:[#allocation2 + $0x18f]] }
 0x1b4   : > { %v1632_v51 = vadd.f32 %v1627_v29, %v1615_v13  ;;  %v2276_v16 = vrot.slane %v5233_v48, 2  ;;  %v2296_v6 = vmul.f32 %v5045_v30, %v2295_v20  ;;  %v2361_v15 = vstv %s3547_s10  ;;  %s5325_s10 = sld [smem:[#allocation2 + $0x214]] }
 0x1b5   : > { %v2349_v33 = vsel %vm344_vm0, %v2347_v2, %v2348_v58  ;;  %v2362_v22 = vmul.f32 %v5045_v30, %v2361_v15 }
 0x1b6   : > { %v1653_v61 = vadd.f32 %v5158_v27, %v1632_v51  ;;  %2200 = vrot.lane.b32.xlu1 %v2197_v54, %s5884_s12  ;;  %2164 = vrot.lane.b32.xlu0 %v2159_v52, %s5886_s11  ;;  %v5228_v46 = vpop.permute.xlu2 %1744  ;;  %v2277_v13 = vsel %vm404_vm1, %v2275_v12, %v2276_v16  ;;  %v2258_v52 = vsel %vm404_vm1, %v2255_v36, %v2257_v49 }
 0x1b7   : > { %v2256_v51 = vsel %vm404_vm1, %v2254_v0, %v2255_v36  ;;  %v2271_v54 = vmul.f32 %v5206_v41, %v2268_v47  ;;  %v2363_v36 = vmul.f32 %v5095_v9, %v2361_v15  ;;  %v2364_v49 = vmul.f32 %v5067_v23, %v2361_v15 }
 0x1b8   : > { %v1669_v37 = vpop.permute.xlu1 %1668  ;;  %v2368_v4 = vrot.slane %v2362_v22, 1 }
 0x1b9   : > { %v1650_v18 = vpop.permute.xlu0 %1649  ;;  %v5222_v27 = vadd.f32 %v1669_v37, %v1653_v61  ;;  %v2278_v37 = vrot.slane %v2271_v54, 2  ;;  %v1924_v22 = vstv %s3520_s27  ;;  %s3526_s27 = sld [smem:[#allocation2 + $0x195]] }
 0x1ba   : > { %v1654_v21 = vadd.f32 %v1650_v18, %v1633_v10  ;;  %v2297_v18 = vmul.f32 %v5095_v9, %v2295_v20 }
 0x1bb   : > { %2202 = vrot.lane.b32.xlu2 %v2199_v45, %s5884_s12  ;;  %v2279_v48 = vsel %vm404_vm1, %v2276_v16, %v2278_v37  ;;  %v2311_v16 = vmul.f32 %v5095_v9, %v2309_v5 }
 0x1bc   : > { %v5230_v35 = vadd.f32 %v1671_v26, %v1654_v21  ;;  %v1681_v26 = vmul.f32 %v5180_v31, %v1679_v1 }
 0x1be   : > { %2223 = vrot.lane.b32.xlu1 %v2220_v24, %s5886_s11  ;;  %2221 = vrot.lane.b32.xlu0 %v2218_v40, %s5886_s11  ;;  %v5249_v29 = vpop.permute.xlu2 %1801  ;;  %v1683_v53 = vadd.f32 %v1681_v26, %v1677_v56  ;;  %v1779_v24 = vrot.slane %v1773_v38, 2  ;;  %v1780_v40 = vrot.slane %v1774_v14, 2  ;;  %v1775_v56 = vmul.f32 %v5206_v41, %v1772_v59 }
 0x1bf   : > { %v2420_v59 = vstv %s3550_s14  ;;  %s5341_s14 = sld [smem:[#allocation2 + $0x192]] }
 0x1c0   : > { %v1693_v28 = vpop.permute.xlu1 %1692  ;;  %v1781_v39 = vsel %vm404_vm1, %v1779_v24, %v1780_v40  ;;  %v1782_v26 = vrot.slane %v1775_v56, 2  ;;  %v2421_v14 = vmul.f32 %v5045_v30, %v2420_v59 }
 0x1c1   : > { %v1691_v62 = vpop.permute.xlu0 %1690  ;;  %v1697_v43 = vadd.f32 %v1693_v28, %v1683_v53  ;;  %v1831_v53 = vstv %s5274_s13  ;;  %s3556_s13 = sld [smem:[#allocation2 + $0x217]] }
 0x1c2   : > { %v1696_v60 = vadd.f32 %v1691_v62, %v1682_v11  ;;  %v1783_v50 = vsel %vm404_vm1, %v1780_v40, %v1782_v26  ;;  %v1833_v38 = vmul.f32 %v5095_v9, %v1831_v53 }
 0x1c3   : > { %2259 = vrot.lane.b32.xlu2 %v2256_v51, %s5884_s12 }
 0x1c4   : > { %v1710_v57 = vadd.f32 %v1705_v19, %v1696_v60  ;;  %v2310_v60 = vmul.f32 %v5045_v30, %v2309_v5 }
 0x1c6   : > { %2280 = vrot.lane.b32.xlu1 %v2277_v13, %s5886_s11  ;;  %2261 = vrot.lane.b32.xlu0 %v2258_v52, %s5884_s12  ;;  %v1727_v19 = vadd.f32 %v1722_v34, %v1710_v57  ;;  %v1825_v8 = vpop.permute.xlu2 %1824  ;;  %v2343_v57 = vmul.f32 %v5067_v23, %v2340_v3  ;;  %v2369_v13 = vrot.slane %v2363_v36, 1  ;;  %v2371_v52 = vrot.slane %v2364_v49, 1 }
 0x1c7   : > { %v5300_v3 = vmul.f32 %v5095_v9, %v2420_v59 }
 0x1c8   : > { %v1743_v61 = vpop.permute.xlu1 %1742  ;;  %v2370_v37 = vsel %vm344_vm0, %v2368_v4, %v2369_v13  ;;  %v2492_v4 = vstv %s3555_s7  ;;  %s5380_s7 = sld [smem:[#allocation2 + $0x281]] }
 0x1c9   : > { %v1707_v1 = vpop.permute.xlu0 %1706  ;;  %v1748_v10 = vadd.f32 %v1743_v61, %v1727_v19  ;;  %v2399_v19 = vstv %s3549_s16  ;;  %v1865_v61 = vstv %s3517_s17  ;;  %v2428_v40 = vrot.slane %v5300_v3, 2  ;;  %s3559_s16 = sld [smem:[#allocation2 + $0x21a]] }
 0x1ca   : > { %v1711_v47 = vadd.f32 %v1707_v1, %v1697_v43  ;;  %v1832_v43 = vmul.f32 %v5045_v30, %v1831_v53  ;;  %v2350_v1 = vrot.slane %v2343_v57, 1  ;;  %v1867_v17 = vmul.f32 %v5095_v9, %v1865_v61  ;;  %s3558_s17 = sld [smem:[#allocation2 + $0x219]] }
 0x1cb   : > { %2282 = vrot.lane.b32.xlu2 %v2279_v48, %s5886_s11  ;;  %v2400_v24 = vmul.f32 %v5045_v30, %v2399_v19 }
 0x1cc   : > { %v1728_v21 = vadd.f32 %v1724_v32, %v1711_v47  ;;  %v2372_v32 = vsel %vm344_vm0, %v2369_v13, %v2371_v52  ;;  %v2351_v44 = vsel %vm344_vm0, %v2348_v58, %v2350_v1  ;;  %v1873_v58 = vrot.slane %v1867_v17, 1 }
 0x1cd   : > { %v1925_v52 = vmul.f32 %v5045_v30, %v1924_v22  ;;  %v5336_v1 = vmul.f32 %v5129_v7, %v2492_v4 }
 0x1ce   : > { %v1749_v42 = vadd.f32 %v5228_v46, %v1728_v21  ;;  %2302 = vrot.lane.b32.xlu1 %v2297_v18, %s5884_s12  ;;  %2300 = vrot.lane.b32.xlu0 %v2296_v6, %s5884_s12  ;;  %v1857_v28 = vpop.permute.xlu2 %1856  ;;  %v2401_v18 = vmul.f32 %v5095_v9, %v2399_v19  ;;  %v2402_v6 = vmul.f32 %v5067_v23, %v2399_v19 }
 0x1cf   : > { %v1866_v21 = vmul.f32 %v5045_v30, %v1865_v61  ;;  %v1931_v30 = vrot.slane %v1925_v52, 2 }
 0x1d0   : > { %v1766_v11 = vpop.permute.xlu1 %1765  ;;  %v2407_v48 = vrot.slane %v2401_v18, 2  ;;  %v2409_v2 = vrot.slane %v2402_v6, 2  ;;  %v2513_v18 = vstv %s3556_s13  ;;  %s5391_s13 = sld [smem:[#allocation2 + $0x282]] }
 0x1d1   : > { %v1764_v45 = vpop.permute.xlu0 %1763  ;;  %v1770_v46 = vadd.f32 %v1766_v11, %v1749_v42  ;;  %v1872_v11 = vrot.slane %v1866_v21, 1 }
 0x1d2   : > { %v1769_v12 = vadd.f32 %v1764_v45, %v1748_v10  ;;  %v1868_v45 = vmul.f32 %v5067_v23, %v1865_v61  ;;  %v2410_v49 = vsel %vm404_vm1, %v2407_v48, %v2409_v2  ;;  %v2493_v61 = vmul.f32 %v5135_v55, %v2492_v4 }
 0x1d3   : > { %v1787_v34 = vadd.f32 %v1783_v50, %v1770_v46  ;;  %2314 = vrot.lane.b32.xlu2 %v2310_v60, %s5886_s11  ;;  %v2406_v46 = vrot.slane %v2400_v24, 2  ;;  %v2423_v60 = vmul.f32 %v5067_v23, %v2420_v59  ;;  %v2514_v2 = vmul.f32 %v5135_v55, %v2513_v18 }
 0x1d4   : > { %v1786_v62 = vadd.f32 %v1781_v39, %v1769_v12  ;;  %v2499_v3 = vrot.slane %v2493_v61, 1 }
 0x1d5   : > { %v2408_v50 = vsel %vm404_vm1, %v2406_v46, %v2407_v48 }
 0x1d6   : > { %v1807_v0 = vadd.f32 %v5249_v29, %v1786_v62  ;;  %2352 = vrot.lane.b32.xlu1 %v2349_v33, %s5884_s12  ;;  %2316 = vrot.lane.b32.xlu0 %v2311_v16, %s5886_s11  ;;  %v5302_v10 = vpop.permute.xlu2 %1896  ;;  %v1874_v62 = vsel %vm344_vm0, %v1872_v11, %v1873_v58  ;;  %v1875_v33 = vrot.slane %v1868_v45, 1  ;;  %v2495_v45 = vmul.f32 %v5165_v25, %v2492_v4 }
 0x1d8   : > { %v1823_v51 = vpop.permute.xlu1 %1822  ;;  %v1876_v13 = vsel %vm344_vm0, %v1873_v58, %v1875_v33  ;;  %v1983_v58 = vstv %s5341_s14  ;;  %s3566_s14 = sld [smem:[#allocation2 + $0x285]] }
 0x1d9   : > { %v1804_v54 = vpop.permute.xlu0 %1803  ;;  %v1828_v29 = vadd.f32 %v1823_v51, %v1807_v0  ;;  %v1984_v33 = vmul.f32 %v5135_v55, %v1983_v58 }
 0x1da   : > { %v1808_v20 = vadd.f32 %v1804_v54, %v1787_v34  ;;  %v1926_v34 = vmul.f32 %v5095_v9, %v1924_v22  ;;  %v2430_v54 = vrot.slane %v2423_v60, 2  ;;  %v2017_v60 = vstv %s3526_s27  ;;  %s5427_s27 = sld [smem:[#allocation2 + $0x200]] }
 0x1db   : > { %v1834_v42 = vadd.f32 %v1832_v43, %v1828_v29  ;;  %2354 = vrot.lane.b32.xlu2 %v2351_v44, %s5884_s12 }
 0x1dc   : > { %v1829_v47 = vadd.f32 %v1825_v8, %v1808_v20  ;;  %v2427_v8 = vrot.slane %v2421_v14, 2  ;;  %v1932_v9 = vrot.slane %v1926_v34, 2  ;;  %v2431_v14 = vsel %vm404_vm1, %v2428_v40, %v2430_v54 }
 0x1dd   : > { %v2018_v54 = vmul.f32 %v5135_v55, %v2017_v60 }
 0x1de   : > { %2375 = vrot.lane.b32.xlu1 %v2372_v32, %s5886_s11  ;;  %2373 = vrot.lane.b32.xlu0 %v2370_v37, %s5886_s11  ;;  %v1835_v56 = vadd.f32 %v1833_v38, %v1829_v47  ;;  %v1954_v12 = vpop.permute.xlu2 %1953  ;;  %v2429_v36 = vsel %vm404_vm1, %v2427_v8, %v2428_v40  ;;  %v1927_v32 = vmul.f32 %v5067_v23, %v1924_v22  ;;  %v2500_v47 = vrot.slane %v5336_v1, 1 }
 0x1df   : > { %v2461_v37 = vstv %s5325_s10  ;;  %v1933_v23 = vsel %vm404_vm1, %v1931_v30, %v1932_v9  ;;  %v2515_v8 = vmul.f32 %v5129_v7, %v2513_v18  ;;  %v2516_v40 = vmul.f32 %v5165_v25, %v2513_v18  ;;  %s3565_s10 = sld [smem:[#allocation2 + $0x284]] }
 0x1e0   : > { %v1845_v5 = vpop.permute.xlu1 %1844  ;;  %v1934_v17 = vrot.slane %v1927_v32, 2  ;;  %v2463_v24 = vmul.f32 %v5129_v7, %v2461_v37  ;;  %v2501_v48 = vsel %vm344_vm0, %v2499_v3, %v2500_v47  ;;  %v2551_v22 = vstv %s3558_s17  ;;  %s3568_s17 = sld [smem:[#allocation2 + $0x287]] }
 0x1e1   : > { %v1843_v15 = vpop.permute.xlu0 %1842  ;;  %v1849_v39 = vadd.f32 %v1845_v5, %v1835_v56  ;;  %v2024_v3 = vrot.slane %v2018_v54, 1 }
 0x1e2   : > { %v1848_v26 = vadd.f32 %v1843_v15, %v1834_v42  ;;  %v1935_v5 = vsel %vm404_vm1, %v1932_v9, %v1934_v17  ;;  %v2462_v15 = vmul.f32 %v5135_v55, %v2461_v37  ;;  %v2020_v37 = vmul.f32 %v5165_v25, %v2017_v60 }
 0x1e3   : > { %2411 = vrot.lane.b32.xlu2 %v2408_v50, %s5884_s12 }
 0x1e4   : > { %v1862_v16 = vadd.f32 %v1857_v28, %v1848_v26  ;;  %v2447_v28 = vstv %s5314_s29  ;;  %v2523_v26 = vrot.slane %v2516_v40, 1  ;;  %s3529_s29 = sld [smem:[#allocation2 + $0x198]] }
 0x1e5   : > { %v2449_v43 = vmul.f32 %v5129_v7, %v2447_v28  ;;  %v2448_v19 = vmul.f32 %v5135_v55, %v2447_v28 }
 0x1e6   : > { %2432 = vrot.lane.b32.xlu1 %v2429_v36, %s5886_s11  ;;  %2413 = vrot.lane.b32.xlu0 %v2410_v49, %s5884_s12  ;;  %v1879_v0 = vadd.f32 %v1874_v62, %v1862_v16  ;;  %v1977_v29 = vpop.permute.xlu2 %1976  ;;  %v2520_v16 = vrot.slane %v2514_v2, 1  ;;  %v2572_v36 = vstv %s3559_s16  ;;  %s3569_s16 = sld [smem:[#allocation2 + $0x288]] }
 0x1e8   : > { %v1895_v53 = vpop.permute.xlu1 %1894 }
 0x1e9   : > { %v1859_v57 = vpop.permute.xlu0 %1858  ;;  %v1900_v59 = vadd.f32 %v1895_v53, %v1879_v0  ;;  %v2502_v0 = vrot.slane %v2495_v45, 1  ;;  %v1985_v53 = vmul.f32 %v5129_v7, %v1983_v58 }
 0x1ea   : > { %v1863_v51 = vadd.f32 %v1859_v57, %v1849_v39  ;;  %v2521_v39 = vrot.slane %v2515_v8, 1  ;;  %v2573_v57 = vmul.f32 %v5135_v55, %v2572_v36  ;;  %v2027_v8 = vrot.slane %v2020_v37, 1 }
 0x1eb   : > { %2434 = vrot.lane.b32.xlu2 %v2431_v14, %s5886_s11  ;;  %v2076_v40 = vstv %s3529_s29  ;;  %s5439_s29 = sld [smem:[#allocation5 + $0x4]] }
 0x1ec   : > { %v1880_v20 = vadd.f32 %v1876_v13, %v1863_v51  ;;  %v2524_v28 = vsel %vm344_vm0, %v2521_v39, %v2523_v26  ;;  %v5366_v13 = vmul.f32 %v5129_v7, %v2572_v36  ;;  %v2522_v4 = vsel %vm344_vm0, %v2520_v16, %v2521_v39 }
 0x1ed   : > { %v2554_v51 = vmul.f32 %v5165_v25, %v2551_v22  ;;  %v2077_v58 = vmul.f32 %v5135_v55, %v2076_v40  ;;  %v2078_v45 = vmul.f32 %v5129_v7, %v2076_v40  ;;  %v2646_v39 = vstv %s3565_s10  ;;  %s5447_s10 = sld [smem:[#allocation2 + $0x28a]] }
 0x1ee   : > { %v1901_v38 = vadd.f32 %v5302_v10, %v1880_v20  ;;  %2454 = vrot.lane.b32.xlu1 %v2449_v43, %s5884_s12  ;;  %2452 = vrot.lane.b32.xlu0 %v2448_v19, %s5884_s12  ;;  %v2009_v56 = vpop.permute.xlu2 %2008  ;;  %v2019_v43 = vmul.f32 %v5129_v7, %v2017_v60  ;;  %v2503_v19 = vsel %vm344_vm0, %v2500_v47, %v2502_v0  ;;  %v2580_v61 = vrot.slane %v5366_v13, 2 }
 0x1ef   : > { %v2552_v20 = vmul.f32 %v5135_v55, %v2551_v22  ;;  %v2561_v32 = vrot.slane %v2554_v51, 2  ;;  %v2083_v55 = vrot.slane %v2077_v58, 2  ;;  %v2667_v13 = vstv %s3566_s14  ;;  %s5456_s14 = sld [smem:[#allocation2 + $0x206]] }
 0x1f0   : > { %v1918_v6 = vpop.permute.xlu1 %1917  ;;  %v2025_v47 = vrot.slane %v2019_v43, 1  ;;  %v2669_v43 = vmul.f32 %v5180_v31, %v2667_v13 }
 0x1f1   : > { %v1916_v21 = vpop.permute.xlu0 %1915  ;;  %v1922_v10 = vadd.f32 %v1918_v6, %v1901_v38 }
 0x1f2   : > { %v1921_v44 = vadd.f32 %v1916_v21, %v1900_v59  ;;  %v2553_v59 = vmul.f32 %v5129_v7, %v2551_v22  ;;  %v2558_v21 = vrot.slane %v2552_v20, 2  ;;  %v2647_v22 = vmul.f32 %v5184_v63, %v2646_v39 }
 0x1f3   : > { %v1939_v46 = vadd.f32 %v1935_v5, %v1922_v10  ;;  %2466 = vrot.lane.b32.xlu2 %v2462_v15, %s5886_s11  ;;  %v2079_v7 = vmul.f32 %v5165_v25, %v2076_v40  ;;  %v2668_v20 = vmul.f32 %v5184_v63, %v2667_v13 }
 0x1f4   : > { %v1938_v42 = vadd.f32 %v1933_v23, %v1921_v44  ;;  %v2559_v9 = vrot.slane %v2553_v59, 2 }
 0x1f5   : > { %v2086_v51 = vrot.slane %v2079_v7, 2 }
 0x1f6   : > { %v1959_v11 = vadd.f32 %v1954_v12, %v1938_v42  ;;  %2504 = vrot.lane.b32.xlu1 %v2501_v48, %s5884_s12  ;;  %2468 = vrot.lane.b32.xlu0 %v2463_v24, %s5886_s11  ;;  %v5368_v52 = vpop.permute.xlu2 %2048  ;;  %v2562_v44 = vsel %vm404_vm1, %v2559_v9, %v2561_v32  ;;  %v2026_v24 = vsel %vm344_vm0, %v2024_v3, %v2025_v47 }
 0x1f7   : > { %v2560_v42 = vsel %vm404_vm1, %v2558_v21, %v2559_v9  ;;  %v2575_v48 = vmul.f32 %v5165_v25, %v2572_v36 }
 0x1f8   : > { %v1975_v49 = vpop.permute.xlu1 %1974 }
 0x1f9   : > { %v1956_v62 = vpop.permute.xlu0 %1955  ;;  %v1980_v12 = vadd.f32 %v1975_v49, %v1959_v11  ;;  %v2028_v11 = vsel %vm344_vm0, %v2025_v47, %v2027_v8  ;;  %v2582_v16 = vrot.slane %v2575_v48, 2  ;;  %v2674_v47 = vrot.slane %v2668_v20, 1  ;;  %v5476_v20 = vld [vmem:[%s4049_s9 + $0x18] sm:$0xff] }
 0x1fa   : > { %v1960_v50 = vadd.f32 %v1956_v62, %v1939_v46 }
 0x1fb   : > { %v1986_v30 = vadd.f32 %v1984_v33, %v1980_v12  ;;  %2506 = vrot.lane.b32.xlu2 %v2503_v19, %s5884_s12  ;;  %v2648_v12 = vmul.f32 %v5180_v31, %v2646_v39  ;;  %v2583_v0 = vsel %vm404_vm1, %v2580_v61, %v2582_v16  ;;  %v2670_v19 = vmul.f32 %v5206_v41, %v2667_v13 }
 0x1fc   : > { %v1981_v34 = vadd.f32 %v1977_v29, %v1960_v50  ;;  %v2579_v29 = vrot.slane %v2573_v57, 2  ;;  %v2084_v50 = vrot.slane %v2078_v45, 2  ;;  %v2615_v57 = vstv %s5391_s13  ;;  %s3574_s13 = sld [smem:[#allocation2 + $0x28d]] }
 0x1fd   : > { %v2617_v54 = vmul.f32 %v5180_v31, %v2615_v57  ;;  %v2616_v9 = vmul.f32 %v5184_v63, %v2615_v57  ;;  %v2677_v3 = vrot.slane %v2670_v19, 1  ;;  %v2753_v57 = vstv %s5447_s10  ;;  %s3545_s10 = sld [smem:[#allocation2 + $0x20c]] }
 0x1fe   : > { %2527 = vrot.lane.b32.xlu1 %v2524_v28, %s5886_s11  ;;  %2525 = vrot.lane.b32.xlu0 %v2522_v4, %s5886_s11  ;;  %v1987_v1 = vadd.f32 %v1985_v53, %v1981_v34  ;;  %v2106_v23 = vpop.permute.xlu2 %2105  ;;  %v2581_v10 = vsel %vm404_vm1, %v2579_v29, %v2580_v61  ;;  %v2653_v28 = vrot.slane %v2647_v22, 1  ;;  %v2654_v53 = vrot.slane %v2648_v12, 1 }
 0x1ff   : > { %v2085_v59 = vsel %vm404_vm1, %v2083_v55, %v2084_v50 }
 0x200   : > { %v1997_v38 = vpop.permute.xlu1 %1996 }
 0x201   : > { %v1995_v14 = vpop.permute.xlu0 %1994  ;;  %v2001_v18 = vadd.f32 %v1997_v38, %v1987_v1  ;;  %v2655_v1 = vsel %vm344_vm0, %v2653_v28, %v2654_v53  ;;  %v2649_v38 = vmul.f32 %v5206_v41, %v2646_v39  ;;  %v2135_v28 = vstv %s5439_s29  ;;  %s3577_s29 = sld [smem:[#allocation2 + $0x290]] }
 0x202   : > { %v2000_v6 = vadd.f32 %v1995_v14, %v1986_v30  ;;  %v2087_v30 = vsel %vm404_vm1, %v2084_v50, %v2086_v51  ;;  %v2675_v14 = vrot.slane %v2669_v43, 1  ;;  %v2798_v13 = vstv %s3574_s13  ;;  %v5472_v43 = vld [vmem:[%s4049_s9 + $0x20] sm:$0xff]  ;;  %s5536_s13 = sld [smem:[#allocation2 + $0x293]] }
 0x203   : > { %2563 = vrot.lane.b32.xlu2 %v2560_v42, %s5884_s12  ;;  %v2755_v19 = vmul.f32 %v5472_v43, %v2753_v57 }
 0x204   : > { %v2014_v17 = vadd.f32 %v2009_v56, %v2000_v6  ;;  %v2601_v56 = vstv %s5380_s7  ;;  %v2676_v8 = vsel %vm344_vm0, %v2674_v47, %v2675_v14  ;;  %s3536_s7 = sld [smem:[#allocation2 + $0x203]] }
 0x205   : > { %v2603_v36 = vmul.f32 %v5180_v31, %v2601_v56  ;;  %v2602_v49 = vmul.f32 %v5184_v63, %v2601_v56 }
 0x206   : > { %2584 = vrot.lane.b32.xlu1 %v2581_v10, %s5886_s11  ;;  %2565 = vrot.lane.b32.xlu0 %v2562_v44, %s5884_s12  ;;  %v2031_v2 = vadd.f32 %v2026_v24, %v2014_v17  ;;  %v2129_v62 = vpop.permute.xlu2 %2128  ;;  %v2705_v17 = vstv %s3568_s17  ;;  %v2678_v24 = vsel %vm344_vm0, %v2675_v14, %v2677_v3  ;;  %s3575_s17 = sld [smem:[#allocation2 + $0x28e]] }
 0x207   : > { %v2706_v45 = vmul.f32 %v5184_v63, %v2705_v17 }
 0x208   : > { %v2047_v5 = vpop.permute.xlu1 %2046 }
 0x209   : > { %v2011_v15 = vpop.permute.xlu0 %2010  ;;  %v2052_v26 = vadd.f32 %v2047_v5, %v2031_v2  ;;  %v2707_v5 = vmul.f32 %v5180_v31, %v2705_v17 }
 0x20a   : > { %v2015_v46 = vadd.f32 %v2011_v15, %v2001_v18  ;;  %v2726_v18 = vstv %s3569_s16  ;;  %v2708_v15 = vmul.f32 %v5206_v41, %v2705_v17  ;;  %v2171_v7 = vstv %s3536_s7  ;;  %s5463_s16 = sld [smem:[#allocation2 + $0x28b]] }
 0x20b   : > { %2586 = vrot.lane.b32.xlu2 %v2583_v0, %s5886_s11  ;;  %v2727_v40 = vmul.f32 %v5184_v63, %v2726_v18  ;;  %v2728_v42 = vmul.f32 %v5180_v31, %v2726_v18  ;;  %v2729_v0 = vmul.f32 %v5206_v41, %v2726_v18  ;;  %v2230_v18 = vstv %s5456_s14  ;;  %s5515_s7 = sld [smem:[#allocation2 + $0x209]] }
 0x20c   : > { %v2032_v33 = vadd.f32 %v2028_v11, %v2015_v46  ;;  %v2713_v46 = vrot.slane %v2707_v5, 2  ;;  %v2715_v16 = vrot.slane %v2708_v15, 2  ;;  %s3583_s14 = sld [smem:[#allocation2 + $0x296]] }
 0x20d   : > { %v2733_v39 = vrot.slane %v2727_v40, 2 }
 0x20e   : > { %v2053_v60 = vadd.f32 %v5368_v52, %v2032_v33  ;;  %2608 = vrot.lane.b32.xlu1 %v2603_v36, %s5884_s12  ;;  %2606 = vrot.lane.b32.xlu0 %v2602_v49, %s5884_s12  ;;  %v5414_v29 = vpop.permute.xlu2 %2162  ;;  %v2137_v33 = vstv %s5427_s27  ;;  %v2716_v55 = vsel %vm404_vm1, %v2713_v46, %v2715_v16  ;;  %s5491_s27 = sld [smem:[#allocation2 + $0x291]] }
 0x20f   : > { %v2138_v50 = vmul.f32 %v5184_v63, %v2137_v33 }
 0x210   : > { %v2070_v34 = vpop.permute.xlu1 %2069 }
 0x211   : > { %v2068_v4 = vpop.permute.xlu0 %2067  ;;  %v2074_v25 = vadd.f32 %v2070_v34, %v2053_v60  ;;  %v2172_v34 = vmul.f32 %v5184_v63, %v2171_v7 }
 0x212   : > { %v2073_v52 = vadd.f32 %v2068_v4, %v2052_v26  ;;  %v2734_v26 = vrot.slane %v2728_v42, 2  ;;  %v2173_v4 = vmul.f32 %v5180_v31, %v2171_v7 }
 0x213   : > { %v2091_v37 = vadd.f32 %v2087_v30, %v2074_v25  ;;  %2620 = vrot.lane.b32.xlu2 %v2616_v9, %s5886_s11  ;;  %v2174_v25 = vmul.f32 %v5206_v41, %v2171_v7 }
 0x214   : > { %v2090_v61 = vadd.f32 %v2085_v59, %v2073_v52  ;;  %v2735_v12 = vsel %vm404_vm1, %v2733_v39, %v2734_v26  ;;  %v2140_v52 = vadd.f32 %v2138_v50, %v2135_v28  ;;  %v2179_v14 = vrot.slane %v2173_v4, 1 }
 0x215   : > { %v2181_v3 = vrot.slane %v2174_v25, 1  ;;  %v2857_v4 = vstv %s3577_s29  ;;  %s5586_s29 = sld [smem:[#allocation2 + $0x29a]] }
 0x216   : > { %v2111_v32 = vadd.f32 %v2106_v23, %v2090_v61  ;;  %2658 = vrot.lane.b32.xlu1 %v2655_v1, %s5884_s12  ;;  %2622 = vrot.lane.b32.xlu0 %v2617_v54, %s5886_s11  ;;  %v2656_v23 = vrot.slane %v2649_v38, 1  ;;  %v5431_v48 = vpop.permute.xlu2 %2202  ;;  %v2736_v54 = vrot.slane %v2729_v0, 2  ;;  %v2754_v61 = vmul.f32 %v5476_v20, %v2753_v57 }
 0x217   : > { %v2799_v1 = vmul.f32 %v5476_v20, %v2798_v13  ;;  %v2178_v38 = vrot.slane %v2172_v34, 1 }
 0x218   : > { %v2127_v6 = vpop.permute.xlu1 %2126  ;;  %v2657_v58 = vsel %vm344_vm0, %v2654_v53, %v2656_v23  ;;  %v2139_v53 = vmul.f32 %v5180_v31, %v2137_v33  ;;  %v2819_v23 = vstv %s3575_s17  ;;  %s5555_s17 = sld [smem:[#allocation2 + $0x294]] }
 0x219   : > { %v2108_v21 = vpop.permute.xlu0 %2107  ;;  %v5423_v10 = vadd.f32 %v2127_v6, %v2111_v32  ;;  %v5483_v32 = vmul.f32 %v5472_v43, %v2798_v13  ;;  %v2805_v6 = vrot.slane %v2799_v1, 1 }
 0x21a   : > { %v2112_v44 = vadd.f32 %v2108_v21, %v2091_v37  ;;  %v2141_v9 = vadd.f32 %v2139_v53, %v2135_v28  ;;  %v2737_v37 = vsel %vm404_vm1, %v2734_v26, %v2736_v54  ;;  %v2821_v26 = vmul.f32 %v5472_v43, %v2819_v23 }
 0x21b   : > { %v3106_v2 = vmax.f32 %v5222_v27, %v5423_v10  ;;  %2660 = vrot.lane.b32.xlu2 %v2657_v58, %s5884_s12  ;;  %v2806_v17 = vrot.slane %v5483_v32, 1  ;;  %v2231_v58 = vmul.f32 %v5184_v63, %v2230_v18  ;;  %v2878_v53 = vstv %s5491_s27  ;;  %s5558_s27 = sld [smem:[#allocation2 + $0x297]] }
 0x21c   : > { %v5435_v56 = vadd.f32 %v2129_v62, %v2112_v44  ;;  %v2712_v62 = vrot.slane %v2706_v45, 2  ;;  %v2767_v44 = vstv %s5463_s16  ;;  %v2232_v45 = vmul.f32 %v5180_v31, %v2230_v18  ;;  %s3548_s16 = sld [smem:[#allocation2 + $0x20f]] }
 0x21d   : > { %v2769_v39 = vmul.f32 %v5472_v43, %v2767_v44  ;;  %v2768_v63 = vmul.f32 %v5476_v20, %v2767_v44  ;;  %v2827_v7 = vrot.slane %v2821_v26, 1 }
 0x21e   : > { %v3107_v11 = vmax.f32 %v5230_v35, %v5435_v56  ;;  %2681 = vrot.lane.b32.xlu1 %v2678_v24, %s5886_s11  ;;  %2679 = vrot.lane.b32.xlu0 %v2676_v8, %s5886_s11  ;;  %v5451_v22 = vpop.permute.xlu2 %2259  ;;  %v2714_v60 = vsel %vm404_vm1, %v2712_v62, %v2713_v46  ;;  %v2180_v24 = vsel %vm344_vm0, %v2178_v38, %v2179_v14  ;;  %v5502_v46 = vld [vmem:[%s4049_s9 + $0x28] sm:$0x3]  ;;  %v2238_v50 = vrot.slane %v2232_v45, 2 }
 0x21f   : > { %v2182_v8 = vsel %vm344_vm0, %v2179_v14, %v2181_v3  ;;  %v2822_v16 = vmul.f32 %v5502_v46, %v2819_v23  ;;  %v2233_v62 = vmul.f32 %v5206_v41, %v2230_v18  ;;  %v2860_v32 = vmul.f32 %v5502_v46, %v2857_v4 }
 0x220   : > { %v2151_v36 = vpop.permute.xlu1 %2150 }
 0x221   : > { %v2149_v49 = vpop.permute.xlu0 %2148  ;;  %v2155_v21 = vadd.f32 %v2151_v36, %v2141_v9  ;;  %v2820_v36 = vmul.f32 %v5476_v20, %v2819_v23  ;;  %v2240_v34 = vrot.slane %v2233_v62, 2  ;;  %v5526_v9 = vmul.f32 %v5472_v43, %v2878_v53 }
 0x222   : > { %v2154_v47 = vadd.f32 %v2149_v49, %v2140_v52  ;;  %v2867_v44 = vrot.slane %v2860_v32, 2  ;;  %v2289_v23 = vstv %s5515_s7  ;;  %v2881_v62 = vmul.f32 %v5502_v46, %v2878_v53  ;;  %s5590_s7 = sld [smem:[#allocation2 + $0x299]] }
 0x223   : > { %2717 = vrot.lane.b32.xlu2 %v2714_v60, %s5884_s12  ;;  %v2829_v60 = vrot.slane %v2822_v16, 1  ;;  %v2826_v0 = vrot.slane %v2820_v36, 1  ;;  %v2241_v38 = vsel %vm404_vm1, %v2238_v50, %v2240_v34  ;;  %v2290_v45 = vmul.f32 %v5476_v20, %v2289_v23 }
 0x224   : > { %v2168_v5 = vadd.f32 %v5414_v29, %v2154_v47  ;;  %v2807_v29 = vsel %vm344_vm0, %v2805_v6, %v2806_v17  ;;  %v2858_v47 = vmul.f32 %v5476_v20, %v2857_v4  ;;  %v2886_v6 = vrot.slane %v5526_v9, 2 }
 0x225   : > { %v2830_v54 = vsel %vm344_vm0, %v2827_v7, %v2829_v60 }
 0x226   : > { %2738 = vrot.lane.b32.xlu1 %v2735_v12, %s5886_s11  ;;  %2719 = vrot.lane.b32.xlu0 %v2716_v55, %s5884_s12  ;;  %v5480_v30 = vpop.permute.xlu2 %2282  ;;  %v2185_v31 = vadd.f32 %v2180_v24, %v2168_v5  ;;  %v2237_v12 = vrot.slane %v2231_v58, 2  ;;  %v2801_v55 = vmul.f32 %v5502_v46, %v2798_v13  ;;  %v2864_v5 = vrot.slane %v2858_v47, 2 }
 0x228   : > { %v2201_v59 = vpop.permute.xlu1 %2200  ;;  %v2808_v25 = vrot.slane %v2801_v55, 1  ;;  %v2239_v52 = vsel %vm404_vm1, %v2237_v12, %v2238_v50 }
 0x229   : > { %v2165_v51 = vpop.permute.xlu0 %2164  ;;  %v2206_v28 = vadd.f32 %v2201_v59, %v2185_v31  ;;  %v2828_v59 = vsel %vm344_vm0, %v2826_v0, %v2827_v7  ;;  %v2950_v7 = vstv %s3583_s14  ;;  %s5625_s14 = sld [smem:[#allocation2 + $0x218]] }
 0x22a   : > { %v2169_v15 = vadd.f32 %v2165_v51, %v2155_v21  ;;  %v2809_v3 = vsel %vm344_vm0, %v2806_v17, %v2808_v25 }
 0x22b   : > { %2740 = vrot.lane.b32.xlu2 %v2737_v37, %s5886_s11 }
 0x22c   : > { %v2186_v33 = vadd.f32 %v2182_v8, %v2169_v15 }
 0x22e   : > { %2760 = vrot.lane.b32.xlu1 %v2755_v19, %s5884_s12  ;;  %2758 = vrot.lane.b32.xlu0 %v2754_v61, %s5884_s12  ;;  %v5506_v49 = vpop.permute.xlu2 %2314  ;;  %v2207_v13 = vadd.f32 %v5431_v48, %v2186_v33  ;;  %v2879_v19 = vmul.f32 %v5476_v20, %v2878_v53  ;;  %v2859_v48 = vmul.f32 %v5472_v43, %v2857_v4  ;;  %v2888_v53 = vrot.slane %v2881_v62, 2 }
 0x230   : > { %v2224_v40 = vpop.permute.xlu1 %2223  ;;  %v2885_v37 = vrot.slane %v2879_v19, 2  ;;  %v2865_v21 = vrot.slane %v2859_v48, 2  ;;  %v2889_v32 = vsel %vm404_vm1, %v2886_v6, %v2888_v53 }
 0x231   : > { %v2222_v42 = vpop.permute.xlu0 %2221  ;;  %v2228_v1 = vadd.f32 %v2224_v40, %v2207_v13  ;;  %v5566_v13 = vld [vmem:[%s4049_s9 + $0x30] sm:$0xff] }
 0x232   : > { %v2227_v51 = vadd.f32 %v2222_v42, %v2206_v28  ;;  %v2323_v42 = vstv %s3545_s10  ;;  %v2868_v26 = vsel %vm404_vm1, %v2865_v21, %v2867_v44  ;;  %v2382_v28 = vstv %s3548_s16  ;;  %s5599_s10 = sld [smem:[#allocation2 + $0x212]]  ;;  %s3603_s16 = sshll.u32 %s3921_s21, 5 }
 0x233   : > { %2772 = vrot.lane.b32.xlu2 %v2768_v63, %s5886_s11  ;;  %v2245_v18 = vadd.f32 %v2241_v38, %v2228_v1  ;;  %v2324_v16 = vmul.f32 %v5476_v20, %v2323_v42  ;;  %v2325_v63 = vmul.f32 %v5472_v43, %v2323_v42  ;;  %v2326_v31 = vmul.f32 %v5502_v46, %v2323_v42  ;;  %v5595_v42 = vld [vmem:[%s4049_s9 + $0x40] sm:$0x3] }
 0x234   : > { %v2244_v14 = vadd.f32 %v2239_v52, %v2227_v51  ;;  %v2383_v19 = vmul.f32 %v5476_v20, %v2382_v28  ;;  %v2384_v48 = vmul.f32 %v5472_v43, %v2382_v28  ;;  %v2953_v62 = vmul.f32 %v5595_v42, %v2950_v7 }
 0x235   : > { %v2330_v12 = vrot.slane %v2324_v16, 1  ;;  %v2333_v34 = vrot.slane %v2326_v31, 1 }
 0x236   : > { %2810 = vrot.lane.b32.xlu1 %v2807_v29, %s5884_s12  ;;  %2774 = vrot.lane.b32.xlu0 %v2769_v39, %s5886_s11  ;;  %v5523_v61 = vpop.permute.xlu2 %2354  ;;  %v2265_v17 = vadd.f32 %v5451_v22, %v2244_v14  ;;  %v2887_v39 = vsel %vm404_vm1, %v2885_v37, %v2886_v6  ;;  %v2291_v22 = vmul.f32 %v5472_v43, %v2289_v23  ;;  %v2919_v37 = vstv %s5555_s17  ;;  %s3203_s17 = sshll.u32 %s5062_s15, 4  ;;  %s5647_s17 = int_to_ptr.vmem [resolvable:$true] %s3203_s17 }
 0x237   : > { %v2866_v29 = vsel %vm404_vm1, %v2864_v5, %v2865_v21  ;;  %v2385_v6 = vmul.f32 %v5502_v46, %v2382_v28  ;;  %v2960_v28 = vrot.slane %v2953_v62, 1 }
 0x238   : > { %v2281_v57 = vpop.permute.xlu1 %2280 }
 0x239   : > { %v2262_v41 = vpop.permute.xlu0 %2261  ;;  %v2286_v58 = vadd.f32 %v2281_v57, %v2265_v17  ;;  %v2331_v57 = vrot.slane %v2325_v63, 1  ;;  %v2392_v16 = vrot.slane %v2385_v6, 2 }
 0x23a   : > { %v2266_v40 = vadd.f32 %v2262_v41, %v2245_v18  ;;  %v5562_v41 = vld [vmem:[%s4049_s9 + $0x38] sm:$0xff]  ;;  %v2971_v18 = vstv %s5558_s27 }
 0x23b   : > { %2812 = vrot.lane.b32.xlu2 %v2809_v3, %s5884_s12  ;;  %v2292_v33 = vadd.f32 %v2290_v45, %v2286_v58  ;;  %v2332_v38 = vsel %vm344_vm0, %v2330_v12, %v2331_v57  ;;  %v2334_v14 = vsel %vm344_vm0, %v2331_v57, %v2333_v34  ;;  %v2921_v17 = vmul.f32 %v5562_v41, %v2919_v37 }
 0x23c   : > { %v2287_v36 = vadd.f32 %v5480_v30, %v2266_v40  ;;  %v2905_v30 = vstv %s5536_s13  ;;  %v2973_v40 = vmul.f32 %v5562_v41, %v2971_v18  ;;  %v2974_v5 = vmul.f32 %v5595_v42, %v2971_v18  ;;  %s3554_s13 = sld [smem:[#allocation2 + $0x215]] }
 0x23d   : > { %v2907_v4 = vmul.f32 %v5562_v41, %v2905_v30  ;;  %v2906_v51 = vmul.f32 %v5566_v13, %v2905_v30  ;;  %v2972_v58 = vmul.f32 %v5566_v13, %v2971_v18  ;;  %v2441_v34 = vstv %s5599_s10  ;;  %s3179_s10 = scalar_lea.sflag [#allocation3], %s5021_s8 }
 0x23e   : > { %2833 = vrot.lane.b32.xlu1 %v2830_v54, %s5886_s11  ;;  %2831 = vrot.lane.b32.xlu0 %v2828_v59, %s5886_s11  ;;  %v5541_v15 = vpop.permute.xlu2 %2411  ;;  %v2293_v60 = vadd.f32 %v2291_v22, %v2287_v36  ;;  %v2951_v54 = vmul.f32 %v5566_v13, %v2950_v7  ;;  %v5573_v59 = vmul.f32 %v5562_v41, %v2950_v7  ;;  %v2979_v31 = vrot.slane %v2973_v40, 1 }
 0x23f   : > { %v2920_v36 = vmul.f32 %v5566_v13, %v2919_v37  ;;  %v2978_v30 = vrot.slane %v2972_v58, 1 }
 0x240   : > { %v2303_v24 = vpop.permute.xlu1 %2302  ;;  %v2957_v3 = vrot.slane %v2951_v54, 1  ;;  %v2958_v47 = vrot.slane %v5573_v59, 1 }
 0x241   : > { %v2301_v8 = vpop.permute.xlu0 %2300  ;;  %v2307_v52 = vadd.f32 %v2303_v24, %v2293_v60  ;;  %v2389_v24 = vrot.slane %v2383_v19, 2  ;;  %v2980_v57 = vsel %vm344_vm0, %v2978_v30, %v2979_v31 }
 0x242   : > { %v2306_v0 = vadd.f32 %v2301_v8, %v2292_v33  ;;  %v2390_v8 = vrot.slane %v2384_v48, 2  ;;  %v2981_v33 = vrot.slane %v2974_v5, 1  ;;  %v2961_v48 = vsel %vm344_vm0, %v2958_v47, %v2960_v28 }
 0x243   : > { %2869 = vrot.lane.b32.xlu2 %v2866_v29, %s5884_s12 }
 0x244   : > { %v2320_v1 = vadd.f32 %v5506_v49, %v2306_v0  ;;  %v2391_v63 = vsel %vm404_vm1, %v2389_v24, %v2390_v8  ;;  %v2393_v60 = vsel %vm404_vm1, %v2390_v8, %v2392_v16  ;;  %v3009_v0 = vstv %s5590_s7  ;;  %s3202_s7 = scalar_lea.hbm %s5879_s3, %s3603_s16 }
 0x245   : > { %v2982_v53 = vsel %vm344_vm0, %v2979_v31, %v2981_v33  ;;  %v3011_v59 = vmul.f32 %v5562_v41, %v3009_v0  ;;  %v3012_v19 = vmul.f32 %v5595_v42, %v3009_v0  ;;  %s3205_s15 = sshll.u32 %s3202_s7, 4  ;;  %s3803_s7 = scalar_lea.hbm %s5879_s3, 64  ;;  %s3206_s15 = int_to_ptr.hbm [resolvable:$true] %s3205_s15 }
 0x246   : > { %2890 = vrot.lane.b32.xlu1 %v2887_v39, %s5886_s11  ;;  %2871 = vrot.lane.b32.xlu0 %v2868_v26, %s5884_s12  ;;  %v5569_v25 = vpop.permute.xlu2 %2434  ;;  %v2337_v44 = vadd.f32 %v2332_v38, %v2320_v1  ;;  %v2959_v26 = vsel %vm344_vm0, %v2957_v3, %v2958_v47  ;;  %v2442_v38 = vmul.f32 %v5566_v13, %v2441_v34  ;;  %v2475_v3 = vstv %s3554_s13  ;;  %s3797_s13 = sshra.s32 %s3206_s15, 4  ;;  %s3798_s13 = int_to_ptr.hbm [resolvable:$true] %s3797_s13 }
 0x247   : > { %v2476_v24 = vmul.f32 %v5566_v13, %v2475_v3  ;;  %v2477_v8 = vmul.f32 %v5562_v41, %v2475_v3  ;;  %s3799_s16 = scalar_lea.hbm %s3798_s13, 32  ;;  %p3804_p5 = scmp.lt.s32.totalorder %s3798_s13, %s5879_s3 }
 0x248   : > { %v2353_v55 = vpop.permute.xlu1 %2352  ;;  %p3800_p1 = scmp.ne.s32.totalorder %s3798_s13, %s3799_s16  ;;  %p3805_p6 = scmp.lt.s32.totalorder %s3803_s7, %s3799_s16 }
 0x249   : > { %v2317_v50 = vpop.permute.xlu0 %2316  ;;  %v2358_v39 = vadd.f32 %v2353_v55, %v2337_v44  ;;  %v3030_v55 = vstv %s5586_s29  ;;  %v2443_v44 = vmul.f32 %v5562_v41, %v2441_v34 }
 0x24a   : > { %v2321_v9 = vadd.f32 %v2317_v50, %v2307_v52  ;;  %v5621_v54 = vmul.f32 %v5562_v41, %v3030_v55  ;;  %p3801_p2 = pnand %p3800_p1, %p4010_p4  ;;  %p3806_p7 = por %p3805_p6, %p3804_p5 }
 0x24b   : > { %2892 = vrot.lane.b32.xlu2 %v2889_v32, %s5886_s11  ;;  %v3010_v32 = vmul.f32 %v5566_v13, %v3009_v0 }
 0x24c   : > { %v2338_v23 = vadd.f32 %v2334_v14, %v2321_v9  ;;  %v3038_v18 = vrot.slane %v5621_v54, 2  ;;  %p3802_p3 = pneg %p3801_p2 }
 0x24e   : > { %2912 = vrot.lane.b32.xlu1 %v2907_v4, %s5884_s12  ;;  %2910 = vrot.lane.b32.xlu0 %v2906_v51, %s5884_s12  ;;  %v5601_v45 = vpop.permute.xlu2 %2466  ;;  %v2359_v22 = vadd.f32 %v5523_v61, %v2338_v23  ;;  %v3031_v4 = vmul.f32 %v5566_v13, %v3030_v55  ;;  %v3016_v23 = vrot.slane %v3010_v32, 2  ;;  %p3807_p9 = pnand %p3806_p7, %p3802_p3 }
 0x250   : > { %v2376_v49 = vpop.permute.xlu1 %2375  ;;  %v3037_v14 = vrot.slane %v3031_v4, 2 }
 0x251   : > { %v2374_v21 = vpop.permute.xlu0 %2373  ;;  %v2380_v12 = vadd.f32 %v2376_v49, %v2359_v22  ;;  %v3017_v49 = vrot.slane %v3011_v59, 2  ;;  %v3033_v22 = vmul.f32 %v5595_v42, %v3030_v55 }
 0x252   : > { %v2379_v29 = vadd.f32 %v2374_v21, %v2358_v39  ;;  %v3039_v5 = vsel %vm404_vm1, %v3037_v14, %v3038_v18  ;;  %v2534_v39 = vstv %s5625_s14 }
 0x253   : > { %2924 = vrot.lane.b32.xlu2 %v2920_v36, %s5886_s11  ;;  %v2397_v52 = vadd.f32 %v2393_v60, %v2380_v12  ;;  %v3018_v36 = vsel %vm404_vm1, %v3016_v23, %v3017_v49 }
 0x254   : > { %v2396_v7 = vadd.f32 %v2391_v63, %v2379_v29 }
 0x256   : > { %2962 = vrot.lane.b32.xlu1 %v2959_v26, %s5884_s12  ;;  %2926 = vrot.lane.b32.xlu0 %v2921_v17, %s5886_s11  ;;  %v5618_v51 = vpop.permute.xlu2 %2506  ;;  %v2417_v1 = vadd.f32 %v5541_v15, %v2396_v7  ;;  %v3019_v15 = vrot.slane %v3012_v19, 2  ;;  %v2478_v17 = vmul.f32 %v5595_v42, %v2475_v3 }
 0x258   : > { %v2433_v50 = vpop.permute.xlu1 %2432  ;;  %v3020_v58 = vsel %vm404_vm1, %v3017_v49, %v3019_v15 }
 0x259   : > { %v2414_v61 = vpop.permute.xlu0 %2413  ;;  %v2438_v37 = vadd.f32 %v2433_v50, %v2417_v1 }
 0x25a   : > { %v2418_v9 = vadd.f32 %v2414_v61, %v2397_v52 }
 0x25b   : > { %2964 = vrot.lane.b32.xlu2 %v2961_v48, %s5884_s12 }
 0x25c   : > { %v2439_v47 = vadd.f32 %v5569_v25, %v2418_v9  ;;  %v2444_v25 = vadd.f32 %v2442_v38, %v2438_v37 }
 0x25e   : > { %2985 = vrot.lane.b32.xlu1 %v2982_v53, %s5886_s11  ;;  %2983 = vrot.lane.b32.xlu0 %v2980_v57, %s5886_s11  ;;  %v5645_v40 = vpop.permute.xlu2 %2563  ;;  %v2445_v26 = vadd.f32 %v2443_v44, %v2439_v47 }
 0x260   : > { %v2455_v21 = vpop.permute.xlu1 %2454 }
 0x261   : > { %v2453_v6 = vpop.permute.xlu0 %2452 }
 0x262   : > { %v2458_v16 = vadd.f32 %v2453_v6, %v2444_v25 }
 0x263   : > { %3810 = shalt.err (!%p3807_p9)
}
 0x264   : > { %s3935_s12 = smov 128   ;;  %s3936_s11 = smov 8   ;;  %v2482_v29 = vrot.slane %v2476_v24, 1  ;;  %v2483_v62 = vrot.slane %v2477_v8, 1  ;;  %v2485_v63 = vrot.slane %v2478_v17, 1  ;;  %v2459_v31 = vadd.f32 %v2455_v21, %v2445_v26 }
 0x265   : > { %3616 = dma.vmem_to_hbm [thread:$0]  (%p4010_p4), %s5647_s17, 512, %s3206_s15, %s3179_s10, %s3935_s12, %s3935_s12, %s3936_s11   ;;  %v2535_v12 = vmul.f32 %v5566_v13, %v2534_v39  ;;  %v2536_v55 = vmul.f32 %v5562_v41, %v2534_v39  ;;  %v2472_v50 = vadd.f32 %v5601_v45, %v2458_v16  ;;  %v3040_v61 = vrot.slane %v3033_v22, 2 }
 0x266   : > { %s5905_s0 = smov 126   ;;  %s5906_s27 = smov 127   ;;  %v2484_v0 = vsel %vm344_vm0, %v2482_v29, %v2483_v62  ;;  %v2486_v7 = vsel %vm344_vm0, %v2483_v62, %v2485_v63  ;;  %v2587_v28 = vpop.permute.xlu2 %2586  ;;  %v2537_v34 = vmul.f32 %v5595_v42, %v2534_v39  ;;  %v3750_v62 = vld [vmem:[%s4049_s9] sm:$0xff] }
 0x267   : > { %3042 = vrot.lane.b32.xlu1 %v3039_v5, %s5905_s0  ;;  %3023 = vrot.lane.b32.xlu0 %v3020_v58, %s5906_s27  ;;  %v2541_v53 = vrot.slane %v2535_v12, 2  ;;  %v2542_v57 = vrot.slane %v2536_v55, 2  ;;  %v2489_v4 = vadd.f32 %v2484_v0, %v2472_v50  ;;  %v3041_v59 = vsel %vm404_vm1, %v3038_v18, %v3040_v61  ;;  %s5690_s25 = sld [smem:[#allocation2 + $0x280]]  ;;  %s3605_s10 = smul.u32 48, %s5021_s8 }
 0x268   : > { %v2505_v33 = vpop.permute.xlu1 %2504  ;;  %3021 = vrot.lane.b32.xlu2 %v3018_v36, %s5906_s27  ;;  %v2544_v48 = vrot.slane %v2537_v34, 2  ;;  %s3564_s17 = sld [smem:[#allocation2 + $0x283]]  ;;  %s3607_s13 = smul.u32 48, %s3921_s21 }
 0x269   : > { %v2469_v30 = vpop.permute.xlu0 %2468  ;;  %v2510_v19 = vadd.f32 %v2505_v33, %v2489_v4  ;;  %v2543_v9 = vsel %vm404_vm1, %v2541_v53, %v2542_v57  ;;  %s3567_s15 = sld [smem:[#allocation2 + $0x286]]  ;;  %v3751_v33 = vld [vmem:[%s4049_s9 + $0x8] sm:$0xff]  ;;  %s273_s27 = scalar_lea.vmem [#allocation8], %s3605_s10 }
 0x26a   : > { %v2473_v60 = vadd.f32 %v2469_v30, %v2459_v31  ;;  %v2545_v49 = vsel %vm404_vm1, %v2542_v57, %v2544_v48  ;;  %v3752_v57 = vld [vmem:[%s4049_s9 + $0x10] sm:$0x3]  ;;  %s5742_s9 = sld [smem:[#allocation2 + $0x289]]  ;;  %s5760_s14 = scalar_lea.hbm %s5880_s4, %s3607_s13 }
 0x26b   : > { %s5751_s16 = sld [smem:[#allocation2 + $0x28c]]  ;;  %s3831_s29 = scalar_lea.hbm %s5880_s4, 96 }
 0x26c   : > { %v2490_v52 = vadd.f32 %v2486_v7, %v2473_v60 }
 0x26d   : > { %v2595_v36 = vstv %s5690_s25  ;;  %s3222_s25 = sshll.u32 %s273_s27, 4  ;;  %s5780_s25 = int_to_ptr.vmem [resolvable:$true] %s3222_s25 }
 0x26e   : > { %v2511_v32 = vadd.f32 %v5618_v51, %v2490_v52  ;;  %v5686_v14 = vpop.permute.xlu2 %2620  ;;  %v2596_v63 = vmul.f32 %v3750_v62, %v2595_v36  ;;  %v2597_v30 = vmul.f32 %v3751_v33, %v2595_v36 }
 0x270   : > { %v2528_v1 = vpop.permute.xlu1 %2527  ;;  %3044 = vrot.lane.b32.xlu2 %v3041_v59, %s5905_s0  ;;  %s5702_s0 = sld [smem:[#allocation5 + $0x5]] }
 0x271   : > { %v2526_v45 = vpop.permute.xlu0 %2525  ;;  %v2532_v3 = vadd.f32 %v2528_v1, %v2511_v32 }
 0x272   : > { %v2531_v38 = vadd.f32 %v2526_v45, %v2510_v19 }
 0x273   : > { %v2549_v18 = vadd.f32 %v2545_v49, %v2532_v3 }
 0x274   : > { %v2548_v37 = vadd.f32 %v2543_v9, %v2531_v38 }
 0x276   : > { %v2569_v54 = vadd.f32 %v5645_v40, %v2548_v37  ;;  %v5692_v44 = vpop.permute.xlu2 %2660  ;;  %v2688_v37 = vstv %s3567_s15  ;;  %s5777_s15 = sld [smem:[#allocation2 + $0x28f]] }
 0x278   : > { %v2585_v15 = vpop.permute.xlu1 %2584 }
 0x279   : > { %v2566_v21 = vpop.permute.xlu0 %2565  ;;  %v2590_v6 = vadd.f32 %v2585_v15, %v2569_v54 }
 0x27a   : > { %v2570_v47 = vadd.f32 %v2566_v21, %v2549_v18 }
 0x27b   : > { %v3108_v51 = vmax.f32 %v3106_v2, %v2590_v6 }
 0x27c   : > { %v2591_v23 = vadd.f32 %v2587_v28, %v2570_v47  ;;  %v2689_v47 = vmul.f32 %v3750_v62, %v2688_v37 }
 0x27d   : > { %v3110_v24 = vsub.f32 %v5222_v27, %v3108_v51  ;;  %v3116_v8 = vsub.f32 %v5423_v10, %v3108_v51  ;;  %v3122_v17 = vsub.f32 %v2590_v6, %v3108_v51  ;;  %v2690_v51 = vmul.f32 %v3751_v33, %v2688_v37 }
 0x27e   : > { %v3109_v40 = vmax.f32 %v3107_v11, %v2591_v23  ;;  %v5707_v22 = vpop.permute.xlu2 %2717 }
 0x27f   : > { %v3112_v25 = vmul.f32 1.442695, %v3110_v24  ;;  %v3118_v5 = vmul.f32 1.442695, %v3116_v8  ;;  %v3124_v58 = vmul.f32 1.442695, %v3122_v17  ;;  %v2691_v17 = vmul.f32 %v3752_v57, %v2688_v37 }
 0x280   : > { %v3111_v2 = vsub.f32 %v5230_v35, %v3109_v40  ;;  %v3117_v39 = vsub.f32 %v5435_v56, %v3109_v40  ;;  %v3123_v27 = vsub.f32 %v2591_v23, %v3109_v40  ;;  %v2609_v26 = vpop.permute.xlu1 %2608  ;;  %v2593_v35 = vstv %s5702_s0  ;;  %s3183_s0 = sand.u32 1, %s3998_s24  }
 0x281   : > { %v2607_v10 = vpop.permute.xlu0 %2606  ;;  %3710 = vpow2.f32 %v3112_v25  ;;  %v2629_v56 = vstv %s3564_s17  ;;  %v2598_v55 = vadd.f32 %v2596_v63, %v2593_v35  ;;  %v2599_v19 = vadd.f32 %v2597_v30, %v2593_v35  ;;  %s3224_s17 = sshll.u32 %s5760_s14, 4  ;;  %s5792_s24 = scalar_lea.sflag [#allocation9], %s3183_s0  ;;  %s3225_s17 = int_to_ptr.hbm [resolvable:$true] %s3224_s17 }
 0x282   : > { %v3114_v16 = vmul.f32 1.442695, %v3111_v2  ;;  %3712 = vpow2.f32 %v3118_v5  ;;  %v3120_v11 = vmul.f32 1.442695, %v3117_v39  ;;  %v3126_v29 = vmul.f32 1.442695, %v3123_v27 }
 0x283   : > { %3714 = vpow2.f32 %v3124_v58  ;;  %v2630_v7 = vmul.f32 %v3750_v62, %v2629_v56  ;;  %v2631_v28 = vmul.f32 %v3751_v33, %v2629_v56  ;;  %v2632_v34 = vmul.f32 %v3752_v57, %v2629_v56 }
 0x284   : > { %3716 = vpow2.f32 %v3114_v16  ;;  %v2612_v45 = vadd.f32 %v2607_v10, %v2598_v55  ;;  %v2613_v49 = vadd.f32 %v2609_v26, %v2599_v19  ;;  %v2695_v58 = vrot.slane %v2689_v47, 2 }
 0x285   : > { %3718 = vpow2.f32 %v3120_v11  ;;  %v2636_v48 = vrot.slane %v2630_v7, 1  ;;  %v2637_v32 = vrot.slane %v2631_v28, 1  ;;  %v2639_v3 = vrot.slane %v2632_v34, 1 }
 0x286   : > { %3720 = vpow2.f32 %v3126_v29  ;;  %v5723_v4 = vpop.permute.xlu2 %2740  ;;  %v2626_v54 = vadd.f32 %v5686_v14, %v2612_v45  ;;  %v2696_v2 = vrot.slane %v2690_v51, 2  ;;  %v2698_v16 = vrot.slane %v2691_v17, 2 }
 0x287   : > { %v5711_v31 = vpop.eup %3710  ;;  %v2638_v21 = vsel %vm344_vm0, %v2636_v48, %v2637_v32  ;;  %v2640_v23 = vsel %vm344_vm0, %v2637_v32, %v2639_v3  ;;  %v2781_v47 = vstv %s5751_s16 }
 0x288   : > { %v5714_v12 = vpop.eup %3712  ;;  %v2659_v50 = vpop.permute.xlu1 %2658  ;;  %v2643_v25 = vadd.f32 %v2638_v21, %v2626_v54  ;;  %v2697_v33 = vsel %vm404_vm1, %v2695_v58, %v2696_v2  ;;  %v2699_v34 = vsel %vm404_vm1, %v2696_v2, %v2698_v16  ;;  %v2747_v54 = vstv %s5742_s9  ;;  %s3825_s9 = sshra.s32 %s3225_s17, 4  ;;  %s3826_s9 = int_to_ptr.hbm [resolvable:$true] %s3825_s9 }
 0x289   : > { %v2623_v60 = vpop.permute.xlu0 %2622  ;;  %v5716_v61 = vpop.eup %3714  ;;  %v3128_v0 = vadd.f32 %v5714_v12, %v5711_v31  ;;  %v2782_v51 = vmul.f32 %v5476_v20, %v2781_v47  ;;  %s3827_s10 = scalar_lea.hbm %s3826_s9, 48  ;;  %p3832_p13 = scmp.lt.s32.totalorder %s3826_s9, %s5880_s4 }
 0x28a   : > { %v5720_v53 = vpop.eup %3716  ;;  %v2627_v6 = vadd.f32 %v2623_v60, %v2613_v49  ;;  %v2664_v26 = vadd.f32 %v2659_v50, %v2643_v25  ;;  %p3828_p10 = scmp.ne.s32.totalorder %s3826_s9, %s3827_s10  ;;  %p3833_p0 = scmp.lt.s32.totalorder %s3831_s29, %s3827_s10 }
 0x28b   : > { %v5725_v52 = vpop.eup %3718  ;;  %v3130_v59 = vadd.f32 %v5716_v61, %v3128_v0 }
 0x28c   : > { %v3129_v1 = vadd.f32 %v5725_v52, %v5720_v53  ;;  %v5730_v9 = vpop.eup %3720  ;;  %v2644_v5 = vadd.f32 %v2640_v23, %v2627_v6  ;;  %v2748_v6 = vmul.f32 %v5476_v20, %v2747_v54  ;;  %v2783_v23 = vmul.f32 %v5472_v43, %v2781_v47  ;;  %p3829_p11 = pnand %p3828_p10, %p4010_p4  ;;  %p3834_p1 = por %p3833_p0, %p3832_p13 }
 0x28d   : > { %3722 = vrcp.f32 %v3130_v59  ;;  %v3143_v27 = vand.u32 2147483648, %v3130_v59  ;;  %v3141_v11 = vand.u32 2147483647, %v3130_v59  ;;  %vm3137_vm12 = vweird.f32 %v3130_v59 }
 0x28e   : > { %v5733_v38 = vadd.f32 %v5730_v9, %v3129_v1  ;;  %v5739_v24 = vpop.permute.xlu2 %2772  ;;  %v2665_v56 = vadd.f32 %v5692_v44, %v2644_v5  ;;  %p3830_p12 = pneg %p3829_p11 }
 0x28f   : > { %v3144_v55 = vor.u32 1.1754944e-38, %v3143_v27  ;;  %vm3142_vm15 = vcmp.eq.f32.partialorder %v3141_v11, 8.507059e+37 }
 0x290   : > { %3724 = vrcp.f32 %v5733_v38  ;;  %v2682_v18 = vpop.permute.xlu1 %2681  ;;  %v3158_v50 = vand.u32 2147483648, %v5733_v38  ;;  %v3156_v0 = vand.u32 2147483647, %v5733_v38  ;;  %vm3152_vm3 = vweird.f32 %v5733_v38  ;;  %p3835_p2 = pnand %p3834_p1, %p3830_p12 }
 0x291   : > { %v2680_v15 = vpop.permute.xlu0 %2679  ;;  %v2686_v7 = vadd.f32 %v2682_v18, %v2665_v56 }
 0x292   : > { %v2685_v29 = vadd.f32 %v2680_v15, %v2664_v26  ;;  %v3159_v32 = vor.u32 1.1754944e-38, %v3158_v50  ;;  %vm3157_vm5 = vcmp.eq.f32.partialorder %v3156_v0, 8.507059e+37 }
 0x293   : > { %v3723_v8 = vpop.eup %3722  ;;  %v2703_v37 = vadd.f32 %v2699_v34, %v2686_v7 }
 0x294   : > { %v3133_v40 = vmul.f32 %v3723_v8, %v3130_v59  ;;  %vm3138_vm11 = vweird.f32 %v3723_v8  ;;  %v2702_v57 = vadd.f32 %v2697_v33, %v2685_v29 }
 0x295   : > { %vm3139_vm13 = vmor %vm3137_vm12, %vm3138_vm11 }
 0x296   : > { %v3725_v14 = vpop.eup %3724  ;;  %v3134_v39 = vsub.f32 1.0, %v3133_v40  ;;  %v5753_v28 = vpop.permute.xlu2 %2812  ;;  %v2723_v49 = vadd.f32 %v5707_v22, %v2702_v57 }
 0x297   : > { %v3148_v10 = vmul.f32 %v3725_v14, %v5733_v38  ;;  %vm3153_vm14 = vweird.f32 %v3725_v14 }
 0x298   : > { %v3135_v36 = vmul.f32 %v3723_v8, %v3134_v39  ;;  %v2739_v62 = vpop.permute.xlu1 %2738  ;;  %vm3154_vm4 = vmor %vm3152_vm3, %vm3153_vm14 }
 0x299   : > { %v2720_v63 = vpop.permute.xlu0 %2719  ;;  %v3149_v35 = vsub.f32 1.0, %v3148_v10  ;;  %v2744_v22 = vadd.f32 %v2739_v62, %v2723_v49 }
 0x29a   : > { %v3136_v30 = vadd.f32 %v3723_v8, %v3135_v36  ;;  %v2724_v21 = vadd.f32 %v2720_v63, %v2703_v37 }
 0x29b   : > { %v3150_v60 = vmul.f32 %v3725_v14, %v3149_v35 }
 0x29c   : > { %v3140_v44 = vsel %vm3139_vm13, %v3723_v8, %v3136_v30  ;;  %v2784_v8 = vmul.f32 %v5502_v46, %v2781_v47 }
 0x29d   : > { %v3145_v59 = vsel %vm3142_vm15, %v3144_v55, %v3140_v44  ;;  %v3151_v19 = vadd.f32 %v3725_v14, %v3150_v60 }
 0x29e   : > { %v3162_v1 = vmul.f32 %v5711_v31, %v3145_v59  ;;  %v3166_v45 = vmul.f32 %v5714_v12, %v3145_v59  ;;  %v3171_v48 = vmul.f32 %v5716_v61, %v3145_v59 }
 0x29f   : > { %v3155_v3 = vsel %vm3154_vm4, %v3725_v14, %v3151_v19 }
 0x2a0   : > { %v3160_v38 = vsel %vm3157_vm5, %v3159_v32, %v3155_v3  ;;  %v2761_v31 = vpop.permute.xlu1 %2760  ;;  %3164 = vst.msk [vmem:[%s273_s27] sm:$0xff] %vm3098_vm2, %v3162_v1 }
 0x2a1   : > { %v2759_v18 = vpop.permute.xlu0 %2758  ;;  %v3163_v12 = vmul.f32 %v5720_v53, %v3160_v38  ;;  %v3167_v61 = vmul.f32 %v5725_v52, %v3160_v38  ;;  %v3172_v15 = vmul.f32 %v5730_v9, %v3160_v38  ;;  %3590 = vst.msk [vmem:[%s273_s27 + $0x10] sm:$0xff] %vm3098_vm2, %v3166_v45  ;;  %v2745_v53 = vadd.f32 %v5723_v4, %v2724_v21  ;;  %v2870_v9 = vpop.permute.xlu2 %2869 }
 0x2a2   : > { %3592 = vst.msk [vmem:[%s273_s27 + $0x20] sm:$0xff] %vm3098_vm2, %v3171_v48  ;;  %v2749_v52 = vmul.f32 %v5472_v43, %v2747_v54 }
 0x2a3   : > { %3165 = vst.msk [vmem:[%s273_s27 + $0x8] sm:$0xff] %vm3098_vm2, %v3163_v12 }
 0x2a4   : > { %3591 = vst.msk [vmem:[%s273_s27 + $0x18] sm:$0xff] %vm3098_vm2, %v3167_v61 }
 0x2a5   : > { %3593 = vst.msk [vmem:[%s273_s27 + $0x28] sm:$0xff] %vm3098_vm2, %v3172_v15 }
 0x2a6   : > { %3838 = shalt.err (!%p3835_p2)
}
 0x2a7   : > { %3617 = dma.vmem_to_hbm [thread:$0]  (%p4010_p4), %s5780_s25, 768, %s3225_s17, %s5792_s24, %s3935_s12, %s3935_s12, %s3936_s11   ;;  %v2750_v4 = vadd.f32 %v2748_v6, %v2744_v22  ;;  %v2751_v25 = vadd.f32 %v2749_v52, %v2745_v53  ;;  %v2788_v58 = vrot.slane %v2782_v51, 1  ;;  %v2789_v2 = vrot.slane %v2783_v23, 1 }
 0x2a8   : > { %v2811_v17 = vpop.permute.xlu1 %2810  ;;  %v2791_v14 = vrot.slane %v2784_v8, 1  ;;  %v2840_v27 = vstv %s5777_s15  ;;  %s3579_s27 = sld [smem:[#allocation2 + $0x292]]  ;;  %s3420_s17 = sshll.u32 %s5021_s8, 4 }
 0x2a9   : > { %v2775_v40 = vpop.permute.xlu0 %2774  ;;  %v2764_v5 = vadd.f32 %v2759_v18, %v2750_v4  ;;  %v2765_v39 = vadd.f32 %v2761_v31, %v2751_v25  ;;  %v2790_v16 = vsel %vm344_vm0, %v2788_v58, %v2789_v2  ;;  %v2841_v11 = vmul.f32 %v5476_v20, %v2840_v27  ;;  %v2893_v62 = vpop.permute.xlu2 %2892  ;;  %s3582_s25 = sld [smem:[#allocation2 + $0x295]]  ;;  %s3604_s15 = sshll.u32 %s3921_s21, 4 }
 0x2aa   : > { %v2792_v36 = vsel %vm344_vm0, %v2789_v2, %v2791_v14  ;;  %v2842_v29 = vmul.f32 %v5472_v43, %v2840_v27  ;;  %v2843_v56 = vmul.f32 %v5502_v46, %v2840_v27  ;;  %s3585_s0 = sld [smem:[#allocation2 + $0x298]]  ;;  %s3240_s13 = scalar_lea.hbm %s5881_s5, %s3604_s15 }
 0x2ab   : > { %v2778_v26 = vadd.f32 %v5739_v24, %v2764_v5  ;;  %v2779_v10 = vadd.f32 %v2775_v40, %v2765_v39  ;;  %v2847_v55 = vrot.slane %v2841_v11, 2  ;;  %s280_s16 = scalar_lea.vmem [#allocation10], %s3420_s17  ;;  %s3243_s7 = sshll.u32 %s3240_s13, 4  ;;  %s3244_s7 = int_to_ptr.hbm [resolvable:$true] %s3243_s7 }
 0x2ac   : > { %v2848_v50 = vrot.slane %v2842_v29, 2  ;;  %v2850_v24 = vrot.slane %v2843_v56, 2  ;;  %s3241_s29 = sshll.u32 %s280_s16, 4  ;;  %s3853_s21 = sshra.s32 %s3244_s7, 4  ;;  %s3242_s29 = int_to_ptr.vmem [resolvable:$true] %s3241_s29  ;;  %s3854_s21 = int_to_ptr.hbm [resolvable:$true] %s3853_s21 }
 0x2ad   : > { %v2795_v33 = vadd.f32 %v2790_v16, %v2778_v26  ;;  %v2796_v30 = vadd.f32 %v2792_v36, %v2779_v10  ;;  %s3855_s8 = scalar_lea.hbm %s3854_s21, 16  ;;  %p3860_p7 = scmp.lt.s32.totalorder %s3854_s21, %s5881_s5 }
 0x2ae   : > { %v2849_v44 = vsel %vm404_vm1, %v2847_v55, %v2848_v50  ;;  %v2851_v57 = vsel %vm404_vm1, %v2848_v50, %v2850_v24  ;;  %v2899_v1 = vstv %s3579_s27  ;;  %p3856_p3 = scmp.ne.s32.totalorder %s3854_s21, %s3855_s8 }
 0x2af   : > { %v2816_v60 = vadd.f32 %v2811_v17, %v2795_v33  ;;  %v2817_v0 = vadd.f32 %v5753_v28, %v2796_v30  ;;  %v2900_v3 = vmul.f32 %v5566_v13, %v2899_v1  ;;  %v2933_v28 = vstv %s3582_s25  ;;  %s3859_s25 = scalar_lea.hbm %s5881_s5, 32 }
 0x2b0   : > { %v2834_v63 = vpop.permute.xlu1 %2833  ;;  %v2901_v54 = vmul.f32 %v5562_v41, %v2899_v1  ;;  %v2934_v31 = vmul.f32 %v5566_v13, %v2933_v28  ;;  %v2935_v18 = vmul.f32 %v5562_v41, %v2933_v28  ;;  %v2936_v12 = vmul.f32 %v5595_v42, %v2933_v28  ;;  %p3857_p5 = pnand %p3856_p3, %p4010_p4  ;;  %p3861_p9 = scmp.lt.s32.totalorder %s3859_s25, %s3855_s8 }
 0x2b1   : > { %v2832_v35 = vpop.permute.xlu0 %2831  ;;  %v2838_v20 = vadd.f32 %v2834_v63, %v2817_v0  ;;  %v2925_v46 = vpop.permute.xlu2 %2924  ;;  %v2992_v6 = vstv %s3585_s0 }
 0x2b2   : > { %v2837_v7 = vadd.f32 %v2832_v35, %v2816_v60  ;;  %v2940_v47 = vrot.slane %v2934_v31, 1  ;;  %v2941_v53 = vrot.slane %v2935_v18, 1  ;;  %v2943_v52 = vrot.slane %v2936_v12, 1  ;;  %p3858_p6 = pneg %p3857_p5  ;;  %p3862_p10 = por %p3861_p9, %p3860_p7 }
 0x2b3   : > { %v2855_v19 = vadd.f32 %v2851_v57, %v2838_v20  ;;  %v2993_v8 = vmul.f32 %v5566_v13, %v2992_v6  ;;  %v2994_v4 = vmul.f32 %v5562_v41, %v2992_v6  ;;  %v2995_v14 = vmul.f32 %v5595_v42, %v2992_v6 }
 0x2b4   : > { %v2854_v59 = vadd.f32 %v2849_v44, %v2837_v7  ;;  %v2942_v25 = vsel %vm344_vm0, %v2940_v47, %v2941_v53  ;;  %v2944_v5 = vsel %vm344_vm0, %v2941_v53, %v2943_v52  ;;  %p3863_p11 = pnand %p3862_p10, %p3858_p6 }
 0x2b5   : > { %v2999_v58 = vrot.slane %v2993_v8, 2  ;;  %v3000_v2 = vrot.slane %v2994_v4, 2  ;;  %v3002_v36 = vrot.slane %v2995_v14, 2 }
 0x2b6   : > { %v2875_v45 = vadd.f32 %v2870_v9, %v2854_v59 }
 0x2b7   : > { %v3001_v41 = vsel %vm404_vm1, %v2999_v58, %v3000_v2  ;;  %v3003_v35 = vsel %vm404_vm1, %v3000_v2, %v3002_v36 }
 0x2b8   : > { %v2891_v43 = vpop.permute.xlu1 %2890 }
 0x2b9   : > { %v2872_v34 = vpop.permute.xlu0 %2871  ;;  %v2896_v32 = vadd.f32 %v2891_v43, %v2875_v45  ;;  %v2965_v15 = vpop.permute.xlu2 %2964 }
 0x2ba   : > { %v2876_v48 = vadd.f32 %v2872_v34, %v2855_v19 }
 0x2bb   : > { %v2902_v61 = vadd.f32 %v2900_v3, %v2896_v32 }
 0x2bc   : > { %v2897_v49 = vadd.f32 %v2893_v62, %v2876_v48 }
 0x2be   : > { %v2903_v21 = vadd.f32 %v2901_v54, %v2897_v49 }
 0x2c0   : > { %v2913_v37 = vpop.permute.xlu1 %2912 }
 0x2c1   : > { %v2911_v38 = vpop.permute.xlu0 %2910  ;;  %v2917_v9 = vadd.f32 %v2913_v37, %v2903_v21 }
 0x2c2   : > { %v2916_v22 = vadd.f32 %v2911_v38, %v2902_v61  ;;  %v3022_v26 = vpop.permute.xlu2 %3021 }
 0x2c4   : > { %v2930_v17 = vadd.f32 %v2925_v46, %v2916_v22 }
 0x2c6   : > { %v2947_v39 = vadd.f32 %v2942_v25, %v2930_v17 }
 0x2c8   : > { %v2963_v51 = vpop.permute.xlu1 %2962 }
 0x2c9   : > { %v2927_v23 = vpop.permute.xlu0 %2926  ;;  %v2968_v10 = vadd.f32 %v2963_v51, %v2947_v39 }
 0x2ca   : > { %v2931_v40 = vadd.f32 %v2927_v23, %v2917_v9  ;;  %v3045_v33 = vpop.permute.xlu2 %3044 }
 0x2cc   : > { %v2948_v27 = vadd.f32 %v2944_v5, %v2931_v40 }
 0x2ce   : > { %v2969_v11 = vadd.f32 %v2965_v15, %v2948_v27 }
 0x2d0   : > { %v2986_v16 = vpop.permute.xlu1 %2985 }
 0x2d1   : > { %v2984_v13 = vpop.permute.xlu0 %2983  ;;  %v2990_v62 = vadd.f32 %v2986_v16, %v2969_v11 }
 0x2d2   : > { %v2989_v29 = vadd.f32 %v2984_v13, %v2968_v10 }
 0x2d3   : > { %v3007_v56 = vadd.f32 %v3003_v35, %v2990_v62 }
 0x2d4   : > { %v3006_v63 = vadd.f32 %v3001_v41, %v2989_v29 }
 0x2d6   : > { %v3027_v42 = vadd.f32 %v3022_v26, %v3006_v63 }
 0x2d9   : > { %v3043_v30 = vpop.permute.xlu1 %3042  ;;  %v3024_v55 = vpop.permute.xlu0 %3023 }
 0x2da   : > { %v3048_v50 = vadd.f32 %v3043_v30, %v3027_v42  ;;  %v3028_v60 = vadd.f32 %v3024_v55, %v3007_v56 }
 0x2dc   : > { %3176 = vst.msk [vmem:[%s280_s16] sm:$0xff] %vm3098_vm2, %v3048_v50  ;;  %v3049_v24 = vadd.f32 %v3045_v33, %v3028_v60 }
 0x2de   : > { %3177 = vst.msk [vmem:[%s280_s16 + $0x8] sm:$0xff] %vm3098_vm2, %v3049_v24 }
 0x2df   : > { %3866 = shalt.err (!%p3863_p11)
}
 0x2e0   : > { %3618 = dma.vmem_to_hbm [thread:$0]  (%p4010_p4), %s3242_s29, 256, %s3244_s7, %s5792_s24, %s3935_s12, %s3935_s12, %s3936_s11  }
 0x2e1 PF: > { %p3643_p12 = scmp.ge.s32.totalorder %s3929_s23, 2  ;;  %s3258_s15 = sand.u32 1, %s3909_s18  }
 0x2e2   : > { %s3259_s9 = scalar_lea.sflag [#allocation3], %s3258_s15 }
 0x2e3   : > { %p3630_p13 = pnand %p3643_p12, %p4019_p8 }
 0x2e5   : > { %p3631_p0 = pneg %p3630_p13 }
 0x2e7   : > { %3900 = dma.done.wait (%p3631_p0), %s3259_s9, 512  }
 0x2e8   : > { %3902 = vsyncadd (%p3631_p0), %s3259_s9, 4294966784  ;;  %s5907_s10 = sadd.s32 4294967294, %s3929_s23  }
 0x2e9   : > { %s3268_s28 = sand.u32 1, %s5907_s10  }
 0x2ea   : > { %s3269_s13 = scalar_lea.sflag [#allocation9], %s3268_s28 }
 0x2eb   : > { %3904 = dma.done.wait (%p3631_p0), %s3269_s13, 1024  }
 0x2ec   : > { %3906 = vsyncadd (%p3631_p0), %s3269_s13, 4294966272  ;;  %s24_s23 = sadd.s32 1, %s3929_s23   ;;  %s5908_s18 = smov %s3913_s19 }
 0x2ed   : > { %p21_p4 = scmp.ge.s32.totalorder %s24_s23, 4   ;;  %s5909_s19 = smov %s3917_s20 }
 0x2ee   : > { %s5910_s20 = smov %s4025_s6  ;;  %s5911_s21 = smov %s3925_s22 }
 0x2ef   : > { %s5912_s22 = smov %s5914_s26  ;;  %23 = sbr.rel (!%p21_p4) target bundleno = 10 (0xa), region = 112 }
 0x2f4   :  { %3285 = vsyncpa [#allocation3], 1 }
 0x2f5   :  { %3287 = vsyncpa [#allocation3 + $0x1], 1 }
 0x2f6   :  { %3288 = vsyncpa [#allocation9], 1 }
 0x2f7   :  { %3290 = vsyncpa [#allocation9 + $0x1], 1 }
 0x2f8   :  { %3291 = vsyncpa [#allocation4], 1 }
 0x2f9   :  { %3293 = vsyncpa [#allocation4 + $0x1], 1 }
 0x2fa   :  { %3294 = vsyncpa [#allocation6], 1 }

</bundles_post_ra>
